<compile_context>
chip_gen: v5e
topology: v5e:2x2
jax: 0.10.0
libtpu: 0.0.40
codegen_flags: <defaults>
</compile_context>

<pallas_src>
import jax
import jax.numpy as jnp
from jax.experimental import pallas as pl
from jax.experimental.pallas import tpu as pltpu

_NEG_SLOPE = 0.01            # nn.LeakyReLU() default slope
_VMEM_LIMIT = 32 * 1024 * 1024


def _leaky(x):
    return jnp.where(x >= 0, x, _NEG_SLOPE * x)


# ----------------------------------------------------------------------------
# Trace-time constant construction (banded conv operators)
# ----------------------------------------------------------------------------
def _make_col_band(w, w_in, stride=1, up=1):
    """w: (3, 3, Cin, Cout) -> (3, w_in*Cin, w_out*Cout) column band matrices.

    Folds 'same' zero padding, column stride and nearest column-upsample.
    band[dy][src_col*Cin + ci, j*Cout + co] += w[dy, dx, ci, co]  where
    src_col = (j*stride + dx - 1) // up when that column is in range.
    """
    kh, kw, cin, cout = w.shape
    wo = (w_in * up) // stride
    j = jnp.arange(wo)
    bands = []
    for dy in range(kh):
        acc = jnp.zeros((w_in * cin, wo * cout), w.dtype)
        for dx in range(kw):
            upcol = j * stride + dx - 1
            valid = (upcol >= 0) & (upcol < w_in * up)
            src = jnp.clip(jnp.where(valid, upcol, 0) // up, 0, w_in - 1)
            sel = jnp.zeros((w_in, wo), w.dtype).at[src, j].set(valid.astype(w.dtype))
            acc = acc + jnp.kron(sel, w[dy, dx])
        bands.append(acc)
    return jnp.stack(bands, 0)


def _make_row_shift(h_in, stride=1, up=1):
    """(3, h_out, h_in) 0/1 row selection matrices (pad / stride / upsample for rows)."""
    h_out = (h_in * up) // stride
    i = jnp.arange(h_out)
    mats = []
    for dy in range(3):
        uprow = i * stride + dy - 1
        valid = (uprow >= 0) & (uprow < h_in * up)
        src = jnp.clip(jnp.where(valid, uprow, 0) // up, 0, h_in - 1)
        mats.append(jnp.zeros((h_out, h_in), jnp.float32).at[i, src].set(
            valid.astype(jnp.float32)))
    return jnp.stack(mats, 0)


def _prep_conv(w, b, w_in, h_in, stride=1, up=1):
    wo = (w_in * up) // stride
    return {
        "band": _make_col_band(w, w_in, stride, up).astype(jnp.bfloat16),
        "rows": _make_row_shift(h_in, stride, up).astype(jnp.bfloat16),
        "bias": jnp.tile(b, (wo,)).reshape(1, -1).astype(jnp.float32),
    }


def _prep_lstm(p, cin, K, hh, ww):
    """Split the [x, h] conv weight into gate-major W_x / W_h column bands."""
    w, b = p["w"], p["b"]                               # (3,3,cin+K,4K), (4K,)
    wx_raw, wh_raw = w[:, :, :cin, :], w[:, :, cin:, :]

    def gate_bands(wpart):
        return jnp.concatenate(
            [_make_col_band(wpart[..., g * K:(g + 1) * K], ww) for g in range(4)], axis=2)

    bias = jnp.concatenate(
        [jnp.tile(b[g * K:(g + 1) * K], (ww,)) for g in range(4)]).reshape(1, -1)
    return {
        "wx": gate_bands(wx_raw).astype(jnp.bfloat16),   # (3, ww*cin, 4*ww*K)
        "wh": gate_bands(wh_raw).astype(jnp.bfloat16),   # (3, ww*K,  4*ww*K)
        "bias": bias.astype(jnp.float32),                # (1, 4*ww*K)
        "wci": p["wci"].reshape(hh, ww * K).astype(jnp.float32),
        "wcf": p["wcf"].reshape(hh, ww * K).astype(jnp.float32),
        "wco": p["wco"].reshape(hh, ww * K).astype(jnp.float32),
        "rows": _make_row_shift(hh).astype(jnp.bfloat16),
    }


def prepare_params(raw, H, W, C, K):
    hh, ww = H // 4, W // 4
    return {
        "enc1": _prep_conv(raw["encoder"]["w1"], raw["encoder"]["b1"], W, H, stride=2),
        "enc2": _prep_conv(raw["encoder"]["w2"], raw["encoder"]["b2"], W // 2, H // 2, stride=2),
        "conv": _prep_conv(raw["conv"]["w"], raw["conv"]["b"], ww, hh),
        "dec1": _prep_conv(raw["decoder"]["w1"], raw["decoder"]["b1"], ww, hh, up=2),
        "dec2": _prep_conv(raw["decoder"]["w2"], raw["decoder"]["b2"], W // 2, H // 2, up=2),
        "conv1": _prep_conv(raw["conv1"]["w"], raw["conv1"]["b"], W, H),
        "enc_lstm1": _prep_lstm(raw["enc_lstm1"], 4 * C, K, hh, ww),
        "enc_lstm2": _prep_lstm(raw["enc_lstm2"], K, K, hh, ww),
        "dec_lstm1": _prep_lstm(raw["dec_lstm1"], K, K, hh, ww),
        "dec_lstm2": _prep_lstm(raw["dec_lstm2"], K, K, hh, ww),
    }


# ----------------------------------------------------------------------------
# In-kernel helpers
# ----------------------------------------------------------------------------
def _banded_conv(x_bf16, rows, band, bias):
    """x: (Hin, Win*Cin) bf16 -> (Hout, Wout*Cout) f32 pre-activation."""
    acc = jnp.zeros((rows.shape[1], band.shape[2]), jnp.float32)
    for dy in range(3):
        xs = jnp.dot(rows[dy], x_bf16,
                     preferred_element_type=jnp.float32).astype(jnp.bfloat16)
        acc = acc + jnp.dot(xs, band[dy], preferred_element_type=jnp.float32)
    return acc + bias


def _lstm_cell(x, h, c, rows, wx, wh, bias, wci, wcf, wco):
    """Peephole ConvLSTM cell on flat (hh, w*chan) values, gates (i, f, c, o)."""
    hh, wk = h.shape
    xb = x.astype(jnp.bfloat16)
    hb = h.astype(jnp.bfloat16)
    acc = jnp.zeros((hh, 4 * wk), jnp.float32)
    for dy in range(3):
        xs = jnp.dot(rows[dy], xb, preferred_element_type=jnp.float32).astype(jnp.bfloat16)
        hs = jnp.dot(rows[dy], hb, preferred_element_type=jnp.float32).astype(jnp.bfloat16)
        acc = acc + jnp.dot(xs, wx[dy], preferred_element_type=jnp.float32)
        acc = acc + jnp.dot(hs, wh[dy], preferred_element_type=jnp.float32)
    g = acc + bias
    i_gate = jax.nn.sigmoid(g[:, 0 * wk:1 * wk] + wci * c)
    f_gate = jax.nn.sigmoid(g[:, 1 * wk:2 * wk] + wcf * c)
    c_new = f_gate * c + i_gate * jnp.tanh(g[:, 2 * wk:3 * wk])
    o_gate = jax.nn.sigmoid(g[:, 3 * wk:4 * wk] + wco * c_new)
    h_new = o_gate * jnp.tanh(c_new)
    return h_new, c_new


# ----------------------------------------------------------------------------
# Pallas kernels
# ----------------------------------------------------------------------------
def _encoder_conv_kernel(x_ref, r1_ref, w1_ref, b1_ref, r2_ref, w2_ref, b2_ref, o_ref):
    """encoderBlock: two stride-2 3x3 convs + LeakyReLU, fused per frame."""
    x = x_ref[0].astype(jnp.bfloat16)
    y = _leaky(_banded_conv(x, r1_ref[...], w1_ref[...], b1_ref[...]))
    z = _leaky(_banded_conv(y.astype(jnp.bfloat16), r2_ref[...], w2_ref[...], b2_ref[...]))
    o_ref[0] = z.astype(o_ref.dtype)


def _decoder_conv_kernel(h_ref, rc_ref, wc_ref, bc_ref, r1_ref, w1_ref, b1_ref,
                         r2_ref, w2_ref, b2_ref, r3_ref, w3_ref, b3_ref, o_ref):
    """self.conv + LReLU, decoderBlock (2 x up2+conv+LReLU), self.conv1 — fused."""
    g = h_ref[0].astype(jnp.bfloat16)
    g = _leaky(_banded_conv(g, rc_ref[...], wc_ref[...], bc_ref[...]))
    g = _leaky(_banded_conv(g.astype(jnp.bfloat16), r1_ref[...], w1_ref[...], b1_ref[...]))
    g = _leaky(_banded_conv(g.astype(jnp.bfloat16), r2_ref[...], w2_ref[...], b2_ref[...]))
    out = _banded_conv(g.astype(jnp.bfloat16), r3_ref[...], w3_ref[...], b3_ref[...])
    o_ref[0] = out.astype(o_ref.dtype)


def _enc_lstm_kernel(feat_ref, rows_ref,
                     wx1_ref, wh1_ref, b1_ref, wci1_ref, wcf1_ref, wco1_ref,
                     wx2_ref, wh2_ref, b2_ref, wci2_ref, wcf2_ref, wco2_ref,
                     h1o_ref, c1o_ref, h2o_ref, c2o_ref,
                     h1s, c1s, h2s, c2s):
    """Both encoder ConvLSTM layers, full T recurrence; states live in VMEM scratch."""
    t = pl.program_id(1)

    @pl.when(t == 0)
    def _():
        h1s[...] = jnp.zeros(h1s.shape, h1s.dtype)
        c1s[...] = jnp.zeros(c1s.shape, c1s.dtype)
        h2s[...] = jnp.zeros(h2s.shape, h2s.dtype)
        c2s[...] = jnp.zeros(c2s.shape, c2s.dtype)

    rows = rows_ref[...]
    h1, c1 = _lstm_cell(feat_ref[0, 0], h1s[...], c1s[...], rows,
                        wx1_ref[...], wh1_ref[...], b1_ref[...],
                        wci1_ref[...], wcf1_ref[...], wco1_ref[...])
    h2, c2 = _lstm_cell(h1, h2s[...], c2s[...], rows,
                        wx2_ref[...], wh2_ref[...], b2_ref[...],
                        wci2_ref[...], wcf2_ref[...], wco2_ref[...])
    h1s[...] = h1
    c1s[...] = c1
    h2s[...] = h2
    c2s[...] = c2

    @pl.when(t == pl.num_programs(1) - 1)
    def _():
        h1o_ref[0] = h1
        c1o_ref[0] = c1
        h2o_ref[0] = h2
        c2o_ref[0] = c2


def _dec_lstm_kernel(ev0_ref, h3i_ref, c3i_ref, h4i_ref, c4i_ref, rows_ref,
                     wx3_ref, wh3_ref, b3_ref, wci3_ref, wcf3_ref, wco3_ref,
                     wx4_ref, wh4_ref, b4_ref, wci4_ref, wcf4_ref, wco4_ref,
                     h4seq_ref,
                     evs, h3s, c3s, h4s, c4s):
    """Both decoder ConvLSTM layers, full future recurrence; encoder_vector feedback in VMEM."""
    f = pl.program_id(1)

    @pl.when(f == 0)
    def _():
        evs[...] = ev0_ref[0]
        h3s[...] = h3i_ref[0]
        c3s[...] = c3i_ref[0]
        h4s[...] = h4i_ref[0]
        c4s[...] = c4i_ref[0]

    rows = rows_ref[...]
    h3, c3 = _lstm_cell(evs[...], h3s[...], c3s[...], rows,
                        wx3_ref[...], wh3_ref[...], b3_ref[...],
                        wci3_ref[...], wcf3_ref[...], wco3_ref[...])
    h4, c4 = _lstm_cell(h3, h4s[...], c4s[...], rows,
                        wx4_ref[...], wh4_ref[...], b4_ref[...],
                        wci4_ref[...], wcf4_ref[...], wco4_ref[...])
    h3s[...] = h3
    c3s[...] = c3
    h4s[...] = h4
    c4s[...] = c4
    evs[...] = h4
    h4seq_ref[0, 0] = h4


# ----------------------------------------------------------------------------
# pallas_call wrappers
# ----------------------------------------------------------------------------
def encoder_convs(frames, p1, p2):
    """frames: (F, H, W*C) -> (F, H//4, (W//4)*4C)."""
    F_, H, L0 = frames.shape
    r1, w1, b1 = p1["rows"], p1["band"], p1["bias"]
    r2, w2, b2 = p2["rows"], p2["band"], p2["bias"]
    Ho, Lo = r2.shape[1], w2.shape[2]
    c3 = lambda n: (0, 0, 0)
    c2 = lambda n: (0, 0)
    flops = int(F_ * 2 * 3 * (r1.shape[1] * L0 * w1.shape[2] + Ho * w1.shape[2] * Lo))
    bytes_accessed = int(4 * F_ * (H * L0 + Ho * Lo)
                         + 2 * 3 * (L0 * w1.shape[2] + w1.shape[2] * Lo))
    return pl.pallas_call(
        _encoder_conv_kernel,
        out_shape=jax.ShapeDtypeStruct((F_, Ho, Lo), jnp.float32),
        grid=(F_,),
        in_specs=[pl.BlockSpec((1, H, L0), lambda n: (n, 0, 0)),
                  pl.BlockSpec(r1.shape, c3), pl.BlockSpec(w1.shape, c3),
                  pl.BlockSpec(b1.shape, c2),
                  pl.BlockSpec(r2.shape, c3), pl.BlockSpec(w2.shape, c3),
                  pl.BlockSpec(b2.shape, c2)],
        out_specs=pl.BlockSpec((1, Ho, Lo), lambda n: (n, 0, 0)),
        compiler_params=pltpu.CompilerParams(
            dimension_semantics=("parallel",), vmem_limit_bytes=_VMEM_LIMIT),
        cost_estimate=pl.CostEstimate(flops=flops, transcendentals=0,
                                      bytes_accessed=bytes_accessed),
    )(frames, r1, w1, b1, r2, w2, b2)


def decoder_convs(h4f, pc, pd1, pd2, pc1):
    """h4f: (F, hh, ww*K) -> (F, H, W*C)."""
    F_, hh, Lin = h4f.shape
    H, L = pc1["rows"].shape[1], pc1["band"].shape[2]
    c3 = lambda n: (0, 0, 0)
    c2 = lambda n: (0, 0)

    def specs(p):
        return [pl.BlockSpec(p["rows"].shape, c3),
                pl.BlockSpec(p["band"].shape, c3),
                pl.BlockSpec(p["bias"].shape, c2)]

    stages = (pc, pd1, pd2, pc1)
    flops = int(F_ * sum(2 * 3 * p["rows"].shape[1] * p["band"].shape[1] * p["band"].shape[2]
                         for p in stages))
    bytes_accessed = int(4 * F_ * (hh * Lin + H * L)
                         + sum(2 * 3 * p["band"].shape[1] * p["band"].shape[2] for p in stages))
    return pl.pallas_call(
        _decoder_conv_kernel,
        out_shape=jax.ShapeDtypeStruct((F_, H, L), jnp.float32),
        grid=(F_,),
        in_specs=[pl.BlockSpec((1, hh, Lin), lambda n: (n, 0, 0))]
                 + specs(pc) + specs(pd1) + specs(pd2) + specs(pc1),
        out_specs=pl.BlockSpec((1, H, L), lambda n: (n, 0, 0)),
        compiler_params=pltpu.CompilerParams(
            dimension_semantics=("parallel",), vmem_limit_bytes=_VMEM_LIMIT),
        cost_estimate=pl.CostEstimate(flops=flops, transcendentals=0,
                                      bytes_accessed=bytes_accessed),
    )(h4f,
      pc["rows"], pc["band"], pc["bias"],
      pd1["rows"], pd1["band"], pd1["bias"],
      pd2["rows"], pd2["band"], pd2["bias"],
      pc1["rows"], pc1["band"], pc1["bias"])


def _lstm_weight_specs(p):
    c3 = lambda n, t: (0, 0, 0)
    c2 = lambda n, t: (0, 0)
    return [pl.BlockSpec(p["wx"].shape, c3), pl.BlockSpec(p["wh"].shape, c3),
            pl.BlockSpec(p["bias"].shape, c2), pl.BlockSpec(p["wci"].shape, c2),
            pl.BlockSpec(p["wcf"].shape, c2), pl.BlockSpec(p["wco"].shape, c2)]


def _lstm_weight_args(p):
    return (p["wx"], p["wh"], p["bias"], p["wci"], p["wcf"], p["wco"])


def encoder_lstm_sweep(feat, p1, p2):
    """feat: (N, T, hh, ww*4C) -> final (h1, c1, h2, c2), each (N, hh, ww*K)."""
    N, T, hh, Lx = feat.shape
    WK = p1["wci"].shape[1]
    rows = p1["rows"]
    st = jax.ShapeDtypeStruct((N, hh, WK), jnp.float32)
    st_spec = pl.BlockSpec((1, hh, WK), lambda n, t: (n, 0, 0))
    flops = int(N * T * 2 * 2 * 3 * hh * (Lx + WK) * 4 * WK)
    transc = int(N * T * 2 * 5 * hh * WK)
    bytes_accessed = int(4 * N * T * hh * Lx + 4 * 4 * N * hh * WK
                         + 2 * 3 * 4 * WK * (Lx + 3 * WK))
    return pl.pallas_call(
        _enc_lstm_kernel,
        out_shape=(st, st, st, st),
        grid=(N, T),
        in_specs=[pl.BlockSpec((1, 1, hh, Lx), lambda n, t: (n, t, 0, 0)),
                  pl.BlockSpec(rows.shape, lambda n, t: (0, 0, 0))]
                 + _lstm_weight_specs(p1) + _lstm_weight_specs(p2),
        out_specs=(st_spec, st_spec, st_spec, st_spec),
        scratch_shapes=[pltpu.VMEM((hh, WK), jnp.float32)] * 4,
        compiler_params=pltpu.CompilerParams(
            dimension_semantics=("parallel", "arbitrary"), vmem_limit_bytes=_VMEM_LIMIT),
        cost_estimate=pl.CostEstimate(flops=flops, transcendentals=transc,
                                      bytes_accessed=bytes_accessed),
    )(feat, rows, *_lstm_weight_args(p1), *_lstm_weight_args(p2))


def decoder_lstm_sweep(ev0, h3, c3, h4, c4, p3, p4, future):
    """Runs both decoder ConvLSTM layers for `future` steps; returns h4 per step."""
    N, hh, WK = ev0.shape
    rows = p3["rows"]
    st_spec = pl.BlockSpec((1, hh, WK), lambda n, f: (n, 0, 0))
    flops = int(N * future * 2 * 2 * 3 * hh * 2 * WK * 4 * WK)
    transc = int(N * future * 2 * 5 * hh * WK)
    bytes_accessed = int(4 * 5 * N * hh * WK + 4 * N * future * hh * WK
                         + 2 * 3 * 4 * WK * 4 * WK)
    return pl.pallas_call(
        _dec_lstm_kernel,
        out_shape=jax.ShapeDtypeStruct((N, future, hh, WK), jnp.float32),
        grid=(N, future),
        in_specs=[st_spec] * 5
                 + [pl.BlockSpec(rows.shape, lambda n, f: (0, 0, 0))]
                 + _lstm_weight_specs(p3) + _lstm_weight_specs(p4),
        out_specs=pl.BlockSpec((1, 1, hh, WK), lambda n, f: (n, f, 0, 0)),
        scratch_shapes=[pltpu.VMEM((hh, WK), jnp.float32)] * 5,
        compiler_params=pltpu.CompilerParams(
            dimension_semantics=("parallel", "arbitrary"), vmem_limit_bytes=_VMEM_LIMIT),
        cost_estimate=pl.CostEstimate(flops=flops, transcendentals=transc,
                                      bytes_accessed=bytes_accessed),
    )(ev0, h3, c3, h4, c4, rows, *_lstm_weight_args(p3), *_lstm_weight_args(p4))


# ----------------------------------------------------------------------------
# Forward pass
# ----------------------------------------------------------------------------
def ae_convlstm_forward(pp, x_ncthw, future_seq, rng_key):
    """x: (N, C, T, H, W) -> (N, C, future_seq, H, W)."""
    N, C, T, H, W = x_ncthw.shape
    hh = H // 4

    # Encoder convs, batched over every (batch, time) frame.
    frames = jnp.transpose(x_ncthw, (0, 2, 3, 4, 1)).reshape(N * T, H, W * C)
    feat = encoder_convs(frames, pp["enc1"], pp["enc2"])          # (N*T, hh, ww*4C)
    feat = feat.reshape(N, T, hh, feat.shape[-1])

    # Encoder ConvLSTM stack: one kernel, full time recurrence in VMEM.
    h1, c1, h2, c2 = encoder_lstm_sweep(feat, pp["enc_lstm1"], pp["enc_lstm2"])

    # encoder_vector = torch.rand_like(h_t): uniform [0, 1) (JAX RNG stream here).
    ev0 = jax.random.uniform(rng_key, h1.shape, h1.dtype)

    # Decoder ConvLSTM stack: one kernel, full future recurrence in VMEM.
    h4_seq = decoder_lstm_sweep(ev0, h1, c1, h2, c2,
                                pp["dec_lstm1"], pp["dec_lstm2"], future_seq)

    # Decoder convs, batched over every (batch, future) frame.
    h4f = h4_seq.reshape(N * future_seq, hh, h4_seq.shape[-1])
    frames_out = decoder_convs(h4f, pp["conv"], pp["dec1"], pp["dec2"], pp["conv1"])
    frames_out = frames_out.reshape(N, future_seq, H, W, C)
    return jnp.transpose(frames_out, (0, 4, 1, 2, 3))             # (N, C, F, H, W)


# ----------------------------------------------------------------------------
# Deterministic synthetic parameter initialization (PyTorch-equivalent shapes,
# stored as (3, 3, Cin, Cout) / (Cout,)).
# ----------------------------------------------------------------------------
def _conv_params(key, cin, cout, scale=0.1):
    kw, kb = jax.random.split(key)
    return {"w": scale * jax.random.normal(kw, (3, 3, cin, cout), jnp.float32),
            "b": scale * jax.random.normal(kb, (cout,), jnp.float32)}


def _lstm_params(key, cin, cout, fh, fw, scale=0.1):
    k1, k2, k3, k4 = jax.random.split(key, 4)
    conv = _conv_params(k1, cin + cout, 4 * cout, scale)
    return {"w": conv["w"], "b": conv["b"],
            "wci": scale * jax.random.normal(k2, (fh, fw, cout), jnp.float32),
            "wcf": scale * jax.random.normal(k3, (fh, fw, cout), jnp.float32),
            "wco": scale * jax.random.normal(k4, (fh, fw, cout), jnp.float32)}


def init_params(key, num_channels, num_kernels, frame_size):
    C, K = num_channels, num_kernels
    fh, fw = frame_size
    keys = jax.random.split(key, 10)
    enc1 = _conv_params(keys[0], C, 2 * C)
    enc2 = _conv_params(keys[1], 2 * C, 4 * C)
    dec1 = _conv_params(keys[2], 4 * C, 2 * C)
    dec2 = _conv_params(keys[3], 2 * C, C)
    return {
        "encoder": {"w1": enc1["w"], "b1": enc1["b"], "w2": enc2["w"], "b2": enc2["b"]},
        "decoder": {"w1": dec1["w"], "b1": dec1["b"], "w2": dec2["w"], "b2": dec2["b"]},
        "enc_lstm1": _lstm_params(keys[4], 4 * C, K, fh, fw),
        "enc_lstm2": _lstm_params(keys[5], K, K, fh, fw),
        "dec_lstm1": _lstm_params(keys[6], K, K, fh, fw),
        "dec_lstm2": _lstm_params(keys[7], K, K, fh, fw),
        "conv": _conv_params(keys[8], K, 4 * C),
        "conv1": _conv_params(keys[9], C, C),
    }


if __name__ == "__main__":
    key = jax.random.PRNGKey(0)
    k_params, k_x, k_rand = jax.random.split(key, 3)

    # Small shapes: batch=2, channels=4, seq=4, spatial=16x16, num_kernels=8, future_seq=3.
    N, C, T, H, W = 2, 4, 4, 16, 16
    num_kernels = 8
    future_seq = 3

    params = init_params(k_params, C, num_kernels, (H // 4, W // 4))
    pp = prepare_params(params, H, W, C, num_kernels)   # trace-time constants (bands etc.)

    x = jax.random.normal(k_x, (N, C, T, H, W), jnp.float32)
    fwd = jax.jit(lambda xx, kk: ae_convlstm_forward(pp, xx, future_seq, kk))
    out = jax.block_until_ready(fwd(x, k_rand))

    assert out.shape == (N, C, future_seq, H, W), out.shape
    assert bool(jnp.all(jnp.isfinite(out)))
    print("KERNEL_OK")
</pallas_src>

<mosaic_0001>
module attributes {stable_mosaic.version = 11 : i64} {
  func.func @_encoder_conv_kernel(%arg0: i32, %arg1: memref<1x16x64xf32, #tpu.memory_space<vmem>>, %arg2: memref<3x8x16xbf16, #tpu.memory_space<vmem>>, %arg3: memref<3x64x64xbf16, #tpu.memory_space<vmem>>, %arg4: memref<1x64xf32, #tpu.memory_space<vmem>>, %arg5: memref<3x4x8xbf16, #tpu.memory_space<vmem>>, %arg6: memref<3x64x64xbf16, #tpu.memory_space<vmem>>, %arg7: memref<1x64xf32, #tpu.memory_space<vmem>>, %arg8: memref<1x4x64xf32, #tpu.memory_space<vmem>>) attributes {dimension_semantics = [#tpu.dimension_semantics<parallel>], iteration_bounds = array<i64: 8>, scalar_prefetch = 0 : i64, scratch_operands = 0 : i64, tpu.core_type = #tpu.core_type<tc>, window_params = [{transform_indices = @transform_0, window_bounds = array<i64: 1, 16, 64>}, {pipeline_mode = #tpu.pipeline_mode<synchronous>, transform_indices = @transform_1, window_bounds = array<i64: 3, 8, 16>}, {pipeline_mode = #tpu.pipeline_mode<synchronous>, transform_indices = @transform_2, window_bounds = array<i64: 3, 64, 64>}, {pipeline_mode = #tpu.pipeline_mode<synchronous>, transform_indices = @transform_3, window_bounds = array<i64: 1, 64>}, {pipeline_mode = #tpu.pipeline_mode<synchronous>, transform_indices = @transform_4, window_bounds = array<i64: 3, 4, 8>}, {pipeline_mode = #tpu.pipeline_mode<synchronous>, transform_indices = @transform_5, window_bounds = array<i64: 3, 64, 64>}, {pipeline_mode = #tpu.pipeline_mode<synchronous>, transform_indices = @transform_6, window_bounds = array<i64: 1, 64>}, {transform_indices = @transform_7, window_bounds = array<i64: 1, 4, 64>}]} {
    %c0 = arith.constant 0 : index
    %c0_0 = arith.constant 0 : index
    %c0_1 = arith.constant 0 : index
    %0 = vector.load %arg1[%c0, %c0_0, %c0_1] : memref<1x16x64xf32, #tpu.memory_space<vmem>>, vector<1x16x64xf32>
    %1 = vector.shape_cast %0 : vector<1x16x64xf32> to vector<16x64xf32>
    %2 = arith.truncf %1 : vector<16x64xf32> to vector<16x64xbf16>
    %c0_2 = arith.constant 0 : index
    %c0_3 = arith.constant 0 : index
    %c0_4 = arith.constant 0 : index
    %3 = vector.load %arg2[%c0_2, %c0_3, %c0_4] : memref<3x8x16xbf16, #tpu.memory_space<vmem>>, vector<3x8x16xbf16>
    %c0_5 = arith.constant 0 : index
    %c0_6 = arith.constant 0 : index
    %c0_7 = arith.constant 0 : index
    %4 = vector.load %arg3[%c0_5, %c0_6, %c0_7] : memref<3x64x64xbf16, #tpu.memory_space<vmem>>, vector<3x64x64xbf16>
    %c0_8 = arith.constant 0 : index
    %c0_9 = arith.constant 0 : index
    %5 = vector.load %arg4[%c0_8, %c0_9] : memref<1x64xf32, #tpu.memory_space<vmem>>, vector<1x64xf32>
    %cst = arith.constant 0.000000e+00 : f32
    %6 = vector.broadcast %cst : f32 to vector<8x64xf32>
    %7 = vector.extract_strided_slice %3 {offsets = [0, 0, 0], sizes = [1, 8, 16], strides = [1, 1, 1]} : vector<3x8x16xbf16> to vector<1x8x16xbf16>
    %8 = vector.shape_cast %7 : vector<1x8x16xbf16> to vector<8x16xbf16>
    %cst_10 = arith.constant dense<0.000000e+00> : vector<8x64xf32>
    %9 = tpu.matmul %8, %2, %cst_10 {dimension_numbers = #tpu.dot_dimension_numbers<[1], [0], [0], [1], [0, 0, 1, 1], [], []>} : vector<8x16xbf16>, vector<16x64xbf16>, vector<8x64xf32> -> vector<8x64xf32>
    %10 = arith.truncf %9 : vector<8x64xf32> to vector<8x64xbf16>
    %11 = vector.extract_strided_slice %4 {offsets = [0, 0, 0], sizes = [1, 64, 64], strides = [1, 1, 1]} : vector<3x64x64xbf16> to vector<1x64x64xbf16>
    %12 = vector.shape_cast %11 : vector<1x64x64xbf16> to vector<64x64xbf16>
    %cst_11 = arith.constant dense<0.000000e+00> : vector<8x64xf32>
    %13 = tpu.matmul %10, %12, %cst_11 {dimension_numbers = #tpu.dot_dimension_numbers<[1], [0], [0], [1], [0, 0, 1, 1], [], []>} : vector<8x64xbf16>, vector<64x64xbf16>, vector<8x64xf32> -> vector<8x64xf32>
    %14 = arith.addf %6, %13 : vector<8x64xf32>
    %15 = vector.extract_strided_slice %3 {offsets = [1, 0, 0], sizes = [1, 8, 16], strides = [1, 1, 1]} : vector<3x8x16xbf16> to vector<1x8x16xbf16>
    %16 = vector.shape_cast %15 : vector<1x8x16xbf16> to vector<8x16xbf16>
    %cst_12 = arith.constant dense<0.000000e+00> : vector<8x64xf32>
    %17 = tpu.matmul %16, %2, %cst_12 {dimension_numbers = #tpu.dot_dimension_numbers<[1], [0], [0], [1], [0, 0, 1, 1], [], []>} : vector<8x16xbf16>, vector<16x64xbf16>, vector<8x64xf32> -> vector<8x64xf32>
    %18 = arith.truncf %17 : vector<8x64xf32> to vector<8x64xbf16>
    %19 = vector.extract_strided_slice %4 {offsets = [1, 0, 0], sizes = [1, 64, 64], strides = [1, 1, 1]} : vector<3x64x64xbf16> to vector<1x64x64xbf16>
    %20 = vector.shape_cast %19 : vector<1x64x64xbf16> to vector<64x64xbf16>
    %cst_13 = arith.constant dense<0.000000e+00> : vector<8x64xf32>
    %21 = tpu.matmul %18, %20, %cst_13 {dimension_numbers = #tpu.dot_dimension_numbers<[1], [0], [0], [1], [0, 0, 1, 1], [], []>} : vector<8x64xbf16>, vector<64x64xbf16>, vector<8x64xf32> -> vector<8x64xf32>
    %22 = arith.addf %14, %21 : vector<8x64xf32>
    %23 = vector.extract_strided_slice %3 {offsets = [2, 0, 0], sizes = [1, 8, 16], strides = [1, 1, 1]} : vector<3x8x16xbf16> to vector<1x8x16xbf16>
    %24 = vector.shape_cast %23 : vector<1x8x16xbf16> to vector<8x16xbf16>
    %cst_14 = arith.constant dense<0.000000e+00> : vector<8x64xf32>
    %25 = tpu.matmul %24, %2, %cst_14 {dimension_numbers = #tpu.dot_dimension_numbers<[1], [0], [0], [1], [0, 0, 1, 1], [], []>} : vector<8x16xbf16>, vector<16x64xbf16>, vector<8x64xf32> -> vector<8x64xf32>
    %26 = arith.truncf %25 : vector<8x64xf32> to vector<8x64xbf16>
    %27 = vector.extract_strided_slice %4 {offsets = [2, 0, 0], sizes = [1, 64, 64], strides = [1, 1, 1]} : vector<3x64x64xbf16> to vector<1x64x64xbf16>
    %28 = vector.shape_cast %27 : vector<1x64x64xbf16> to vector<64x64xbf16>
    %cst_15 = arith.constant dense<0.000000e+00> : vector<8x64xf32>
    %29 = tpu.matmul %26, %28, %cst_15 {dimension_numbers = #tpu.dot_dimension_numbers<[1], [0], [0], [1], [0, 0, 1, 1], [], []>} : vector<8x64xbf16>, vector<64x64xbf16>, vector<8x64xf32> -> vector<8x64xf32>
    %30 = arith.addf %22, %29 : vector<8x64xf32>
    %31 = vector.broadcast %5 : vector<1x64xf32> to vector<8x64xf32>
    %32 = arith.addf %30, %31 : vector<8x64xf32>
    %cst_16 = arith.constant 0.000000e+00 : f32
    %33 = vector.broadcast %cst_16 : f32 to vector<8x64xf32>
    %34 = arith.cmpf oge, %32, %33 : vector<8x64xf32>
    %cst_17 = arith.constant 0.00999999977 : f32
    %35 = vector.broadcast %cst_17 : f32 to vector<8x64xf32>
    %36 = arith.mulf %35, %32 : vector<8x64xf32>
    %37 = arith.select %34, %32, %36 : vector<8x64xi1>, vector<8x64xf32>
    %38 = arith.truncf %37 : vector<8x64xf32> to vector<8x64xbf16>
    %c0_18 = arith.constant 0 : index
    %c0_19 = arith.constant 0 : index
    %c0_20 = arith.constant 0 : index
    %39 = vector.load %arg5[%c0_18, %c0_19, %c0_20] : memref<3x4x8xbf16, #tpu.memory_space<vmem>>, vector<3x4x8xbf16>
    %c0_21 = arith.constant 0 : index
    %c0_22 = arith.constant 0 : index
    %c0_23 = arith.constant 0 : index
    %40 = vector.load %arg6[%c0_21, %c0_22, %c0_23] : memref<3x64x64xbf16, #tpu.memory_space<vmem>>, vector<3x64x64xbf16>
    %c0_24 = arith.constant 0 : index
    %c0_25 = arith.constant 0 : index
    %41 = vector.load %arg7[%c0_24, %c0_25] : memref<1x64xf32, #tpu.memory_space<vmem>>, vector<1x64xf32>
    %cst_26 = arith.constant 0.000000e+00 : f32
    %42 = vector.broadcast %cst_26 : f32 to vector<4x64xf32>
    %43 = vector.extract_strided_slice %39 {offsets = [0, 0, 0], sizes = [1, 4, 8], strides = [1, 1, 1]} : vector<3x4x8xbf16> to vector<1x4x8xbf16>
    %44 = vector.shape_cast %43 : vector<1x4x8xbf16> to vector<4x8xbf16>
    %cst_27 = arith.constant dense<0.000000e+00> : vector<4x64xf32>
    %45 = tpu.matmul %44, %38, %cst_27 {dimension_numbers = #tpu.dot_dimension_numbers<[1], [0], [0], [1], [0, 0, 1, 1], [], []>} : vector<4x8xbf16>, vector<8x64xbf16>, vector<4x64xf32> -> vector<4x64xf32>
    %46 = arith.truncf %45 : vector<4x64xf32> to vector<4x64xbf16>
    %47 = vector.extract_strided_slice %40 {offsets = [0, 0, 0], sizes = [1, 64, 64], strides = [1, 1, 1]} : vector<3x64x64xbf16> to vector<1x64x64xbf16>
    %48 = vector.shape_cast %47 : vector<1x64x64xbf16> to vector<64x64xbf16>
    %cst_28 = arith.constant dense<0.000000e+00> : vector<4x64xf32>
    %49 = tpu.matmul %46, %48, %cst_28 {dimension_numbers = #tpu.dot_dimension_numbers<[1], [0], [0], [1], [0, 0, 1, 1], [], []>} : vector<4x64xbf16>, vector<64x64xbf16>, vector<4x64xf32> -> vector<4x64xf32>
    %50 = arith.addf %42, %49 : vector<4x64xf32>
    %51 = vector.extract_strided_slice %39 {offsets = [1, 0, 0], sizes = [1, 4, 8], strides = [1, 1, 1]} : vector<3x4x8xbf16> to vector<1x4x8xbf16>
    %52 = vector.shape_cast %51 : vector<1x4x8xbf16> to vector<4x8xbf16>
    %cst_29 = arith.constant dense<0.000000e+00> : vector<4x64xf32>
    %53 = tpu.matmul %52, %38, %cst_29 {dimension_numbers = #tpu.dot_dimension_numbers<[1], [0], [0], [1], [0, 0, 1, 1], [], []>} : vector<4x8xbf16>, vector<8x64xbf16>, vector<4x64xf32> -> vector<4x64xf32>
    %54 = arith.truncf %53 : vector<4x64xf32> to vector<4x64xbf16>
    %55 = vector.extract_strided_slice %40 {offsets = [1, 0, 0], sizes = [1, 64, 64], strides = [1, 1, 1]} : vector<3x64x64xbf16> to vector<1x64x64xbf16>
    %56 = vector.shape_cast %55 : vector<1x64x64xbf16> to vector<64x64xbf16>
    %cst_30 = arith.constant dense<0.000000e+00> : vector<4x64xf32>
    %57 = tpu.matmul %54, %56, %cst_30 {dimension_numbers = #tpu.dot_dimension_numbers<[1], [0], [0], [1], [0, 0, 1, 1], [], []>} : vector<4x64xbf16>, vector<64x64xbf16>, vector<4x64xf32> -> vector<4x64xf32>
    %58 = arith.addf %50, %57 : vector<4x64xf32>
    %59 = vector.extract_strided_slice %39 {offsets = [2, 0, 0], sizes = [1, 4, 8], strides = [1, 1, 1]} : vector<3x4x8xbf16> to vector<1x4x8xbf16>
    %60 = vector.shape_cast %59 : vector<1x4x8xbf16> to vector<4x8xbf16>
    %cst_31 = arith.constant dense<0.000000e+00> : vector<4x64xf32>
    %61 = tpu.matmul %60, %38, %cst_31 {dimension_numbers = #tpu.dot_dimension_numbers<[1], [0], [0], [1], [0, 0, 1, 1], [], []>} : vector<4x8xbf16>, vector<8x64xbf16>, vector<4x64xf32> -> vector<4x64xf32>
    %62 = arith.truncf %61 : vector<4x64xf32> to vector<4x64xbf16>
    %63 = vector.extract_strided_slice %40 {offsets = [2, 0, 0], sizes = [1, 64, 64], strides = [1, 1, 1]} : vector<3x64x64xbf16> to vector<1x64x64xbf16>
    %64 = vector.shape_cast %63 : vector<1x64x64xbf16> to vector<64x64xbf16>
    %cst_32 = arith.constant dense<0.000000e+00> : vector<4x64xf32>
    %65 = tpu.matmul %62, %64, %cst_32 {dimension_numbers = #tpu.dot_dimension_numbers<[1], [0], [0], [1], [0, 0, 1, 1], [], []>} : vector<4x64xbf16>, vector<64x64xbf16>, vector<4x64xf32> -> vector<4x64xf32>
    %66 = arith.addf %58, %65 : vector<4x64xf32>
    %67 = vector.broadcast %41 : vector<1x64xf32> to vector<4x64xf32>
    %68 = arith.addf %66, %67 : vector<4x64xf32>
    %cst_33 = arith.constant 0.000000e+00 : f32
    %69 = vector.broadcast %cst_33 : f32 to vector<4x64xf32>
    %70 = arith.cmpf oge, %68, %69 : vector<4x64xf32>
    %cst_34 = arith.constant 0.00999999977 : f32
    %71 = vector.broadcast %cst_34 : f32 to vector<4x64xf32>
    %72 = arith.mulf %71, %68 : vector<4x64xf32>
    %73 = arith.select %70, %68, %72 : vector<4x64xi1>, vector<4x64xf32>
    %c0_35 = arith.constant 0 : index
    %c0_36 = arith.constant 0 : index
    %c0_37 = arith.constant 0 : index
    %74 = vector.load %arg8[%c0_35, %c0_36, %c0_37] : memref<1x4x64xf32, #tpu.memory_space<vmem>>, vector<1x4x64xf32>
    %75 = vector.shape_cast %74 : vector<1x4x64xf32> to vector<4x64xf32>
    %76 = vector.shape_cast %73 : vector<4x64xf32> to vector<1x4x64xf32>
    tpu.vector_store %arg8[%c0_35, %c0_36, %c0_37], %76 {strides = array<i32>} : memref<1x4x64xf32, #tpu.memory_space<vmem>>, vector<1x4x64xf32>,
    return
  }
  func.func @transform_0(%arg0: i32) -> (i32, i32, i32) {
    %c0_i32 = arith.constant 0 : i32
    %c0_i32_0 = arith.constant 0 : i32
    %c0_i32_1 = arith.constant 0 : i32
    return %arg0, %c0_i32, %c0_i32_0 : i32, i32, i32
  }
  func.func @transform_1(%arg0: i32) -> (i32, i32, i32) {
    %c0_i32 = arith.constant 0 : i32
    %c0_i32_0 = arith.constant 0 : i32
    %c0_i32_1 = arith.constant 0 : i32
    %c0_i32_2 = arith.constant 0 : i32
    return %c0_i32, %c0_i32_0, %c0_i32_1 : i32, i32, i32
  }
  func.func @transform_2(%arg0: i32) -> (i32, i32, i32) {
    %c0_i32 = arith.constant 0 : i32
    %c0_i32_0 = arith.constant 0 : i32
    %c0_i32_1 = arith.constant 0 : i32
    %c0_i32_2 = arith.constant 0 : i32
    return %c0_i32, %c0_i32_0, %c0_i32_1 : i32, i32, i32
  }
  func.func @transform_3(%arg0: i32) -> (i32, i32) {
    %c0_i32 = arith.constant 0 : i32
    %c0_i32_0 = arith.constant 0 : i32
    %c0_i32_1 = arith.constant 0 : i32
    return %c0_i32, %c0_i32_0 : i32, i32
  }
  func.func @transform_4(%arg0: i32) -> (i32, i32, i32) {
    %c0_i32 = arith.constant 0 : i32
    %c0_i32_0 = arith.constant 0 : i32
    %c0_i32_1 = arith.constant 0 : i32
    %c0_i32_2 = arith.constant 0 : i32
    return %c0_i32, %c0_i32_0, %c0_i32_1 : i32, i32, i32
  }
  func.func @transform_5(%arg0: i32) -> (i32, i32, i32) {
    %c0_i32 = arith.constant 0 : i32
    %c0_i32_0 = arith.constant 0 : i32
    %c0_i32_1 = arith.constant 0 : i32
    %c0_i32_2 = arith.constant 0 : i32
    return %c0_i32, %c0_i32_0, %c0_i32_1 : i32, i32, i32
  }
  func.func @transform_6(%arg0: i32) -> (i32, i32) {
    %c0_i32 = arith.constant 0 : i32
    %c0_i32_0 = arith.constant 0 : i32
    %c0_i32_1 = arith.constant 0 : i32
    return %c0_i32, %c0_i32_0 : i32, i32
  }
  func.func @transform_7(%arg0: i32) -> (i32, i32, i32) {
    %c0_i32 = arith.constant 0 : i32
    %c0_i32_0 = arith.constant 0 : i32
    %c0_i32_1 = arith.constant 0 : i32
    return %arg0, %c0_i32, %c0_i32_0 : i32, i32, i32
  }
}

module attributes {stable_mosaic.version = 11 : i64} {
  func.func @_enc_lstm_kernel(%arg0: i32, %arg1: i32, %arg2: memref<1x1x4x64xf32, #tpu.memory_space<vmem>>, %arg3: memref<3x4x4xbf16, #tpu.memory_space<vmem>>, %arg4: memref<3x64x128xbf16, #tpu.memory_space<vmem>>, %arg5: memref<3x32x128xbf16, #tpu.memory_space<vmem>>, %arg6: memref<1x128xf32, #tpu.memory_space<vmem>>, %arg7: memref<4x32xf32, #tpu.memory_space<vmem>>, %arg8: memref<4x32xf32, #tpu.memory_space<vmem>>, %arg9: memref<4x32xf32, #tpu.memory_space<vmem>>, %arg10: memref<3x32x128xbf16, #tpu.memory_space<vmem>>, %arg11: memref<3x32x128xbf16, #tpu.memory_space<vmem>>, %arg12: memref<1x128xf32, #tpu.memory_space<vmem>>, %arg13: memref<4x32xf32, #tpu.memory_space<vmem>>, %arg14: memref<4x32xf32, #tpu.memory_space<vmem>>, %arg15: memref<4x32xf32, #tpu.memory_space<vmem>>, %arg16: memref<1x4x32xf32, #tpu.memory_space<vmem>>, %arg17: memref<1x4x32xf32, #tpu.memory_space<vmem>>, %arg18: memref<1x4x32xf32, #tpu.memory_space<vmem>>, %arg19: memref<1x4x32xf32, #tpu.memory_space<vmem>>, %arg20: memref<4x32xf32, #tpu.memory_space<vmem>>, %arg21: memref<4x32xf32, #tpu.memory_space<vmem>>, %arg22: memref<4x32xf32, #tpu.memory_space<vmem>>, %arg23: memref<4x32xf32, #tpu.memory_space<vmem>>) attributes {dimension_semantics = [#tpu.dimension_semantics<parallel>, #tpu.dimension_semantics<arbitrary>], iteration_bounds = array<i64: 2, 4>, scalar_prefetch = 0 : i64, scratch_operands = 4 : i64, tpu.core_type = #tpu.core_type<tc>, window_params = [{transform_indices = @transform_0, window_bounds = array<i64: 1, 1, 4, 64>}, {pipeline_mode = #tpu.pipeline_mode<synchronous>, transform_indices = @transform_1, window_bounds = array<i64: 3, 4, 4>}, {pipeline_mode = #tpu.pipeline_mode<synchronous>, transform_indices = @transform_2, window_bounds = array<i64: 3, 64, 128>}, {pipeline_mode = #tpu.pipeline_mode<synchronous>, transform_indices = @transform_3, window_bounds = array<i64: 3, 32, 128>}, {pipeline_mode = #tpu.pipeline_mode<synchronous>, transform_indices = @transform_4, window_bounds = array<i64: 1, 128>}, {pipeline_mode = #tpu.pipeline_mode<synchronous>, transform_indices = @transform_5, window_bounds = array<i64: 4, 32>}, {pipeline_mode = #tpu.pipeline_mode<synchronous>, transform_indices = @transform_6, window_bounds = array<i64: 4, 32>}, {pipeline_mode = #tpu.pipeline_mode<synchronous>, transform_indices = @transform_7, window_bounds = array<i64: 4, 32>}, {pipeline_mode = #tpu.pipeline_mode<synchronous>, transform_indices = @transform_8, window_bounds = array<i64: 3, 32, 128>}, {pipeline_mode = #tpu.pipeline_mode<synchronous>, transform_indices = @transform_9, window_bounds = array<i64: 3, 32, 128>}, {pipeline_mode = #tpu.pipeline_mode<synchronous>, transform_indices = @transform_10, window_bounds = array<i64: 1, 128>}, {pipeline_mode = #tpu.pipeline_mode<synchronous>, transform_indices = @transform_11, window_bounds = array<i64: 4, 32>}, {pipeline_mode = #tpu.pipeline_mode<synchronous>, transform_indices = @transform_12, window_bounds = array<i64: 4, 32>}, {pipeline_mode = #tpu.pipeline_mode<synchronous>, transform_indices = @transform_13, window_bounds = array<i64: 4, 32>}, {transform_indices = @transform_14, window_bounds = array<i64: 1, 4, 32>}, {transform_indices = @transform_15, window_bounds = array<i64: 1, 4, 32>}, {transform_indices = @transform_16, window_bounds = array<i64: 1, 4, 32>}, {transform_indices = @transform_17, window_bounds = array<i64: 1, 4, 32>}]} {
    %c0_i32 = arith.constant 0 : i32
    %0 = arith.cmpi eq, %arg1, %c0_i32 : i32
    %1 = arith.extui %0 : i1 to i32
    %c0_i32_0 = arith.constant 0 : i32
    %2 = arith.cmpi ne, %1, %c0_i32_0 : i32
    scf.if %2 {
      %cst_83 = arith.constant 0.000000e+00 : f32
      %197 = vector.broadcast %cst_83 : f32 to vector<4x32xf32>
      %c0_84 = arith.constant 0 : index
      %c0_85 = arith.constant 0 : index
      %198 = vector.load %arg20[%c0_84, %c0_85] : memref<4x32xf32, #tpu.memory_space<vmem>>, vector<4x32xf32>
      tpu.vector_store %arg20[%c0_84, %c0_85], %197 {strides = array<i32>} : memref<4x32xf32, #tpu.memory_space<vmem>>, vector<4x32xf32>,
      %cst_86 = arith.constant 0.000000e+00 : f32
      %199 = vector.broadcast %cst_86 : f32 to vector<4x32xf32>
      %c0_87 = arith.constant 0 : index
      %c0_88 = arith.constant 0 : index
      %200 = vector.load %arg21[%c0_87, %c0_88] : memref<4x32xf32, #tpu.memory_space<vmem>>, vector<4x32xf32>
      tpu.vector_store %arg21[%c0_87, %c0_88], %199 {strides = array<i32>} : memref<4x32xf32, #tpu.memory_space<vmem>>, vector<4x32xf32>,
      %cst_89 = arith.constant 0.000000e+00 : f32
      %201 = vector.broadcast %cst_89 : f32 to vector<4x32xf32>
      %c0_90 = arith.constant 0 : index
      %c0_91 = arith.constant 0 : index
      %202 = vector.load %arg22[%c0_90, %c0_91] : memref<4x32xf32, #tpu.memory_space<vmem>>, vector<4x32xf32>
      tpu.vector_store %arg22[%c0_90, %c0_91], %201 {strides = array<i32>} : memref<4x32xf32, #tpu.memory_space<vmem>>, vector<4x32xf32>,
      %cst_92 = arith.constant 0.000000e+00 : f32
      %203 = vector.broadcast %cst_92 : f32 to vector<4x32xf32>
      %c0_93 = arith.constant 0 : index
      %c0_94 = arith.constant 0 : index
      %204 = vector.load %arg23[%c0_93, %c0_94] : memref<4x32xf32, #tpu.memory_space<vmem>>, vector<4x32xf32>
      tpu.vector_store %arg23[%c0_93, %c0_94], %203 {strides = array<i32>} : memref<4x32xf32, #tpu.memory_space<vmem>>, vector<4x32xf32>,
    } else {
    }
    %c0 = arith.constant 0 : index
    %c0_1 = arith.constant 0 : index
    %c0_2 = arith.constant 0 : index
    %3 = vector.load %arg3[%c0, %c0_1, %c0_2] : memref<3x4x4xbf16, #tpu.memory_space<vmem>>, vector<3x4x4xbf16>
    %c0_3 = arith.constant 0 : index
    %c0_4 = arith.constant 0 : index
    %c0_5 = arith.constant 0 : index
    %c0_6 = arith.constant 0 : index
    %4 = vector.load %arg2[%c0_3, %c0_4, %c0_5, %c0_6] : memref<1x1x4x64xf32, #tpu.memory_space<vmem>>, vector<1x1x4x64xf32>
    %5 = vector.shape_cast %4 : vector<1x1x4x64xf32> to vector<4x64xf32>
    %c0_7 = arith.constant 0 : index
    %c0_8 = arith.constant 0 : index
    %6 = vector.load %arg20[%c0_7, %c0_8] : memref<4x32xf32, #tpu.memory_space<vmem>>, vector<4x32xf32>
    %c0_9 = arith.constant 0 : index
    %c0_10 = arith.constant 0 : index
    %7 = vector.load %arg21[%c0_9, %c0_10] : memref<4x32xf32, #tpu.memory_space<vmem>>, vector<4x32xf32>
    %c0_11 = arith.constant 0 : index
    %c0_12 = arith.constant 0 : index
    %c0_13 = arith.constant 0 : index
    %8 = vector.load %arg4[%c0_11, %c0_12, %c0_13] : memref<3x64x128xbf16, #tpu.memory_space<vmem>>, vector<3x64x128xbf16>
    %c0_14 = arith.constant 0 : index
    %c0_15 = arith.constant 0 : index
    %c0_16 = arith.constant 0 : index
    %9 = vector.load %arg5[%c0_14, %c0_15, %c0_16] : memref<3x32x128xbf16, #tpu.memory_space<vmem>>, vector<3x32x128xbf16>
    %c0_17 = arith.constant 0 : index
    %c0_18 = arith.constant 0 : index
    %10 = vector.load %arg6[%c0_17, %c0_18] : memref<1x128xf32, #tpu.memory_space<vmem>>, vector<1x128xf32>
    %c0_19 = arith.constant 0 : index
    %c0_20 = arith.constant 0 : index
    %11 = vector.load %arg7[%c0_19, %c0_20] : memref<4x32xf32, #tpu.memory_space<vmem>>, vector<4x32xf32>
    %c0_21 = arith.constant 0 : index
    %c0_22 = arith.constant 0 : index
    %12 = vector.load %arg8[%c0_21, %c0_22] : memref<4x32xf32, #tpu.memory_space<vmem>>, vector<4x32xf32>
    %c0_23 = arith.constant 0 : index
    %c0_24 = arith.constant 0 : index
    %13 = vector.load %arg9[%c0_23, %c0_24] : memref<4x32xf32, #tpu.memory_space<vmem>>, vector<4x32xf32>
    %14 = arith.truncf %5 : vector<4x64xf32> to vector<4x64xbf16>
    %15 = arith.truncf %6 : vector<4x32xf32> to vector<4x32xbf16>
    %cst = arith.constant 0.000000e+00 : f32
    %16 = vector.broadcast %cst : f32 to vector<4x128xf32>
    %17 = vector.extract_strided_slice %3 {offsets = [0, 0, 0], sizes = [1, 4, 4], strides = [1, 1, 1]} : vector<3x4x4xbf16> to vector<1x4x4xbf16>
    %18 = vector.shape_cast %17 : vector<1x4x4xbf16> to vector<4x4xbf16>
    %cst_25 = arith.constant dense<0.000000e+00> : vector<4x64xf32>
    %19 = tpu.matmul %18, %14, %cst_25 {dimension_numbers = #tpu.dot_dimension_numbers<[1], [0], [0], [1], [0, 0, 1, 1], [], []>} : vector<4x4xbf16>, vector<4x64xbf16>, vector<4x64xf32> -> vector<4x64xf32>
    %20 = arith.truncf %19 : vector<4x64xf32> to vector<4x64xbf16>
    %21 = vector.extract_strided_slice %3 {offsets = [0, 0, 0], sizes = [1, 4, 4], strides = [1, 1, 1]} : vector<3x4x4xbf16> to vector<1x4x4xbf16>
    %22 = vector.shape_cast %21 : vector<1x4x4xbf16> to vector<4x4xbf16>
    %cst_26 = arith.constant dense<0.000000e+00> : vector<4x32xf32>
    %23 = tpu.matmul %22, %15, %cst_26 {dimension_numbers = #tpu.dot_dimension_numbers<[1], [0], [0], [1], [0, 0, 1, 1], [], []>} : vector<4x4xbf16>, vector<4x32xbf16>, vector<4x32xf32> -> vector<4x32xf32>
    %24 = arith.truncf %23 : vector<4x32xf32> to vector<4x32xbf16>
    %25 = vector.extract_strided_slice %8 {offsets = [0, 0, 0], sizes = [1, 64, 128], strides = [1, 1, 1]} : vector<3x64x128xbf16> to vector<1x64x128xbf16>
    %26 = vector.shape_cast %25 : vector<1x64x128xbf16> to vector<64x128xbf16>
    %cst_27 = arith.constant dense<0.000000e+00> : vector<4x128xf32>
    %27 = tpu.matmul %20, %26, %cst_27 {dimension_numbers = #tpu.dot_dimension_numbers<[1], [0], [0], [1], [0, 0, 1, 1], [], []>} : vector<4x64xbf16>, vector<64x128xbf16>, vector<4x128xf32> -> vector<4x128xf32>
    %28 = arith.addf %16, %27 : vector<4x128xf32>
    %29 = vector.extract_strided_slice %9 {offsets = [0, 0, 0], sizes = [1, 32, 128], strides = [1, 1, 1]} : vector<3x32x128xbf16> to vector<1x32x128xbf16>
    %30 = vector.shape_cast %29 : vector<1x32x128xbf16> to vector<32x128xbf16>
    %cst_28 = arith.constant dense<0.000000e+00> : vector<4x128xf32>
    %31 = tpu.matmul %24, %30, %cst_28 {dimension_numbers = #tpu.dot_dimension_numbers<[1], [0], [0], [1], [0, 0, 1, 1], [], []>} : vector<4x32xbf16>, vector<32x128xbf16>, vector<4x128xf32> -> vector<4x128xf32>
    %32 = arith.addf %28, %31 : vector<4x128xf32>
    %33 = vector.extract_strided_slice %3 {offsets = [1, 0, 0], sizes = [1, 4, 4], strides = [1, 1, 1]} : vector<3x4x4xbf16> to vector<1x4x4xbf16>
    %34 = vector.shape_cast %33 : vector<1x4x4xbf16> to vector<4x4xbf16>
    %cst_29 = arith.constant dense<0.000000e+00> : vector<4x64xf32>
    %35 = tpu.matmul %34, %14, %cst_29 {dimension_numbers = #tpu.dot_dimension_numbers<[1], [0], [0], [1], [0, 0, 1, 1], [], []>} : vector<4x4xbf16>, vector<4x64xbf16>, vector<4x64xf32> -> vector<4x64xf32>
    %36 = arith.truncf %35 : vector<4x64xf32> to vector<4x64xbf16>
    %37 = vector.extract_strided_slice %3 {offsets = [1, 0, 0], sizes = [1, 4, 4], strides = [1, 1, 1]} : vector<3x4x4xbf16> to vector<1x4x4xbf16>
    %38 = vector.shape_cast %37 : vector<1x4x4xbf16> to vector<4x4xbf16>
    %cst_30 = arith.constant dense<0.000000e+00> : vector<4x32xf32>
    %39 = tpu.matmul %38, %15, %cst_30 {dimension_numbers = #tpu.dot_dimension_numbers<[1], [0], [0], [1], [0, 0, 1, 1], [], []>} : vector<4x4xbf16>, vector<4x32xbf16>, vector<4x32xf32> -> vector<4x32xf32>
    %40 = arith.truncf %39 : vector<4x32xf32> to vector<4x32xbf16>
    %41 = vector.extract_strided_slice %8 {offsets = [1, 0, 0], sizes = [1, 64, 128], strides = [1, 1, 1]} : vector<3x64x128xbf16> to vector<1x64x128xbf16>
    %42 = vector.shape_cast %41 : vector<1x64x128xbf16> to vector<64x128xbf16>
    %cst_31 = arith.constant dense<0.000000e+00> : vector<4x128xf32>
    %43 = tpu.matmul %36, %42, %cst_31 {dimension_numbers = #tpu.dot_dimension_numbers<[1], [0], [0], [1], [0, 0, 1, 1], [], []>} : vector<4x64xbf16>, vector<64x128xbf16>, vector<4x128xf32> -> vector<4x128xf32>
    %44 = arith.addf %32, %43 : vector<4x128xf32>
    %45 = vector.extract_strided_slice %9 {offsets = [1, 0, 0], sizes = [1, 32, 128], strides = [1, 1, 1]} : vector<3x32x128xbf16> to vector<1x32x128xbf16>
    %46 = vector.shape_cast %45 : vector<1x32x128xbf16> to vector<32x128xbf16>
    %cst_32 = arith.constant dense<0.000000e+00> : vector<4x128xf32>
    %47 = tpu.matmul %40, %46, %cst_32 {dimension_numbers = #tpu.dot_dimension_numbers<[1], [0], [0], [1], [0, 0, 1, 1], [], []>} : vector<4x32xbf16>, vector<32x128xbf16>, vector<4x128xf32> -> vector<4x128xf32>
    %48 = arith.addf %44, %47 : vector<4x128xf32>
    %49 = vector.extract_strided_slice %3 {offsets = [2, 0, 0], sizes = [1, 4, 4], strides = [1, 1, 1]} : vector<3x4x4xbf16> to vector<1x4x4xbf16>
    %50 = vector.shape_cast %49 : vector<1x4x4xbf16> to vector<4x4xbf16>
    %cst_33 = arith.constant dense<0.000000e+00> : vector<4x64xf32>
    %51 = tpu.matmul %50, %14, %cst_33 {dimension_numbers = #tpu.dot_dimension_numbers<[1], [0], [0], [1], [0, 0, 1, 1], [], []>} : vector<4x4xbf16>, vector<4x64xbf16>, vector<4x64xf32> -> vector<4x64xf32>
    %52 = arith.truncf %51 : vector<4x64xf32> to vector<4x64xbf16>
    %53 = vector.extract_strided_slice %3 {offsets = [2, 0, 0], sizes = [1, 4, 4], strides = [1, 1, 1]} : vector<3x4x4xbf16> to vector<1x4x4xbf16>
    %54 = vector.shape_cast %53 : vector<1x4x4xbf16> to vector<4x4xbf16>
    %cst_34 = arith.constant dense<0.000000e+00> : vector<4x32xf32>
    %55 = tpu.matmul %54, %15, %cst_34 {dimension_numbers = #tpu.dot_dimension_numbers<[1], [0], [0], [1], [0, 0, 1, 1], [], []>} : vector<4x4xbf16>, vector<4x32xbf16>, vector<4x32xf32> -> vector<4x32xf32>
    %56 = arith.truncf %55 : vector<4x32xf32> to vector<4x32xbf16>
    %57 = vector.extract_strided_slice %8 {offsets = [2, 0, 0], sizes = [1, 64, 128], strides = [1, 1, 1]} : vector<3x64x128xbf16> to vector<1x64x128xbf16>
    %58 = vector.shape_cast %57 : vector<1x64x128xbf16> to vector<64x128xbf16>
    %cst_35 = arith.constant dense<0.000000e+00> : vector<4x128xf32>
    %59 = tpu.matmul %52, %58, %cst_35 {dimension_numbers = #tpu.dot_dimension_numbers<[1], [0], [0], [1], [0, 0, 1, 1], [], []>} : vector<4x64xbf16>, vector<64x128xbf16>, vector<4x128xf32> -> vector<4x128xf32>
    %60 = arith.addf %48, %59 : vector<4x128xf32>
    %61 = vector.extract_strided_slice %9 {offsets = [2, 0, 0], sizes = [1, 32, 128], strides = [1, 1, 1]} : vector<3x32x128xbf16> to vector<1x32x128xbf16>
    %62 = vector.shape_cast %61 : vector<1x32x128xbf16> to vector<32x128xbf16>
    %cst_36 = arith.constant dense<0.000000e+00> : vector<4x128xf32>
    %63 = tpu.matmul %56, %62, %cst_36 {dimension_numbers = #tpu.dot_dimension_numbers<[1], [0], [0], [1], [0, 0, 1, 1], [], []>} : vector<4x32xbf16>, vector<32x128xbf16>, vector<4x128xf32> -> vector<4x128xf32>
    %64 = arith.addf %60, %63 : vector<4x128xf32>
    %65 = vector.broadcast %10 : vector<1x128xf32> to vector<4x128xf32>
    %66 = arith.addf %64, %65 : vector<4x128xf32>
    %67 = vector.extract_strided_slice %66 {offsets = [0, 0], sizes = [4, 32], strides = [1, 1]} : vector<4x128xf32> to vector<4x32xf32>
    %68 = arith.mulf %11, %7 : vector<4x32xf32>
    %69 = arith.addf %67, %68 : vector<4x32xf32>
    %70 = arith.negf %69 : vector<4x32xf32>
    %71 = math.exp %70 : vector<4x32xf32>
    %cst_37 = arith.constant 1.000000e+00 : f32
    %72 = vector.broadcast %cst_37 : f32 to vector<4x32xf32>
    %73 = arith.addf %72, %71 : vector<4x32xf32>
    %74 = arith.divf %72, %73 : vector<4x32xf32>
    %75 = vector.extract_strided_slice %66 {offsets = [0, 32], sizes = [4, 32], strides = [1, 1]} : vector<4x128xf32> to vector<4x32xf32>
    %76 = arith.mulf %12, %7 : vector<4x32xf32>
    %77 = arith.addf %75, %76 : vector<4x32xf32>
    %78 = arith.negf %77 : vector<4x32xf32>
    %79 = math.exp %78 : vector<4x32xf32>
    %cst_38 = arith.constant 1.000000e+00 : f32
    %80 = vector.broadcast %cst_38 : f32 to vector<4x32xf32>
    %81 = arith.addf %80, %79 : vector<4x32xf32>
    %82 = arith.divf %80, %81 : vector<4x32xf32>
    %83 = arith.mulf %82, %7 : vector<4x32xf32>
    %84 = vector.extract_strided_slice %66 {offsets = [0, 64], sizes = [4, 32], strides = [1, 1]} : vector<4x128xf32> to vector<4x32xf32>
    %85 = math.tanh %84 : vector<4x32xf32>
    %86 = arith.mulf %74, %85 : vector<4x32xf32>
    %87 = arith.addf %83, %86 : vector<4x32xf32>
    %88 = vector.extract_strided_slice %66 {offsets = [0, 96], sizes = [4, 32], strides = [1, 1]} : vector<4x128xf32> to vector<4x32xf32>
    %89 = arith.mulf %13, %87 : vector<4x32xf32>
    %90 = arith.addf %88, %89 : vector<4x32xf32>
    %91 = arith.negf %90 : vector<4x32xf32>
    %92 = math.exp %91 : vector<4x32xf32>
    %cst_39 = arith.constant 1.000000e+00 : f32
    %93 = vector.broadcast %cst_39 : f32 to vector<4x32xf32>
    %94 = arith.addf %93, %92 : vector<4x32xf32>
    %95 = arith.divf %93, %94 : vector<4x32xf32>
    %96 = math.tanh %87 : vector<4x32xf32>
    %97 = arith.mulf %95, %96 : vector<4x32xf32>
    %c0_40 = arith.constant 0 : index
    %c0_41 = arith.constant 0 : index
    %98 = vector.load %arg22[%c0_40, %c0_41] : memref<4x32xf32, #tpu.memory_space<vmem>>, vector<4x32xf32>
    %c0_42 = arith.constant 0 : index
    %c0_43 = arith.constant 0 : index
    %99 = vector.load %arg23[%c0_42, %c0_43] : memref<4x32xf32, #tpu.memory_space<vmem>>, vector<4x32xf32>
    %c0_44 = arith.constant 0 : index
    %c0_45 = arith.constant 0 : index
    %c0_46 = arith.constant 0 : index
    %100 = vector.load %arg10[%c0_44, %c0_45, %c0_46] : memref<3x32x128xbf16, #tpu.memory_space<vmem>>, vector<3x32x128xbf16>
    %c0_47 = arith.constant 0 : index
    %c0_48 = arith.constant 0 : index
    %c0_49 = arith.constant 0 : index
    %101 = vector.load %arg11[%c0_47, %c0_48, %c0_49] : memref<3x32x128xbf16, #tpu.memory_space<vmem>>, vector<3x32x128xbf16>
    %c0_50 = arith.constant 0 : index
    %c0_51 = arith.constant 0 : index
    %102 = vector.load %arg12[%c0_50, %c0_51] : memref<1x128xf32, #tpu.memory_space<vmem>>, vector<1x128xf32>
    %c0_52 = arith.constant 0 : index
    %c0_53 = arith.constant 0 : index
    %103 = vector.load %arg13[%c0_52, %c0_53] : memref<4x32xf32, #tpu.memory_space<vmem>>, vector<4x32xf32>
    %c0_54 = arith.constant 0 : index
    %c0_55 = arith.constant 0 : index
    %104 = vector.load %arg14[%c0_54, %c0_55] : memref<4x32xf32, #tpu.memory_space<vmem>>, vector<4x32xf32>
    %c0_56 = arith.constant 0 : index
    %c0_57 = arith.constant 0 : index
    %105 = vector.load %arg15[%c0_56, %c0_57] : memref<4x32xf32, #tpu.memory_space<vmem>>, vector<4x32xf32>
    %106 = arith.truncf %97 : vector<4x32xf32> to vector<4x32xbf16>
    %107 = arith.truncf %98 : vector<4x32xf32> to vector<4x32xbf16>
    %cst_58 = arith.constant 0.000000e+00 : f32
    %108 = vector.broadcast %cst_58 : f32 to vector<4x128xf32>
    %109 = vector.extract_strided_slice %3 {offsets = [0, 0, 0], sizes = [1, 4, 4], strides = [1, 1, 1]} : vector<3x4x4xbf16> to vector<1x4x4xbf16>
    %110 = vector.shape_cast %109 : vector<1x4x4xbf16> to vector<4x4xbf16>
    %cst_59 = arith.constant dense<0.000000e+00> : vector<4x32xf32>
    %111 = tpu.matmul %110, %106, %cst_59 {dimension_numbers = #tpu.dot_dimension_numbers<[1], [0], [0], [1], [0, 0, 1, 1], [], []>} : vector<4x4xbf16>, vector<4x32xbf16>, vector<4x32xf32> -> vector<4x32xf32>
    %112 = arith.truncf %111 : vector<4x32xf32> to vector<4x32xbf16>
    %113 = vector.extract_strided_slice %3 {offsets = [0, 0, 0], sizes = [1, 4, 4], strides = [1, 1, 1]} : vector<3x4x4xbf16> to vector<1x4x4xbf16>
    %114 = vector.shape_cast %113 : vector<1x4x4xbf16> to vector<4x4xbf16>
    %cst_60 = arith.constant dense<0.000000e+00> : vector<4x32xf32>
    %115 = tpu.matmul %114, %107, %cst_60 {dimension_numbers = #tpu.dot_dimension_numbers<[1], [0], [0], [1], [0, 0, 1, 1], [], []>} : vector<4x4xbf16>, vector<4x32xbf16>, vector<4x32xf32> -> vector<4x32xf32>
    %116 = arith.truncf %115 : vector<4x32xf32> to vector<4x32xbf16>
    %117 = vector.extract_strided_slice %100 {offsets = [0, 0, 0], sizes = [1, 32, 128], strides = [1, 1, 1]} : vector<3x32x128xbf16> to vector<1x32x128xbf16>
    %118 = vector.shape_cast %117 : vector<1x32x128xbf16> to vector<32x128xbf16>
    %cst_61 = arith.constant dense<0.000000e+00> : vector<4x128xf32>
    %119 = tpu.matmul %112, %118, %cst_61 {dimension_numbers = #tpu.dot_dimension_numbers<[1], [0], [0], [1], [0, 0, 1, 1], [], []>} : vector<4x32xbf16>, vector<32x128xbf16>, vector<4x128xf32> -> vector<4x128xf32>
    %120 = arith.addf %108, %119 : vector<4x128xf32>
    %121 = vector.extract_strided_slice %101 {offsets = [0, 0, 0], sizes = [1, 32, 128], strides = [1, 1, 1]} : vector<3x32x128xbf16> to vector<1x32x128xbf16>
    %122 = vector.shape_cast %121 : vector<1x32x128xbf16> to vector<32x128xbf16>
    %cst_62 = arith.constant dense<0.000000e+00> : vector<4x128xf32>
    %123 = tpu.matmul %116, %122, %cst_62 {dimension_numbers = #tpu.dot_dimension_numbers<[1], [0], [0], [1], [0, 0, 1, 1], [], []>} : vector<4x32xbf16>, vector<32x128xbf16>, vector<4x128xf32> -> vector<4x128xf32>
    %124 = arith.addf %120, %123 : vector<4x128xf32>
    %125 = vector.extract_strided_slice %3 {offsets = [1, 0, 0], sizes = [1, 4, 4], strides = [1, 1, 1]} : vector<3x4x4xbf16> to vector<1x4x4xbf16>
    %126 = vector.shape_cast %125 : vector<1x4x4xbf16> to vector<4x4xbf16>
    %cst_63 = arith.constant dense<0.000000e+00> : vector<4x32xf32>
    %127 = tpu.matmul %126, %106, %cst_63 {dimension_numbers = #tpu.dot_dimension_numbers<[1], [0], [0], [1], [0, 0, 1, 1], [], []>} : vector<4x4xbf16>, vector<4x32xbf16>, vector<4x32xf32> -> vector<4x32xf32>
    %128 = arith.truncf %127 : vector<4x32xf32> to vector<4x32xbf16>
    %129 = vector.extract_strided_slice %3 {offsets = [1, 0, 0], sizes = [1, 4, 4], strides = [1, 1, 1]} : vector<3x4x4xbf16> to vector<1x4x4xbf16>
    %130 = vector.shape_cast %129 : vector<1x4x4xbf16> to vector<4x4xbf16>
    %cst_64 = arith.constant dense<0.000000e+00> : vector<4x32xf32>
    %131 = tpu.matmul %130, %107, %cst_64 {dimension_numbers = #tpu.dot_dimension_numbers<[1], [0], [0], [1], [0, 0, 1, 1], [], []>} : vector<4x4xbf16>, vector<4x32xbf16>, vector<4x32xf32> -> vector<4x32xf32>
    %132 = arith.truncf %131 : vector<4x32xf32> to vector<4x32xbf16>
    %133 = vector.extract_strided_slice %100 {offsets = [1, 0, 0], sizes = [1, 32, 128], strides = [1, 1, 1]} : vector<3x32x128xbf16> to vector<1x32x128xbf16>
    %134 = vector.shape_cast %133 : vector<1x32x128xbf16> to vector<32x128xbf16>
    %cst_65 = arith.constant dense<0.000000e+00> : vector<4x128xf32>
    %135 = tpu.matmul %128, %134, %cst_65 {dimension_numbers = #tpu.dot_dimension_numbers<[1], [0], [0], [1], [0, 0, 1, 1], [], []>} : vector<4x32xbf16>, vector<32x128xbf16>, vector<4x128xf32> -> vector<4x128xf32>
    %136 = arith.addf %124, %135 : vector<4x128xf32>
    %137 = vector.extract_strided_slice %101 {offsets = [1, 0, 0], sizes = [1, 32, 128], strides = [1, 1, 1]} : vector<3x32x128xbf16> to vector<1x32x128xbf16>
    %138 = vector.shape_cast %137 : vector<1x32x128xbf16> to vector<32x128xbf16>
    %cst_66 = arith.constant dense<0.000000e+00> : vector<4x128xf32>
    %139 = tpu.matmul %132, %138, %cst_66 {dimension_numbers = #tpu.dot_dimension_numbers<[1], [0], [0], [1], [0, 0, 1, 1], [], []>} : vector<4x32xbf16>, vector<32x128xbf16>, vector<4x128xf32> -> vector<4x128xf32>
    %140 = arith.addf %136, %139 : vector<4x128xf32>
    %141 = vector.extract_strided_slice %3 {offsets = [2, 0, 0], sizes = [1, 4, 4], strides = [1, 1, 1]} : vector<3x4x4xbf16> to vector<1x4x4xbf16>
    %142 = vector.shape_cast %141 : vector<1x4x4xbf16> to vector<4x4xbf16>
    %cst_67 = arith.constant dense<0.000000e+00> : vector<4x32xf32>
    %143 = tpu.matmul %142, %106, %cst_67 {dimension_numbers = #tpu.dot_dimension_numbers<[1], [0], [0], [1], [0, 0, 1, 1], [], []>} : vector<4x4xbf16>, vector<4x32xbf16>, vector<4x32xf32> -> vector<4x32xf32>
    %144 = arith.truncf %143 : vector<4x32xf32> to vector<4x32xbf16>
    %145 = vector.extract_strided_slice %3 {offsets = [2, 0, 0], sizes = [1, 4, 4], strides = [1, 1, 1]} : vector<3x4x4xbf16> to vector<1x4x4xbf16>
    %146 = vector.shape_cast %145 : vector<1x4x4xbf16> to vector<4x4xbf16>
    %cst_68 = arith.constant dense<0.000000e+00> : vector<4x32xf32>
    %147 = tpu.matmul %146, %107, %cst_68 {dimension_numbers = #tpu.dot_dimension_numbers<[1], [0], [0], [1], [0, 0, 1, 1], [], []>} : vector<4x4xbf16>, vector<4x32xbf16>, vector<4x32xf32> -> vector<4x32xf32>
    %148 = arith.truncf %147 : vector<4x32xf32> to vector<4x32xbf16>
    %149 = vector.extract_strided_slice %100 {offsets = [2, 0, 0], sizes = [1, 32, 128], strides = [1, 1, 1]} : vector<3x32x128xbf16> to vector<1x32x128xbf16>
    %150 = vector.shape_cast %149 : vector<1x32x128xbf16> to vector<32x128xbf16>
    %cst_69 = arith.constant dense<0.000000e+00> : vector<4x128xf32>
    %151 = tpu.matmul %144, %150, %cst_69 {dimension_numbers = #tpu.dot_dimension_numbers<[1], [0], [0], [1], [0, 0, 1, 1], [], []>} : vector<4x32xbf16>, vector<32x128xbf16>, vector<4x128xf32> -> vector<4x128xf32>
    %152 = arith.addf %140, %151 : vector<4x128xf32>
    %153 = vector.extract_strided_slice %101 {offsets = [2, 0, 0], sizes = [1, 32, 128], strides = [1, 1, 1]} : vector<3x32x128xbf16> to vector<1x32x128xbf16>
    %154 = vector.shape_cast %153 : vector<1x32x128xbf16> to vector<32x128xbf16>
    %cst_70 = arith.constant dense<0.000000e+00> : vector<4x128xf32>
    %155 = tpu.matmul %148, %154, %cst_70 {dimension_numbers = #tpu.dot_dimension_numbers<[1], [0], [0], [1], [0, 0, 1, 1], [], []>} : vector<4x32xbf16>, vector<32x128xbf16>, vector<4x128xf32> -> vector<4x128xf32>
    %156 = arith.addf %152, %155 : vector<4x128xf32>
    %157 = vector.broadcast %102 : vector<1x128xf32> to vector<4x128xf32>
    %158 = arith.addf %156, %157 : vector<4x128xf32>
    %159 = vector.extract_strided_slice %158 {offsets = [0, 0], sizes = [4, 32], strides = [1, 1]} : vector<4x128xf32> to vector<4x32xf32>
    %160 = arith.mulf %103, %99 : vector<4x32xf32>
    %161 = arith.addf %159, %160 : vector<4x32xf32>
    %162 = arith.negf %161 : vector<4x32xf32>
    %163 = math.exp %162 : vector<4x32xf32>
    %cst_71 = arith.constant 1.000000e+00 : f32
    %164 = vector.broadcast %cst_71 : f32 to vector<4x32xf32>
    %165 = arith.addf %164, %163 : vector<4x32xf32>
    %166 = arith.divf %164, %165 : vector<4x32xf32>
    %167 = vector.extract_strided_slice %158 {offsets = [0, 32], sizes = [4, 32], strides = [1, 1]} : vector<4x128xf32> to vector<4x32xf32>
    %168 = arith.mulf %104, %99 : vector<4x32xf32>
    %169 = arith.addf %167, %168 : vector<4x32xf32>
    %170 = arith.negf %169 : vector<4x32xf32>
    %171 = math.exp %170 : vector<4x32xf32>
    %cst_72 = arith.constant 1.000000e+00 : f32
    %172 = vector.broadcast %cst_72 : f32 to vector<4x32xf32>
    %173 = arith.addf %172, %171 : vector<4x32xf32>
    %174 = arith.divf %172, %173 : vector<4x32xf32>
    %175 = arith.mulf %174, %99 : vector<4x32xf32>
    %176 = vector.extract_strided_slice %158 {offsets = [0, 64], sizes = [4, 32], strides = [1, 1]} : vector<4x128xf32> to vector<4x32xf32>
    %177 = math.tanh %176 : vector<4x32xf32>
    %178 = arith.mulf %166, %177 : vector<4x32xf32>
    %179 = arith.addf %175, %178 : vector<4x32xf32>
    %180 = vector.extract_strided_slice %158 {offsets = [0, 96], sizes = [4, 32], strides = [1, 1]} : vector<4x128xf32> to vector<4x32xf32>
    %181 = arith.mulf %105, %179 : vector<4x32xf32>
    %182 = arith.addf %180, %181 : vector<4x32xf32>
    %183 = arith.negf %182 : vector<4x32xf32>
    %184 = math.exp %183 : vector<4x32xf32>
    %cst_73 = arith.constant 1.000000e+00 : f32
    %185 = vector.broadcast %cst_73 : f32 to vector<4x32xf32>
    %186 = arith.addf %185, %184 : vector<4x32xf32>
    %187 = arith.divf %185, %186 : vector<4x32xf32>
    %188 = math.tanh %179 : vector<4x32xf32>
    %189 = arith.mulf %187, %188 : vector<4x32xf32>
    %c0_74 = arith.constant 0 : index
    %c0_75 = arith.constant 0 : index
    %190 = vector.load %arg20[%c0_74, %c0_75] : memref<4x32xf32, #tpu.memory_space<vmem>>, vector<4x32xf32>
    tpu.vector_store %arg20[%c0_74, %c0_75], %97 {strides = array<i32>} : memref<4x32xf32, #tpu.memory_space<vmem>>, vector<4x32xf32>,
    %c0_76 = arith.constant 0 : index
    %c0_77 = arith.constant 0 : index
    %191 = vector.load %arg21[%c0_76, %c0_77] : memref<4x32xf32, #tpu.memory_space<vmem>>, vector<4x32xf32>
    tpu.vector_store %arg21[%c0_76, %c0_77], %87 {strides = array<i32>} : memref<4x32xf32, #tpu.memory_space<vmem>>, vector<4x32xf32>,
    %c0_78 = arith.constant 0 : index
    %c0_79 = arith.constant 0 : index
    %192 = vector.load %arg22[%c0_78, %c0_79] : memref<4x32xf32, #tpu.memory_space<vmem>>, vector<4x32xf32>
    tpu.vector_store %arg22[%c0_78, %c0_79], %189 {strides = array<i32>} : memref<4x32xf32, #tpu.memory_space<vmem>>, vector<4x32xf32>,
    %c0_80 = arith.constant 0 : index
    %c0_81 = arith.constant 0 : index
    %193 = vector.load %arg23[%c0_80, %c0_81] : memref<4x32xf32, #tpu.memory_space<vmem>>, vector<4x32xf32>
    tpu.vector_store %arg23[%c0_80, %c0_81], %179 {strides = array<i32>} : memref<4x32xf32, #tpu.memory_space<vmem>>, vector<4x32xf32>,
    %c3_i32 = arith.constant 3 : i32
    %194 = arith.cmpi eq, %arg1, %c3_i32 : i32
    %195 = arith.extui %194 : i1 to i32
    %c0_i32_82 = arith.constant 0 : i32
    %196 = arith.cmpi ne, %195, %c0_i32_82 : i32
    scf.if %196 {
      %c0_83 = arith.constant 0 : index
      %c0_84 = arith.constant 0 : index
      %c0_85 = arith.constant 0 : index
      %197 = vector.load %arg16[%c0_83, %c0_84, %c0_85] : memref<1x4x32xf32, #tpu.memory_space<vmem>>, vector<1x4x32xf32>
      %198 = vector.shape_cast %197 : vector<1x4x32xf32> to vector<4x32xf32>
      %199 = vector.shape_cast %97 : vector<4x32xf32> to vector<1x4x32xf32>
      tpu.vector_store %arg16[%c0_83, %c0_84, %c0_85], %199 {strides = array<i32>} : memref<1x4x32xf32, #tpu.memory_space<vmem>>, vector<1x4x32xf32>,
      %c0_86 = arith.constant 0 : index
      %c0_87 = arith.constant 0 : index
      %c0_88 = arith.constant 0 : index
      %200 = vector.load %arg17[%c0_86, %c0_87, %c0_88] : memref<1x4x32xf32, #tpu.memory_space<vmem>>, vector<1x4x32xf32>
      %201 = vector.shape_cast %200 : vector<1x4x32xf32> to vector<4x32xf32>
      %202 = vector.shape_cast %87 : vector<4x32xf32> to vector<1x4x32xf32>
      tpu.vector_store %arg17[%c0_86, %c0_87, %c0_88], %202 {strides = array<i32>} : memref<1x4x32xf32, #tpu.memory_space<vmem>>, vector<1x4x32xf32>,
      %c0_89 = arith.constant 0 : index
      %c0_90 = arith.constant 0 : index
      %c0_91 = arith.constant 0 : index
      %203 = vector.load %arg18[%c0_89, %c0_90, %c0_91] : memref<1x4x32xf32, #tpu.memory_space<vmem>>, vector<1x4x32xf32>
      %204 = vector.shape_cast %203 : vector<1x4x32xf32> to vector<4x32xf32>
      %205 = vector.shape_cast %189 : vector<4x32xf32> to vector<1x4x32xf32>
      tpu.vector_store %arg18[%c0_89, %c0_90, %c0_91], %205 {strides = array<i32>} : memref<1x4x32xf32, #tpu.memory_space<vmem>>, vector<1x4x32xf32>,
      %c0_92 = arith.constant 0 : index
      %c0_93 = arith.constant 0 : index
      %c0_94 = arith.constant 0 : index
      %206 = vector.load %arg19[%c0_92, %c0_93, %c0_94] : memref<1x4x32xf32, #tpu.memory_space<vmem>>, vector<1x4x32xf32>
      %207 = vector.shape_cast %206 : vector<1x4x32xf32> to vector<4x32xf32>
      %208 = vector.shape_cast %179 : vector<4x32xf32> to vector<1x4x32xf32>
      tpu.vector_store %arg19[%c0_92, %c0_93, %c0_94], %208 {strides = array<i32>} : memref<1x4x32xf32, #tpu.memory_space<vmem>>, vector<1x4x32xf32>,
    } else {
    }
    return
  }
  func.func @transform_0(%arg0: i32, %arg1: i32) -> (i32, i32, i32, i32) {
    %c0_i32 = arith.constant 0 : i32
    %c0_i32_0 = arith.constant 0 : i32
    %c0_i32_1 = arith.constant 0 : i32
    return %arg0, %arg1, %c0_i32, %c0_i32_0 : i32, i32, i32, i32
  }
  func.func @transform_1(%arg0: i32, %arg1: i32) -> (i32, i32, i32) {
    %c0_i32 = arith.constant 0 : i32
    %c0_i32_0 = arith.constant 0 : i32
    %c0_i32_1 = arith.constant 0 : i32
    %c0_i32_2 = arith.constant 0 : i32
    return %c0_i32, %c0_i32_0, %c0_i32_1 : i32, i32, i32
  }
  func.func @transform_2(%arg0: i32, %arg1: i32) -> (i32, i32, i32) {
    %c0_i32 = arith.constant 0 : i32
    %c0_i32_0 = arith.constant 0 : i32
    %c0_i32_1 = arith.constant 0 : i32
    %c0_i32_2 = arith.constant 0 : i32
    return %c0_i32, %c0_i32_0, %c0_i32_1 : i32, i32, i32
  }
  func.func @transform_3(%arg0: i32, %arg1: i32) -> (i32, i32, i32) {
    %c0_i32 = arith.constant 0 : i32
    %c0_i32_0 = arith.constant 0 : i32
    %c0_i32_1 = arith.constant 0 : i32
    %c0_i32_2 = arith.constant 0 : i32
    return %c0_i32, %c0_i32_0, %c0_i32_1 : i32, i32, i32
  }
  func.func @transform_4(%arg0: i32, %arg1: i32) -> (i32, i32) {
    %c0_i32 = arith.constant 0 : i32
    %c0_i32_0 = arith.constant 0 : i32
    %c0_i32_1 = arith.constant 0 : i32
    return %c0_i32, %c0_i32_0 : i32, i32
  }
  func.func @transform_5(%arg0: i32, %arg1: i32) -> (i32, i32) {
    %c0_i32 = arith.constant 0 : i32
    %c0_i32_0 = arith.constant 0 : i32
    %c0_i32_1 = arith.constant 0 : i32
    return %c0_i32, %c0_i32_0 : i32, i32
  }
  func.func @transform_6(%arg0: i32, %arg1: i32) -> (i32, i32) {
    %c0_i32 = arith.constant 0 : i32
    %c0_i32_0 = arith.constant 0 : i32
    %c0_i32_1 = arith.constant 0 : i32
    return %c0_i32, %c0_i32_0 : i32, i32
  }
  func.func @transform_7(%arg0: i32, %arg1: i32) -> (i32, i32) {
    %c0_i32 = arith.constant 0 : i32
    %c0_i32_0 = arith.constant 0 : i32
    %c0_i32_1 = arith.constant 0 : i32
    return %c0_i32, %c0_i32_0 : i32, i32
  }
  func.func @transform_8(%arg0: i32, %arg1: i32) -> (i32, i32, i32) {
    %c0_i32 = arith.constant 0 : i32
    %c0_i32_0 = arith.constant 0 : i32
    %c0_i32_1 = arith.constant 0 : i32
    %c0_i32_2 = arith.constant 0 : i32
    return %c0_i32, %c0_i32_0, %c0_i32_1 : i32, i32, i32
  }
  func.func @transform_9(%arg0: i32, %arg1: i32) -> (i32, i32, i32) {
    %c0_i32 = arith.constant 0 : i32
    %c0_i32_0 = arith.constant 0 : i32
    %c0_i32_1 = arith.constant 0 : i32
    %c0_i32_2 = arith.constant 0 : i32
    return %c0_i32, %c0_i32_0, %c0_i32_1 : i32, i32, i32
  }
  func.func @transform_10(%arg0: i32, %arg1: i32) -> (i32, i32) {
    %c0_i32 = arith.constant 0 : i32
    %c0_i32_0 = arith.constant 0 : i32
    %c0_i32_1 = arith.constant 0 : i32
    return %c0_i32, %c0_i32_0 : i32, i32
  }
  func.func @transform_11(%arg0: i32, %arg1: i32) -> (i32, i32) {
    %c0_i32 = arith.constant 0 : i32
    %c0_i32_0 = arith.constant 0 : i32
    %c0_i32_1 = arith.constant 0 : i32
    return %c0_i32, %c0_i32_0 : i32, i32
  }
  func.func @transform_12(%arg0: i32, %arg1: i32) -> (i32, i32) {
    %c0_i32 = arith.constant 0 : i32
    %c0_i32_0 = arith.constant 0 : i32
    %c0_i32_1 = arith.constant 0 : i32
    return %c0_i32, %c0_i32_0 : i32, i32
  }
  func.func @transform_13(%arg0: i32, %arg1: i32) -> (i32, i32) {
    %c0_i32 = arith.constant 0 : i32
    %c0_i32_0 = arith.constant 0 : i32
    %c0_i32_1 = arith.constant 0 : i32
    return %c0_i32, %c0_i32_0 : i32, i32
  }
  func.func @transform_14(%arg0: i32, %arg1: i32) -> (i32, i32, i32) {
    %c0_i32 = arith.constant 0 : i32
    %c0_i32_0 = arith.constant 0 : i32
    %c0_i32_1 = arith.constant 0 : i32
    return %arg0, %c0_i32, %c0_i32_0 : i32, i32, i32
  }
  func.func @transform_15(%arg0: i32, %arg1: i32) -> (i32, i32, i32) {
    %c0_i32 = arith.constant 0 : i32
    %c0_i32_0 = arith.constant 0 : i32
    %c0_i32_1 = arith.constant 0 : i32
    return %arg0, %c0_i32, %c0_i32_0 : i32, i32, i32
  }
  func.func @transform_16(%arg0: i32, %arg1: i32) -> (i32, i32, i32) {
    %c0_i32 = arith.constant 0 : i32
    %c0_i32_0 = arith.constant 0 : i32
    %c0_i32_1 = arith.constant 0 : i32
    return %arg0, %c0_i32, %c0_i32_0 : i32, i32, i32
  }
  func.func @transform_17(%arg0: i32, %arg1: i32) -> (i32, i32, i32) {
    %c0_i32 = arith.constant 0 : i32
    %c0_i32_0 = arith.constant 0 : i32
    %c0_i32_1 = arith.constant 0 : i32
    return %arg0, %c0_i32, %c0_i32_0 : i32, i32, i32
  }
}

module attributes {stable_mosaic.version = 11 : i64} {
  func.func @_dec_lstm_kernel(%arg0: i32, %arg1: i32, %arg2: memref<1x4x32xf32, #tpu.memory_space<vmem>>, %arg3: memref<1x4x32xf32, #tpu.memory_space<vmem>>, %arg4: memref<1x4x32xf32, #tpu.memory_space<vmem>>, %arg5: memref<1x4x32xf32, #tpu.memory_space<vmem>>, %arg6: memref<1x4x32xf32, #tpu.memory_space<vmem>>, %arg7: memref<3x4x4xbf16, #tpu.memory_space<vmem>>, %arg8: memref<3x32x128xbf16, #tpu.memory_space<vmem>>, %arg9: memref<3x32x128xbf16, #tpu.memory_space<vmem>>, %arg10: memref<1x128xf32, #tpu.memory_space<vmem>>, %arg11: memref<4x32xf32, #tpu.memory_space<vmem>>, %arg12: memref<4x32xf32, #tpu.memory_space<vmem>>, %arg13: memref<4x32xf32, #tpu.memory_space<vmem>>, %arg14: memref<3x32x128xbf16, #tpu.memory_space<vmem>>, %arg15: memref<3x32x128xbf16, #tpu.memory_space<vmem>>, %arg16: memref<1x128xf32, #tpu.memory_space<vmem>>, %arg17: memref<4x32xf32, #tpu.memory_space<vmem>>, %arg18: memref<4x32xf32, #tpu.memory_space<vmem>>, %arg19: memref<4x32xf32, #tpu.memory_space<vmem>>, %arg20: memref<1x1x4x32xf32, #tpu.memory_space<vmem>>, %arg21: memref<4x32xf32, #tpu.memory_space<vmem>>, %arg22: memref<4x32xf32, #tpu.memory_space<vmem>>, %arg23: memref<4x32xf32, #tpu.memory_space<vmem>>, %arg24: memref<4x32xf32, #tpu.memory_space<vmem>>, %arg25: memref<4x32xf32, #tpu.memory_space<vmem>>) attributes {dimension_semantics = [#tpu.dimension_semantics<parallel>, #tpu.dimension_semantics<arbitrary>], iteration_bounds = array<i64: 2, 3>, scalar_prefetch = 0 : i64, scratch_operands = 5 : i64, tpu.core_type = #tpu.core_type<tc>, window_params = [{transform_indices = @transform_0, window_bounds = array<i64: 1, 4, 32>}, {transform_indices = @transform_1, window_bounds = array<i64: 1, 4, 32>}, {transform_indices = @transform_2, window_bounds = array<i64: 1, 4, 32>}, {transform_indices = @transform_3, window_bounds = array<i64: 1, 4, 32>}, {transform_indices = @transform_4, window_bounds = array<i64: 1, 4, 32>}, {pipeline_mode = #tpu.pipeline_mode<synchronous>, transform_indices = @transform_5, window_bounds = array<i64: 3, 4, 4>}, {pipeline_mode = #tpu.pipeline_mode<synchronous>, transform_indices = @transform_6, window_bounds = array<i64: 3, 32, 128>}, {pipeline_mode = #tpu.pipeline_mode<synchronous>, transform_indices = @transform_7, window_bounds = array<i64: 3, 32, 128>}, {pipeline_mode = #tpu.pipeline_mode<synchronous>, transform_indices = @transform_8, window_bounds = array<i64: 1, 128>}, {pipeline_mode = #tpu.pipeline_mode<synchronous>, transform_indices = @transform_9, window_bounds = array<i64: 4, 32>}, {pipeline_mode = #tpu.pipeline_mode<synchronous>, transform_indices = @transform_10, window_bounds = array<i64: 4, 32>}, {pipeline_mode = #tpu.pipeline_mode<synchronous>, transform_indices = @transform_11, window_bounds = array<i64: 4, 32>}, {pipeline_mode = #tpu.pipeline_mode<synchronous>, transform_indices = @transform_12, window_bounds = array<i64: 3, 32, 128>}, {pipeline_mode = #tpu.pipeline_mode<synchronous>, transform_indices = @transform_13, window_bounds = array<i64: 3, 32, 128>}, {pipeline_mode = #tpu.pipeline_mode<synchronous>, transform_indices = @transform_14, window_bounds = array<i64: 1, 128>}, {pipeline_mode = #tpu.pipeline_mode<synchronous>, transform_indices = @transform_15, window_bounds = array<i64: 4, 32>}, {pipeline_mode = #tpu.pipeline_mode<synchronous>, transform_indices = @transform_16, window_bounds = array<i64: 4, 32>}, {pipeline_mode = #tpu.pipeline_mode<synchronous>, transform_indices = @transform_17, window_bounds = array<i64: 4, 32>}, {transform_indices = @transform_18, window_bounds = array<i64: 1, 1, 4, 32>}]} {
    %c0_i32 = arith.constant 0 : i32
    %0 = arith.cmpi eq, %arg1, %c0_i32 : i32
    %1 = arith.extui %0 : i1 to i32
    %c0_i32_0 = arith.constant 0 : i32
    %2 = arith.cmpi ne, %1, %c0_i32_0 : i32
    scf.if %2 {
      %c0_86 = arith.constant 0 : index
      %c0_87 = arith.constant 0 : index
      %c0_88 = arith.constant 0 : index
      %197 = vector.load %arg2[%c0_86, %c0_87, %c0_88] : memref<1x4x32xf32, #tpu.memory_space<vmem>>, vector<1x4x32xf32>
      %198 = vector.shape_cast %197 : vector<1x4x32xf32> to vector<4x32xf32>
      %c0_89 = arith.constant 0 : index
      %c0_90 = arith.constant 0 : index
      %199 = vector.load %arg21[%c0_89, %c0_90] : memref<4x32xf32, #tpu.memory_space<vmem>>, vector<4x32xf32>
      tpu.vector_store %arg21[%c0_89, %c0_90], %198 {strides = array<i32>} : memref<4x32xf32, #tpu.memory_space<vmem>>, vector<4x32xf32>,
      %c0_91 = arith.constant 0 : index
      %c0_92 = arith.constant 0 : index
      %c0_93 = arith.constant 0 : index
      %200 = vector.load %arg3[%c0_91, %c0_92, %c0_93] : memref<1x4x32xf32, #tpu.memory_space<vmem>>, vector<1x4x32xf32>
      %201 = vector.shape_cast %200 : vector<1x4x32xf32> to vector<4x32xf32>
      %c0_94 = arith.constant 0 : index
      %c0_95 = arith.constant 0 : index
      %202 = vector.load %arg22[%c0_94, %c0_95] : memref<4x32xf32, #tpu.memory_space<vmem>>, vector<4x32xf32>
      tpu.vector_store %arg22[%c0_94, %c0_95], %201 {strides = array<i32>} : memref<4x32xf32, #tpu.memory_space<vmem>>, vector<4x32xf32>,
      %c0_96 = arith.constant 0 : index
      %c0_97 = arith.constant 0 : index
      %c0_98 = arith.constant 0 : index
      %203 = vector.load %arg4[%c0_96, %c0_97, %c0_98] : memref<1x4x32xf32, #tpu.memory_space<vmem>>, vector<1x4x32xf32>
      %204 = vector.shape_cast %203 : vector<1x4x32xf32> to vector<4x32xf32>
      %c0_99 = arith.constant 0 : index
      %c0_100 = arith.constant 0 : index
      %205 = vector.load %arg23[%c0_99, %c0_100] : memref<4x32xf32, #tpu.memory_space<vmem>>, vector<4x32xf32>
      tpu.vector_store %arg23[%c0_99, %c0_100], %204 {strides = array<i32>} : memref<4x32xf32, #tpu.memory_space<vmem>>, vector<4x32xf32>,
      %c0_101 = arith.constant 0 : index
      %c0_102 = arith.constant 0 : index
      %c0_103 = arith.constant 0 : index
      %206 = vector.load %arg5[%c0_101, %c0_102, %c0_103] : memref<1x4x32xf32, #tpu.memory_space<vmem>>, vector<1x4x32xf32>
      %207 = vector.shape_cast %206 : vector<1x4x32xf32> to vector<4x32xf32>
      %c0_104 = arith.constant 0 : index
      %c0_105 = arith.constant 0 : index
      %208 = vector.load %arg24[%c0_104, %c0_105] : memref<4x32xf32, #tpu.memory_space<vmem>>, vector<4x32xf32>
      tpu.vector_store %arg24[%c0_104, %c0_105], %207 {strides = array<i32>} : memref<4x32xf32, #tpu.memory_space<vmem>>, vector<4x32xf32>,
      %c0_106 = arith.constant 0 : index
      %c0_107 = arith.constant 0 : index
      %c0_108 = arith.constant 0 : index
      %209 = vector.load %arg6[%c0_106, %c0_107, %c0_108] : memref<1x4x32xf32, #tpu.memory_space<vmem>>, vector<1x4x32xf32>
      %210 = vector.shape_cast %209 : vector<1x4x32xf32> to vector<4x32xf32>
      %c0_109 = arith.constant 0 : index
      %c0_110 = arith.constant 0 : index
      %211 = vector.load %arg25[%c0_109, %c0_110] : memref<4x32xf32, #tpu.memory_space<vmem>>, vector<4x32xf32>
      tpu.vector_store %arg25[%c0_109, %c0_110], %210 {strides = array<i32>} : memref<4x32xf32, #tpu.memory_space<vmem>>, vector<4x32xf32>,
    } else {
    }
    %c0 = arith.constant 0 : index
    %c0_1 = arith.constant 0 : index
    %c0_2 = arith.constant 0 : index
    %3 = vector.load %arg7[%c0, %c0_1, %c0_2] : memref<3x4x4xbf16, #tpu.memory_space<vmem>>, vector<3x4x4xbf16>
    %c0_3 = arith.constant 0 : index
    %c0_4 = arith.constant 0 : index
    %4 = vector.load %arg21[%c0_3, %c0_4] : memref<4x32xf32, #tpu.memory_space<vmem>>, vector<4x32xf32>
    %c0_5 = arith.constant 0 : index
    %c0_6 = arith.constant 0 : index
    %5 = vector.load %arg22[%c0_5, %c0_6] : memref<4x32xf32, #tpu.memory_space<vmem>>, vector<4x32xf32>
    %c0_7 = arith.constant 0 : index
    %c0_8 = arith.constant 0 : index
    %6 = vector.load %arg23[%c0_7, %c0_8] : memref<4x32xf32, #tpu.memory_space<vmem>>, vector<4x32xf32>
    %c0_9 = arith.constant 0 : index
    %c0_10 = arith.constant 0 : index
    %c0_11 = arith.constant 0 : index
    %7 = vector.load %arg8[%c0_9, %c0_10, %c0_11] : memref<3x32x128xbf16, #tpu.memory_space<vmem>>, vector<3x32x128xbf16>
    %c0_12 = arith.constant 0 : index
    %c0_13 = arith.constant 0 : index
    %c0_14 = arith.constant 0 : index
    %8 = vector.load %arg9[%c0_12, %c0_13, %c0_14] : memref<3x32x128xbf16, #tpu.memory_space<vmem>>, vector<3x32x128xbf16>
    %c0_15 = arith.constant 0 : index
    %c0_16 = arith.constant 0 : index
    %9 = vector.load %arg10[%c0_15, %c0_16] : memref<1x128xf32, #tpu.memory_space<vmem>>, vector<1x128xf32>
    %c0_17 = arith.constant 0 : index
    %c0_18 = arith.constant 0 : index
    %10 = vector.load %arg11[%c0_17, %c0_18] : memref<4x32xf32, #tpu.memory_space<vmem>>, vector<4x32xf32>
    %c0_19 = arith.constant 0 : index
    %c0_20 = arith.constant 0 : index
    %11 = vector.load %arg12[%c0_19, %c0_20] : memref<4x32xf32, #tpu.memory_space<vmem>>, vector<4x32xf32>
    %c0_21 = arith.constant 0 : index
    %c0_22 = arith.constant 0 : index
    %12 = vector.load %arg13[%c0_21, %c0_22] : memref<4x32xf32, #tpu.memory_space<vmem>>, vector<4x32xf32>
    %13 = arith.truncf %4 : vector<4x32xf32> to vector<4x32xbf16>
    %14 = arith.truncf %5 : vector<4x32xf32> to vector<4x32xbf16>
    %cst = arith.constant 0.000000e+00 : f32
    %15 = vector.broadcast %cst : f32 to vector<4x128xf32>
    %16 = vector.extract_strided_slice %3 {offsets = [0, 0, 0], sizes = [1, 4, 4], strides = [1, 1, 1]} : vector<3x4x4xbf16> to vector<1x4x4xbf16>
    %17 = vector.shape_cast %16 : vector<1x4x4xbf16> to vector<4x4xbf16>
    %cst_23 = arith.constant dense<0.000000e+00> : vector<4x32xf32>
    %18 = tpu.matmul %17, %13, %cst_23 {dimension_numbers = #tpu.dot_dimension_numbers<[1], [0], [0], [1], [0, 0, 1, 1], [], []>} : vector<4x4xbf16>, vector<4x32xbf16>, vector<4x32xf32> -> vector<4x32xf32>
    %19 = arith.truncf %18 : vector<4x32xf32> to vector<4x32xbf16>
    %20 = vector.extract_strided_slice %3 {offsets = [0, 0, 0], sizes = [1, 4, 4], strides = [1, 1, 1]} : vector<3x4x4xbf16> to vector<1x4x4xbf16>
    %21 = vector.shape_cast %20 : vector<1x4x4xbf16> to vector<4x4xbf16>
    %cst_24 = arith.constant dense<0.000000e+00> : vector<4x32xf32>
    %22 = tpu.matmul %21, %14, %cst_24 {dimension_numbers = #tpu.dot_dimension_numbers<[1], [0], [0], [1], [0, 0, 1, 1], [], []>} : vector<4x4xbf16>, vector<4x32xbf16>, vector<4x32xf32> -> vector<4x32xf32>
    %23 = arith.truncf %22 : vector<4x32xf32> to vector<4x32xbf16>
    %24 = vector.extract_strided_slice %7 {offsets = [0, 0, 0], sizes = [1, 32, 128], strides = [1, 1, 1]} : vector<3x32x128xbf16> to vector<1x32x128xbf16>
    %25 = vector.shape_cast %24 : vector<1x32x128xbf16> to vector<32x128xbf16>
    %cst_25 = arith.constant dense<0.000000e+00> : vector<4x128xf32>
    %26 = tpu.matmul %19, %25, %cst_25 {dimension_numbers = #tpu.dot_dimension_numbers<[1], [0], [0], [1], [0, 0, 1, 1], [], []>} : vector<4x32xbf16>, vector<32x128xbf16>, vector<4x128xf32> -> vector<4x128xf32>
    %27 = arith.addf %15, %26 : vector<4x128xf32>
    %28 = vector.extract_strided_slice %8 {offsets = [0, 0, 0], sizes = [1, 32, 128], strides = [1, 1, 1]} : vector<3x32x128xbf16> to vector<1x32x128xbf16>
    %29 = vector.shape_cast %28 : vector<1x32x128xbf16> to vector<32x128xbf16>
    %cst_26 = arith.constant dense<0.000000e+00> : vector<4x128xf32>
    %30 = tpu.matmul %23, %29, %cst_26 {dimension_numbers = #tpu.dot_dimension_numbers<[1], [0], [0], [1], [0, 0, 1, 1], [], []>} : vector<4x32xbf16>, vector<32x128xbf16>, vector<4x128xf32> -> vector<4x128xf32>
    %31 = arith.addf %27, %30 : vector<4x128xf32>
    %32 = vector.extract_strided_slice %3 {offsets = [1, 0, 0], sizes = [1, 4, 4], strides = [1, 1, 1]} : vector<3x4x4xbf16> to vector<1x4x4xbf16>
    %33 = vector.shape_cast %32 : vector<1x4x4xbf16> to vector<4x4xbf16>
    %cst_27 = arith.constant dense<0.000000e+00> : vector<4x32xf32>
    %34 = tpu.matmul %33, %13, %cst_27 {dimension_numbers = #tpu.dot_dimension_numbers<[1], [0], [0], [1], [0, 0, 1, 1], [], []>} : vector<4x4xbf16>, vector<4x32xbf16>, vector<4x32xf32> -> vector<4x32xf32>
    %35 = arith.truncf %34 : vector<4x32xf32> to vector<4x32xbf16>
    %36 = vector.extract_strided_slice %3 {offsets = [1, 0, 0], sizes = [1, 4, 4], strides = [1, 1, 1]} : vector<3x4x4xbf16> to vector<1x4x4xbf16>
    %37 = vector.shape_cast %36 : vector<1x4x4xbf16> to vector<4x4xbf16>
    %cst_28 = arith.constant dense<0.000000e+00> : vector<4x32xf32>
    %38 = tpu.matmul %37, %14, %cst_28 {dimension_numbers = #tpu.dot_dimension_numbers<[1], [0], [0], [1], [0, 0, 1, 1], [], []>} : vector<4x4xbf16>, vector<4x32xbf16>, vector<4x32xf32> -> vector<4x32xf32>
    %39 = arith.truncf %38 : vector<4x32xf32> to vector<4x32xbf16>
    %40 = vector.extract_strided_slice %7 {offsets = [1, 0, 0], sizes = [1, 32, 128], strides = [1, 1, 1]} : vector<3x32x128xbf16> to vector<1x32x128xbf16>
    %41 = vector.shape_cast %40 : vector<1x32x128xbf16> to vector<32x128xbf16>
    %cst_29 = arith.constant dense<0.000000e+00> : vector<4x128xf32>
    %42 = tpu.matmul %35, %41, %cst_29 {dimension_numbers = #tpu.dot_dimension_numbers<[1], [0], [0], [1], [0, 0, 1, 1], [], []>} : vector<4x32xbf16>, vector<32x128xbf16>, vector<4x128xf32> -> vector<4x128xf32>
    %43 = arith.addf %31, %42 : vector<4x128xf32>
    %44 = vector.extract_strided_slice %8 {offsets = [1, 0, 0], sizes = [1, 32, 128], strides = [1, 1, 1]} : vector<3x32x128xbf16> to vector<1x32x128xbf16>
    %45 = vector.shape_cast %44 : vector<1x32x128xbf16> to vector<32x128xbf16>
    %cst_30 = arith.constant dense<0.000000e+00> : vector<4x128xf32>
    %46 = tpu.matmul %39, %45, %cst_30 {dimension_numbers = #tpu.dot_dimension_numbers<[1], [0], [0], [1], [0, 0, 1, 1], [], []>} : vector<4x32xbf16>, vector<32x128xbf16>, vector<4x128xf32> -> vector<4x128xf32>
    %47 = arith.addf %43, %46 : vector<4x128xf32>
    %48 = vector.extract_strided_slice %3 {offsets = [2, 0, 0], sizes = [1, 4, 4], strides = [1, 1, 1]} : vector<3x4x4xbf16> to vector<1x4x4xbf16>
    %49 = vector.shape_cast %48 : vector<1x4x4xbf16> to vector<4x4xbf16>
    %cst_31 = arith.constant dense<0.000000e+00> : vector<4x32xf32>
    %50 = tpu.matmul %49, %13, %cst_31 {dimension_numbers = #tpu.dot_dimension_numbers<[1], [0], [0], [1], [0, 0, 1, 1], [], []>} : vector<4x4xbf16>, vector<4x32xbf16>, vector<4x32xf32> -> vector<4x32xf32>
    %51 = arith.truncf %50 : vector<4x32xf32> to vector<4x32xbf16>
    %52 = vector.extract_strided_slice %3 {offsets = [2, 0, 0], sizes = [1, 4, 4], strides = [1, 1, 1]} : vector<3x4x4xbf16> to vector<1x4x4xbf16>
    %53 = vector.shape_cast %52 : vector<1x4x4xbf16> to vector<4x4xbf16>
    %cst_32 = arith.constant dense<0.000000e+00> : vector<4x32xf32>
    %54 = tpu.matmul %53, %14, %cst_32 {dimension_numbers = #tpu.dot_dimension_numbers<[1], [0], [0], [1], [0, 0, 1, 1], [], []>} : vector<4x4xbf16>, vector<4x32xbf16>, vector<4x32xf32> -> vector<4x32xf32>
    %55 = arith.truncf %54 : vector<4x32xf32> to vector<4x32xbf16>
    %56 = vector.extract_strided_slice %7 {offsets = [2, 0, 0], sizes = [1, 32, 128], strides = [1, 1, 1]} : vector<3x32x128xbf16> to vector<1x32x128xbf16>
    %57 = vector.shape_cast %56 : vector<1x32x128xbf16> to vector<32x128xbf16>
    %cst_33 = arith.constant dense<0.000000e+00> : vector<4x128xf32>
    %58 = tpu.matmul %51, %57, %cst_33 {dimension_numbers = #tpu.dot_dimension_numbers<[1], [0], [0], [1], [0, 0, 1, 1], [], []>} : vector<4x32xbf16>, vector<32x128xbf16>, vector<4x128xf32> -> vector<4x128xf32>
    %59 = arith.addf %47, %58 : vector<4x128xf32>
    %60 = vector.extract_strided_slice %8 {offsets = [2, 0, 0], sizes = [1, 32, 128], strides = [1, 1, 1]} : vector<3x32x128xbf16> to vector<1x32x128xbf16>
    %61 = vector.shape_cast %60 : vector<1x32x128xbf16> to vector<32x128xbf16>
    %cst_34 = arith.constant dense<0.000000e+00> : vector<4x128xf32>
    %62 = tpu.matmul %55, %61, %cst_34 {dimension_numbers = #tpu.dot_dimension_numbers<[1], [0], [0], [1], [0, 0, 1, 1], [], []>} : vector<4x32xbf16>, vector<32x128xbf16>, vector<4x128xf32> -> vector<4x128xf32>
    %63 = arith.addf %59, %62 : vector<4x128xf32>
    %64 = vector.broadcast %9 : vector<1x128xf32> to vector<4x128xf32>
    %65 = arith.addf %63, %64 : vector<4x128xf32>
    %66 = vector.extract_strided_slice %65 {offsets = [0, 0], sizes = [4, 32], strides = [1, 1]} : vector<4x128xf32> to vector<4x32xf32>
    %67 = arith.mulf %10, %6 : vector<4x32xf32>
    %68 = arith.addf %66, %67 : vector<4x32xf32>
    %69 = arith.negf %68 : vector<4x32xf32>
    %70 = math.exp %69 : vector<4x32xf32>
    %cst_35 = arith.constant 1.000000e+00 : f32
    %71 = vector.broadcast %cst_35 : f32 to vector<4x32xf32>
    %72 = arith.addf %71, %70 : vector<4x32xf32>
    %73 = arith.divf %71, %72 : vector<4x32xf32>
    %74 = vector.extract_strided_slice %65 {offsets = [0, 32], sizes = [4, 32], strides = [1, 1]} : vector<4x128xf32> to vector<4x32xf32>
    %75 = arith.mulf %11, %6 : vector<4x32xf32>
    %76 = arith.addf %74, %75 : vector<4x32xf32>
    %77 = arith.negf %76 : vector<4x32xf32>
    %78 = math.exp %77 : vector<4x32xf32>
    %cst_36 = arith.constant 1.000000e+00 : f32
    %79 = vector.broadcast %cst_36 : f32 to vector<4x32xf32>
    %80 = arith.addf %79, %78 : vector<4x32xf32>
    %81 = arith.divf %79, %80 : vector<4x32xf32>
    %82 = arith.mulf %81, %6 : vector<4x32xf32>
    %83 = vector.extract_strided_slice %65 {offsets = [0, 64], sizes = [4, 32], strides = [1, 1]} : vector<4x128xf32> to vector<4x32xf32>
    %84 = math.tanh %83 : vector<4x32xf32>
    %85 = arith.mulf %73, %84 : vector<4x32xf32>
    %86 = arith.addf %82, %85 : vector<4x32xf32>
    %87 = vector.extract_strided_slice %65 {offsets = [0, 96], sizes = [4, 32], strides = [1, 1]} : vector<4x128xf32> to vector<4x32xf32>
    %88 = arith.mulf %12, %86 : vector<4x32xf32>
    %89 = arith.addf %87, %88 : vector<4x32xf32>
    %90 = arith.negf %89 : vector<4x32xf32>
    %91 = math.exp %90 : vector<4x32xf32>
    %cst_37 = arith.constant 1.000000e+00 : f32
    %92 = vector.broadcast %cst_37 : f32 to vector<4x32xf32>
    %93 = arith.addf %92, %91 : vector<4x32xf32>
    %94 = arith.divf %92, %93 : vector<4x32xf32>
    %95 = math.tanh %86 : vector<4x32xf32>
    %96 = arith.mulf %94, %95 : vector<4x32xf32>
    %c0_38 = arith.constant 0 : index
    %c0_39 = arith.constant 0 : index
    %97 = vector.load %arg24[%c0_38, %c0_39] : memref<4x32xf32, #tpu.memory_space<vmem>>, vector<4x32xf32>
    %c0_40 = arith.constant 0 : index
    %c0_41 = arith.constant 0 : index
    %98 = vector.load %arg25[%c0_40, %c0_41] : memref<4x32xf32, #tpu.memory_space<vmem>>, vector<4x32xf32>
    %c0_42 = arith.constant 0 : index
    %c0_43 = arith.constant 0 : index
    %c0_44 = arith.constant 0 : index
    %99 = vector.load %arg14[%c0_42, %c0_43, %c0_44] : memref<3x32x128xbf16, #tpu.memory_space<vmem>>, vector<3x32x128xbf16>
    %c0_45 = arith.constant 0 : index
    %c0_46 = arith.constant 0 : index
    %c0_47 = arith.constant 0 : index
    %100 = vector.load %arg15[%c0_45, %c0_46, %c0_47] : memref<3x32x128xbf16, #tpu.memory_space<vmem>>, vector<3x32x128xbf16>
    %c0_48 = arith.constant 0 : index
    %c0_49 = arith.constant 0 : index
    %101 = vector.load %arg16[%c0_48, %c0_49] : memref<1x128xf32, #tpu.memory_space<vmem>>, vector<1x128xf32>
    %c0_50 = arith.constant 0 : index
    %c0_51 = arith.constant 0 : index
    %102 = vector.load %arg17[%c0_50, %c0_51] : memref<4x32xf32, #tpu.memory_space<vmem>>, vector<4x32xf32>
    %c0_52 = arith.constant 0 : index
    %c0_53 = arith.constant 0 : index
    %103 = vector.load %arg18[%c0_52, %c0_53] : memref<4x32xf32, #tpu.memory_space<vmem>>, vector<4x32xf32>
    %c0_54 = arith.constant 0 : index
    %c0_55 = arith.constant 0 : index
    %104 = vector.load %arg19[%c0_54, %c0_55] : memref<4x32xf32, #tpu.memory_space<vmem>>, vector<4x32xf32>
    %105 = arith.truncf %96 : vector<4x32xf32> to vector<4x32xbf16>
    %106 = arith.truncf %97 : vector<4x32xf32> to vector<4x32xbf16>
    %cst_56 = arith.constant 0.000000e+00 : f32
    %107 = vector.broadcast %cst_56 : f32 to vector<4x128xf32>
    %108 = vector.extract_strided_slice %3 {offsets = [0, 0, 0], sizes = [1, 4, 4], strides = [1, 1, 1]} : vector<3x4x4xbf16> to vector<1x4x4xbf16>
    %109 = vector.shape_cast %108 : vector<1x4x4xbf16> to vector<4x4xbf16>
    %cst_57 = arith.constant dense<0.000000e+00> : vector<4x32xf32>
    %110 = tpu.matmul %109, %105, %cst_57 {dimension_numbers = #tpu.dot_dimension_numbers<[1], [0], [0], [1], [0, 0, 1, 1], [], []>} : vector<4x4xbf16>, vector<4x32xbf16>, vector<4x32xf32> -> vector<4x32xf32>
    %111 = arith.truncf %110 : vector<4x32xf32> to vector<4x32xbf16>
    %112 = vector.extract_strided_slice %3 {offsets = [0, 0, 0], sizes = [1, 4, 4], strides = [1, 1, 1]} : vector<3x4x4xbf16> to vector<1x4x4xbf16>
    %113 = vector.shape_cast %112 : vector<1x4x4xbf16> to vector<4x4xbf16>
    %cst_58 = arith.constant dense<0.000000e+00> : vector<4x32xf32>
    %114 = tpu.matmul %113, %106, %cst_58 {dimension_numbers = #tpu.dot_dimension_numbers<[1], [0], [0], [1], [0, 0, 1, 1], [], []>} : vector<4x4xbf16>, vector<4x32xbf16>, vector<4x32xf32> -> vector<4x32xf32>
    %115 = arith.truncf %114 : vector<4x32xf32> to vector<4x32xbf16>
    %116 = vector.extract_strided_slice %99 {offsets = [0, 0, 0], sizes = [1, 32, 128], strides = [1, 1, 1]} : vector<3x32x128xbf16> to vector<1x32x128xbf16>
    %117 = vector.shape_cast %116 : vector<1x32x128xbf16> to vector<32x128xbf16>
    %cst_59 = arith.constant dense<0.000000e+00> : vector<4x128xf32>
    %118 = tpu.matmul %111, %117, %cst_59 {dimension_numbers = #tpu.dot_dimension_numbers<[1], [0], [0], [1], [0, 0, 1, 1], [], []>} : vector<4x32xbf16>, vector<32x128xbf16>, vector<4x128xf32> -> vector<4x128xf32>
    %119 = arith.addf %107, %118 : vector<4x128xf32>
    %120 = vector.extract_strided_slice %100 {offsets = [0, 0, 0], sizes = [1, 32, 128], strides = [1, 1, 1]} : vector<3x32x128xbf16> to vector<1x32x128xbf16>
    %121 = vector.shape_cast %120 : vector<1x32x128xbf16> to vector<32x128xbf16>
    %cst_60 = arith.constant dense<0.000000e+00> : vector<4x128xf32>
    %122 = tpu.matmul %115, %121, %cst_60 {dimension_numbers = #tpu.dot_dimension_numbers<[1], [0], [0], [1], [0, 0, 1, 1], [], []>} : vector<4x32xbf16>, vector<32x128xbf16>, vector<4x128xf32> -> vector<4x128xf32>
    %123 = arith.addf %119, %122 : vector<4x128xf32>
    %124 = vector.extract_strided_slice %3 {offsets = [1, 0, 0], sizes = [1, 4, 4], strides = [1, 1, 1]} : vector<3x4x4xbf16> to vector<1x4x4xbf16>
    %125 = vector.shape_cast %124 : vector<1x4x4xbf16> to vector<4x4xbf16>
    %cst_61 = arith.constant dense<0.000000e+00> : vector<4x32xf32>
    %126 = tpu.matmul %125, %105, %cst_61 {dimension_numbers = #tpu.dot_dimension_numbers<[1], [0], [0], [1], [0, 0, 1, 1], [], []>} : vector<4x4xbf16>, vector<4x32xbf16>, vector<4x32xf32> -> vector<4x32xf32>
    %127 = arith.truncf %126 : vector<4x32xf32> to vector<4x32xbf16>
    %128 = vector.extract_strided_slice %3 {offsets = [1, 0, 0], sizes = [1, 4, 4], strides = [1, 1, 1]} : vector<3x4x4xbf16> to vector<1x4x4xbf16>
    %129 = vector.shape_cast %128 : vector<1x4x4xbf16> to vector<4x4xbf16>
    %cst_62 = arith.constant dense<0.000000e+00> : vector<4x32xf32>
    %130 = tpu.matmul %129, %106, %cst_62 {dimension_numbers = #tpu.dot_dimension_numbers<[1], [0], [0], [1], [0, 0, 1, 1], [], []>} : vector<4x4xbf16>, vector<4x32xbf16>, vector<4x32xf32> -> vector<4x32xf32>
    %131 = arith.truncf %130 : vector<4x32xf32> to vector<4x32xbf16>
    %132 = vector.extract_strided_slice %99 {offsets = [1, 0, 0], sizes = [1, 32, 128], strides = [1, 1, 1]} : vector<3x32x128xbf16> to vector<1x32x128xbf16>
    %133 = vector.shape_cast %132 : vector<1x32x128xbf16> to vector<32x128xbf16>
    %cst_63 = arith.constant dense<0.000000e+00> : vector<4x128xf32>
    %134 = tpu.matmul %127, %133, %cst_63 {dimension_numbers = #tpu.dot_dimension_numbers<[1], [0], [0], [1], [0, 0, 1, 1], [], []>} : vector<4x32xbf16>, vector<32x128xbf16>, vector<4x128xf32> -> vector<4x128xf32>
    %135 = arith.addf %123, %134 : vector<4x128xf32>
    %136 = vector.extract_strided_slice %100 {offsets = [1, 0, 0], sizes = [1, 32, 128], strides = [1, 1, 1]} : vector<3x32x128xbf16> to vector<1x32x128xbf16>
    %137 = vector.shape_cast %136 : vector<1x32x128xbf16> to vector<32x128xbf16>
    %cst_64 = arith.constant dense<0.000000e+00> : vector<4x128xf32>
    %138 = tpu.matmul %131, %137, %cst_64 {dimension_numbers = #tpu.dot_dimension_numbers<[1], [0], [0], [1], [0, 0, 1, 1], [], []>} : vector<4x32xbf16>, vector<32x128xbf16>, vector<4x128xf32> -> vector<4x128xf32>
    %139 = arith.addf %135, %138 : vector<4x128xf32>
    %140 = vector.extract_strided_slice %3 {offsets = [2, 0, 0], sizes = [1, 4, 4], strides = [1, 1, 1]} : vector<3x4x4xbf16> to vector<1x4x4xbf16>
    %141 = vector.shape_cast %140 : vector<1x4x4xbf16> to vector<4x4xbf16>
    %cst_65 = arith.constant dense<0.000000e+00> : vector<4x32xf32>
    %142 = tpu.matmul %141, %105, %cst_65 {dimension_numbers = #tpu.dot_dimension_numbers<[1], [0], [0], [1], [0, 0, 1, 1], [], []>} : vector<4x4xbf16>, vector<4x32xbf16>, vector<4x32xf32> -> vector<4x32xf32>
    %143 = arith.truncf %142 : vector<4x32xf32> to vector<4x32xbf16>
    %144 = vector.extract_strided_slice %3 {offsets = [2, 0, 0], sizes = [1, 4, 4], strides = [1, 1, 1]} : vector<3x4x4xbf16> to vector<1x4x4xbf16>
    %145 = vector.shape_cast %144 : vector<1x4x4xbf16> to vector<4x4xbf16>
    %cst_66 = arith.constant dense<0.000000e+00> : vector<4x32xf32>
    %146 = tpu.matmul %145, %106, %cst_66 {dimension_numbers = #tpu.dot_dimension_numbers<[1], [0], [0], [1], [0, 0, 1, 1], [], []>} : vector<4x4xbf16>, vector<4x32xbf16>, vector<4x32xf32> -> vector<4x32xf32>
    %147 = arith.truncf %146 : vector<4x32xf32> to vector<4x32xbf16>
    %148 = vector.extract_strided_slice %99 {offsets = [2, 0, 0], sizes = [1, 32, 128], strides = [1, 1, 1]} : vector<3x32x128xbf16> to vector<1x32x128xbf16>
    %149 = vector.shape_cast %148 : vector<1x32x128xbf16> to vector<32x128xbf16>
    %cst_67 = arith.constant dense<0.000000e+00> : vector<4x128xf32>
    %150 = tpu.matmul %143, %149, %cst_67 {dimension_numbers = #tpu.dot_dimension_numbers<[1], [0], [0], [1], [0, 0, 1, 1], [], []>} : vector<4x32xbf16>, vector<32x128xbf16>, vector<4x128xf32> -> vector<4x128xf32>
    %151 = arith.addf %139, %150 : vector<4x128xf32>
    %152 = vector.extract_strided_slice %100 {offsets = [2, 0, 0], sizes = [1, 32, 128], strides = [1, 1, 1]} : vector<3x32x128xbf16> to vector<1x32x128xbf16>
    %153 = vector.shape_cast %152 : vector<1x32x128xbf16> to vector<32x128xbf16>
    %cst_68 = arith.constant dense<0.000000e+00> : vector<4x128xf32>
    %154 = tpu.matmul %147, %153, %cst_68 {dimension_numbers = #tpu.dot_dimension_numbers<[1], [0], [0], [1], [0, 0, 1, 1], [], []>} : vector<4x32xbf16>, vector<32x128xbf16>, vector<4x128xf32> -> vector<4x128xf32>
    %155 = arith.addf %151, %154 : vector<4x128xf32>
    %156 = vector.broadcast %101 : vector<1x128xf32> to vector<4x128xf32>
    %157 = arith.addf %155, %156 : vector<4x128xf32>
    %158 = vector.extract_strided_slice %157 {offsets = [0, 0], sizes = [4, 32], strides = [1, 1]} : vector<4x128xf32> to vector<4x32xf32>
    %159 = arith.mulf %102, %98 : vector<4x32xf32>
    %160 = arith.addf %158, %159 : vector<4x32xf32>
    %161 = arith.negf %160 : vector<4x32xf32>
    %162 = math.exp %161 : vector<4x32xf32>
    %cst_69 = arith.constant 1.000000e+00 : f32
    %163 = vector.broadcast %cst_69 : f32 to vector<4x32xf32>
    %164 = arith.addf %163, %162 : vector<4x32xf32>
    %165 = arith.divf %163, %164 : vector<4x32xf32>
    %166 = vector.extract_strided_slice %157 {offsets = [0, 32], sizes = [4, 32], strides = [1, 1]} : vector<4x128xf32> to vector<4x32xf32>
    %167 = arith.mulf %103, %98 : vector<4x32xf32>
    %168 = arith.addf %166, %167 : vector<4x32xf32>
    %169 = arith.negf %168 : vector<4x32xf32>
    %170 = math.exp %169 : vector<4x32xf32>
    %cst_70 = arith.constant 1.000000e+00 : f32
    %171 = vector.broadcast %cst_70 : f32 to vector<4x32xf32>
    %172 = arith.addf %171, %170 : vector<4x32xf32>
    %173 = arith.divf %171, %172 : vector<4x32xf32>
    %174 = arith.mulf %173, %98 : vector<4x32xf32>
    %175 = vector.extract_strided_slice %157 {offsets = [0, 64], sizes = [4, 32], strides = [1, 1]} : vector<4x128xf32> to vector<4x32xf32>
    %176 = math.tanh %175 : vector<4x32xf32>
    %177 = arith.mulf %165, %176 : vector<4x32xf32>
    %178 = arith.addf %174, %177 : vector<4x32xf32>
    %179 = vector.extract_strided_slice %157 {offsets = [0, 96], sizes = [4, 32], strides = [1, 1]} : vector<4x128xf32> to vector<4x32xf32>
    %180 = arith.mulf %104, %178 : vector<4x32xf32>
    %181 = arith.addf %179, %180 : vector<4x32xf32>
    %182 = arith.negf %181 : vector<4x32xf32>
    %183 = math.exp %182 : vector<4x32xf32>
    %cst_71 = arith.constant 1.000000e+00 : f32
    %184 = vector.broadcast %cst_71 : f32 to vector<4x32xf32>
    %185 = arith.addf %184, %183 : vector<4x32xf32>
    %186 = arith.divf %184, %185 : vector<4x32xf32>
    %187 = math.tanh %178 : vector<4x32xf32>
    %188 = arith.mulf %186, %187 : vector<4x32xf32>
    %c0_72 = arith.constant 0 : index
    %c0_73 = arith.constant 0 : index
    %189 = vector.load %arg22[%c0_72, %c0_73] : memref<4x32xf32, #tpu.memory_space<vmem>>, vector<4x32xf32>
    tpu.vector_store %arg22[%c0_72, %c0_73], %96 {strides = array<i32>} : memref<4x32xf32, #tpu.memory_space<vmem>>, vector<4x32xf32>,
    %c0_74 = arith.constant 0 : index
    %c0_75 = arith.constant 0 : index
    %190 = vector.load %arg23[%c0_74, %c0_75] : memref<4x32xf32, #tpu.memory_space<vmem>>, vector<4x32xf32>
    tpu.vector_store %arg23[%c0_74, %c0_75], %86 {strides = array<i32>} : memref<4x32xf32, #tpu.memory_space<vmem>>, vector<4x32xf32>,
    %c0_76 = arith.constant 0 : index
    %c0_77 = arith.constant 0 : index
    %191 = vector.load %arg24[%c0_76, %c0_77] : memref<4x32xf32, #tpu.memory_space<vmem>>, vector<4x32xf32>
    tpu.vector_store %arg24[%c0_76, %c0_77], %188 {strides = array<i32>} : memref<4x32xf32, #tpu.memory_space<vmem>>, vector<4x32xf32>,
    %c0_78 = arith.constant 0 : index
    %c0_79 = arith.constant 0 : index
    %192 = vector.load %arg25[%c0_78, %c0_79] : memref<4x32xf32, #tpu.memory_space<vmem>>, vector<4x32xf32>
    tpu.vector_store %arg25[%c0_78, %c0_79], %178 {strides = array<i32>} : memref<4x32xf32, #tpu.memory_space<vmem>>, vector<4x32xf32>,
    %c0_80 = arith.constant 0 : index
    %c0_81 = arith.constant 0 : index
    %193 = vector.load %arg21[%c0_80, %c0_81] : memref<4x32xf32, #tpu.memory_space<vmem>>, vector<4x32xf32>
    tpu.vector_store %arg21[%c0_80, %c0_81], %188 {strides = array<i32>} : memref<4x32xf32, #tpu.memory_space<vmem>>, vector<4x32xf32>,
    %c0_82 = arith.constant 0 : index
    %c0_83 = arith.constant 0 : index
    %c0_84 = arith.constant 0 : index
    %c0_85 = arith.constant 0 : index
    %194 = vector.load %arg20[%c0_82, %c0_83, %c0_84, %c0_85] : memref<1x1x4x32xf32, #tpu.memory_space<vmem>>, vector<1x1x4x32xf32>
    %195 = vector.shape_cast %194 : vector<1x1x4x32xf32> to vector<4x32xf32>
    %196 = vector.shape_cast %188 : vector<4x32xf32> to vector<1x1x4x32xf32>
    tpu.vector_store %arg20[%c0_82, %c0_83, %c0_84, %c0_85], %196 {strides = array<i32>} : memref<1x1x4x32xf32, #tpu.memory_space<vmem>>, vector<1x1x4x32xf32>,
    return
  }
  func.func @transform_0(%arg0: i32, %arg1: i32) -> (i32, i32, i32) {
    %c0_i32 = arith.constant 0 : i32
    %c0_i32_0 = arith.constant 0 : i32
    %c0_i32_1 = arith.constant 0 : i32
    return %arg0, %c0_i32, %c0_i32_0 : i32, i32, i32
  }
  func.func @transform_1(%arg0: i32, %arg1: i32) -> (i32, i32, i32) {
    %c0_i32 = arith.constant 0 : i32
    %c0_i32_0 = arith.constant 0 : i32
    %c0_i32_1 = arith.constant 0 : i32
    return %arg0, %c0_i32, %c0_i32_0 : i32, i32, i32
  }
  func.func @transform_2(%arg0: i32, %arg1: i32) -> (i32, i32, i32) {
    %c0_i32 = arith.constant 0 : i32
    %c0_i32_0 = arith.constant 0 : i32
    %c0_i32_1 = arith.constant 0 : i32
    return %arg0, %c0_i32, %c0_i32_0 : i32, i32, i32
  }
  func.func @transform_3(%arg0: i32, %arg1: i32) -> (i32, i32, i32) {
    %c0_i32 = arith.constant 0 : i32
    %c0_i32_0 = arith.constant 0 : i32
    %c0_i32_1 = arith.constant 0 : i32
    return %arg0, %c0_i32, %c0_i32_0 : i32, i32, i32
  }
  func.func @transform_4(%arg0: i32, %arg1: i32) -> (i32, i32, i32) {
    %c0_i32 = arith.constant 0 : i32
    %c0_i32_0 = arith.constant 0 : i32
    %c0_i32_1 = arith.constant 0 : i32
    return %arg0, %c0_i32, %c0_i32_0 : i32, i32, i32
  }
  func.func @transform_5(%arg0: i32, %arg1: i32) -> (i32, i32, i32) {
    %c0_i32 = arith.constant 0 : i32
    %c0_i32_0 = arith.constant 0 : i32
    %c0_i32_1 = arith.constant 0 : i32
    %c0_i32_2 = arith.constant 0 : i32
    return %c0_i32, %c0_i32_0, %c0_i32_1 : i32, i32, i32
  }
  func.func @transform_6(%arg0: i32, %arg1: i32) -> (i32, i32, i32) {
    %c0_i32 = arith.constant 0 : i32
    %c0_i32_0 = arith.constant 0 : i32
    %c0_i32_1 = arith.constant 0 : i32
    %c0_i32_2 = arith.constant 0 : i32
    return %c0_i32, %c0_i32_0, %c0_i32_1 : i32, i32, i32
  }
  func.func @transform_7(%arg0: i32, %arg1: i32) -> (i32, i32, i32) {
    %c0_i32 = arith.constant 0 : i32
    %c0_i32_0 = arith.constant 0 : i32
    %c0_i32_1 = arith.constant 0 : i32
    %c0_i32_2 = arith.constant 0 : i32
    return %c0_i32, %c0_i32_0, %c0_i32_1 : i32, i32, i32
  }
  func.func @transform_8(%arg0: i32, %arg1: i32) -> (i32, i32) {
    %c0_i32 = arith.constant 0 : i32
    %c0_i32_0 = arith.constant 0 : i32
    %c0_i32_1 = arith.constant 0 : i32
    return %c0_i32, %c0_i32_0 : i32, i32
  }
  func.func @transform_9(%arg0: i32, %arg1: i32) -> (i32, i32) {
    %c0_i32 = arith.constant 0 : i32
    %c0_i32_0 = arith.constant 0 : i32
    %c0_i32_1 = arith.constant 0 : i32
    return %c0_i32, %c0_i32_0 : i32, i32
  }
  func.func @transform_10(%arg0: i32, %arg1: i32) -> (i32, i32) {
    %c0_i32 = arith.constant 0 : i32
    %c0_i32_0 = arith.constant 0 : i32
    %c0_i32_1 = arith.constant 0 : i32
    return %c0_i32, %c0_i32_0 : i32, i32
  }
  func.func @transform_11(%arg0: i32, %arg1: i32) -> (i32, i32) {
    %c0_i32 = arith.constant 0 : i32
    %c0_i32_0 = arith.constant 0 : i32
    %c0_i32_1 = arith.constant 0 : i32
    return %c0_i32, %c0_i32_0 : i32, i32
  }
  func.func @transform_12(%arg0: i32, %arg1: i32) -> (i32, i32, i32) {
    %c0_i32 = arith.constant 0 : i32
    %c0_i32_0 = arith.constant 0 : i32
    %c0_i32_1 = arith.constant 0 : i32
    %c0_i32_2 = arith.constant 0 : i32
    return %c0_i32, %c0_i32_0, %c0_i32_1 : i32, i32, i32
  }
  func.func @transform_13(%arg0: i32, %arg1: i32) -> (i32, i32, i32) {
    %c0_i32 = arith.constant 0 : i32
    %c0_i32_0 = arith.constant 0 : i32
    %c0_i32_1 = arith.constant 0 : i32
    %c0_i32_2 = arith.constant 0 : i32
    return %c0_i32, %c0_i32_0, %c0_i32_1 : i32, i32, i32
  }
  func.func @transform_14(%arg0: i32, %arg1: i32) -> (i32, i32) {
    %c0_i32 = arith.constant 0 : i32
    %c0_i32_0 = arith.constant 0 : i32
    %c0_i32_1 = arith.constant 0 : i32
    return %c0_i32, %c0_i32_0 : i32, i32
  }
  func.func @transform_15(%arg0: i32, %arg1: i32) -> (i32, i32) {
    %c0_i32 = arith.constant 0 : i32
    %c0_i32_0 = arith.constant 0 : i32
    %c0_i32_1 = arith.constant 0 : i32
    return %c0_i32, %c0_i32_0 : i32, i32
  }
  func.func @transform_16(%arg0: i32, %arg1: i32) -> (i32, i32) {
    %c0_i32 = arith.constant 0 : i32
    %c0_i32_0 = arith.constant 0 : i32
    %c0_i32_1 = arith.constant 0 : i32
    return %c0_i32, %c0_i32_0 : i32, i32
  }
  func.func @transform_17(%arg0: i32, %arg1: i32) -> (i32, i32) {
    %c0_i32 = arith.constant 0 : i32
    %c0_i32_0 = arith.constant 0 : i32
    %c0_i32_1 = arith.constant 0 : i32
    return %c0_i32, %c0_i32_0 : i32, i32
  }
  func.func @transform_18(%arg0: i32, %arg1: i32) -> (i32, i32, i32, i32) {
    %c0_i32 = arith.constant 0 : i32
    %c0_i32_0 = arith.constant 0 : i32
    %c0_i32_1 = arith.constant 0 : i32
    return %arg0, %arg1, %c0_i32, %c0_i32_0 : i32, i32, i32, i32
  }
}

module attributes {stable_mosaic.version = 11 : i64} {
  func.func @_decoder_conv_kernel(%arg0: i32, %arg1: memref<1x4x32xf32, #tpu.memory_space<vmem>>, %arg2: memref<3x4x4xbf16, #tpu.memory_space<vmem>>, %arg3: memref<3x32x64xbf16, #tpu.memory_space<vmem>>, %arg4: memref<1x64xf32, #tpu.memory_space<vmem>>, %arg5: memref<3x8x4xbf16, #tpu.memory_space<vmem>>, %arg6: memref<3x64x64xbf16, #tpu.memory_space<vmem>>, %arg7: memref<1x64xf32, #tpu.memory_space<vmem>>, %arg8: memref<3x16x8xbf16, #tpu.memory_space<vmem>>, %arg9: memref<3x64x64xbf16, #tpu.memory_space<vmem>>, %arg10: memref<1x64xf32, #tpu.memory_space<vmem>>, %arg11: memref<3x16x16xbf16, #tpu.memory_space<vmem>>, %arg12: memref<3x64x64xbf16, #tpu.memory_space<vmem>>, %arg13: memref<1x64xf32, #tpu.memory_space<vmem>>, %arg14: memref<1x16x64xf32, #tpu.memory_space<vmem>>) attributes {dimension_semantics = [#tpu.dimension_semantics<parallel>], iteration_bounds = array<i64: 6>, scalar_prefetch = 0 : i64, scratch_operands = 0 : i64, tpu.core_type = #tpu.core_type<tc>, window_params = [{transform_indices = @transform_0, window_bounds = array<i64: 1, 4, 32>}, {pipeline_mode = #tpu.pipeline_mode<synchronous>, transform_indices = @transform_1, window_bounds = array<i64: 3, 4, 4>}, {pipeline_mode = #tpu.pipeline_mode<synchronous>, transform_indices = @transform_2, window_bounds = array<i64: 3, 32, 64>}, {pipeline_mode = #tpu.pipeline_mode<synchronous>, transform_indices = @transform_3, window_bounds = array<i64: 1, 64>}, {pipeline_mode = #tpu.pipeline_mode<synchronous>, transform_indices = @transform_4, window_bounds = array<i64: 3, 8, 4>}, {pipeline_mode = #tpu.pipeline_mode<synchronous>, transform_indices = @transform_5, window_bounds = array<i64: 3, 64, 64>}, {pipeline_mode = #tpu.pipeline_mode<synchronous>, transform_indices = @transform_6, window_bounds = array<i64: 1, 64>}, {pipeline_mode = #tpu.pipeline_mode<synchronous>, transform_indices = @transform_7, window_bounds = array<i64: 3, 16, 8>}, {pipeline_mode = #tpu.pipeline_mode<synchronous>, transform_indices = @transform_8, window_bounds = array<i64: 3, 64, 64>}, {pipeline_mode = #tpu.pipeline_mode<synchronous>, transform_indices = @transform_9, window_bounds = array<i64: 1, 64>}, {pipeline_mode = #tpu.pipeline_mode<synchronous>, transform_indices = @transform_10, window_bounds = array<i64: 3, 16, 16>}, {pipeline_mode = #tpu.pipeline_mode<synchronous>, transform_indices = @transform_11, window_bounds = array<i64: 3, 64, 64>}, {pipeline_mode = #tpu.pipeline_mode<synchronous>, transform_indices = @transform_12, window_bounds = array<i64: 1, 64>}, {transform_indices = @transform_13, window_bounds = array<i64: 1, 16, 64>}]} {
    %c0 = arith.constant 0 : index
    %c0_0 = arith.constant 0 : index
    %c0_1 = arith.constant 0 : index
    %0 = vector.load %arg1[%c0, %c0_0, %c0_1] : memref<1x4x32xf32, #tpu.memory_space<vmem>>, vector<1x4x32xf32>
    %1 = vector.shape_cast %0 : vector<1x4x32xf32> to vector<4x32xf32>
    %2 = arith.truncf %1 : vector<4x32xf32> to vector<4x32xbf16>
    %c0_2 = arith.constant 0 : index
    %c0_3 = arith.constant 0 : index
    %c0_4 = arith.constant 0 : index
    %3 = vector.load %arg2[%c0_2, %c0_3, %c0_4] : memref<3x4x4xbf16, #tpu.memory_space<vmem>>, vector<3x4x4xbf16>
    %c0_5 = arith.constant 0 : index
    %c0_6 = arith.constant 0 : index
    %c0_7 = arith.constant 0 : index
    %4 = vector.load %arg3[%c0_5, %c0_6, %c0_7] : memref<3x32x64xbf16, #tpu.memory_space<vmem>>, vector<3x32x64xbf16>
    %c0_8 = arith.constant 0 : index
    %c0_9 = arith.constant 0 : index
    %5 = vector.load %arg4[%c0_8, %c0_9] : memref<1x64xf32, #tpu.memory_space<vmem>>, vector<1x64xf32>
    %cst = arith.constant 0.000000e+00 : f32
    %6 = vector.broadcast %cst : f32 to vector<4x64xf32>
    %7 = vector.extract_strided_slice %3 {offsets = [0, 0, 0], sizes = [1, 4, 4], strides = [1, 1, 1]} : vector<3x4x4xbf16> to vector<1x4x4xbf16>
    %8 = vector.shape_cast %7 : vector<1x4x4xbf16> to vector<4x4xbf16>
    %cst_10 = arith.constant dense<0.000000e+00> : vector<4x32xf32>
    %9 = tpu.matmul %8, %2, %cst_10 {dimension_numbers = #tpu.dot_dimension_numbers<[1], [0], [0], [1], [0, 0, 1, 1], [], []>} : vector<4x4xbf16>, vector<4x32xbf16>, vector<4x32xf32> -> vector<4x32xf32>
    %10 = arith.truncf %9 : vector<4x32xf32> to vector<4x32xbf16>
    %11 = vector.extract_strided_slice %4 {offsets = [0, 0, 0], sizes = [1, 32, 64], strides = [1, 1, 1]} : vector<3x32x64xbf16> to vector<1x32x64xbf16>
    %12 = vector.shape_cast %11 : vector<1x32x64xbf16> to vector<32x64xbf16>
    %cst_11 = arith.constant dense<0.000000e+00> : vector<4x64xf32>
    %13 = tpu.matmul %10, %12, %cst_11 {dimension_numbers = #tpu.dot_dimension_numbers<[1], [0], [0], [1], [0, 0, 1, 1], [], []>} : vector<4x32xbf16>, vector<32x64xbf16>, vector<4x64xf32> -> vector<4x64xf32>
    %14 = arith.addf %6, %13 : vector<4x64xf32>
    %15 = vector.extract_strided_slice %3 {offsets = [1, 0, 0], sizes = [1, 4, 4], strides = [1, 1, 1]} : vector<3x4x4xbf16> to vector<1x4x4xbf16>
    %16 = vector.shape_cast %15 : vector<1x4x4xbf16> to vector<4x4xbf16>
    %cst_12 = arith.constant dense<0.000000e+00> : vector<4x32xf32>
    %17 = tpu.matmul %16, %2, %cst_12 {dimension_numbers = #tpu.dot_dimension_numbers<[1], [0], [0], [1], [0, 0, 1, 1], [], []>} : vector<4x4xbf16>, vector<4x32xbf16>, vector<4x32xf32> -> vector<4x32xf32>
    %18 = arith.truncf %17 : vector<4x32xf32> to vector<4x32xbf16>
    %19 = vector.extract_strided_slice %4 {offsets = [1, 0, 0], sizes = [1, 32, 64], strides = [1, 1, 1]} : vector<3x32x64xbf16> to vector<1x32x64xbf16>
    %20 = vector.shape_cast %19 : vector<1x32x64xbf16> to vector<32x64xbf16>
    %cst_13 = arith.constant dense<0.000000e+00> : vector<4x64xf32>
    %21 = tpu.matmul %18, %20, %cst_13 {dimension_numbers = #tpu.dot_dimension_numbers<[1], [0], [0], [1], [0, 0, 1, 1], [], []>} : vector<4x32xbf16>, vector<32x64xbf16>, vector<4x64xf32> -> vector<4x64xf32>
    %22 = arith.addf %14, %21 : vector<4x64xf32>
    %23 = vector.extract_strided_slice %3 {offsets = [2, 0, 0], sizes = [1, 4, 4], strides = [1, 1, 1]} : vector<3x4x4xbf16> to vector<1x4x4xbf16>
    %24 = vector.shape_cast %23 : vector<1x4x4xbf16> to vector<4x4xbf16>
    %cst_14 = arith.constant dense<0.000000e+00> : vector<4x32xf32>
    %25 = tpu.matmul %24, %2, %cst_14 {dimension_numbers = #tpu.dot_dimension_numbers<[1], [0], [0], [1], [0, 0, 1, 1], [], []>} : vector<4x4xbf16>, vector<4x32xbf16>, vector<4x32xf32> -> vector<4x32xf32>
    %26 = arith.truncf %25 : vector<4x32xf32> to vector<4x32xbf16>
    %27 = vector.extract_strided_slice %4 {offsets = [2, 0, 0], sizes = [1, 32, 64], strides = [1, 1, 1]} : vector<3x32x64xbf16> to vector<1x32x64xbf16>
    %28 = vector.shape_cast %27 : vector<1x32x64xbf16> to vector<32x64xbf16>
    %cst_15 = arith.constant dense<0.000000e+00> : vector<4x64xf32>
    %29 = tpu.matmul %26, %28, %cst_15 {dimension_numbers = #tpu.dot_dimension_numbers<[1], [0], [0], [1], [0, 0, 1, 1], [], []>} : vector<4x32xbf16>, vector<32x64xbf16>, vector<4x64xf32> -> vector<4x64xf32>
    %30 = arith.addf %22, %29 : vector<4x64xf32>
    %31 = vector.broadcast %5 : vector<1x64xf32> to vector<4x64xf32>
    %32 = arith.addf %30, %31 : vector<4x64xf32>
    %cst_16 = arith.constant 0.000000e+00 : f32
    %33 = vector.broadcast %cst_16 : f32 to vector<4x64xf32>
    %34 = arith.cmpf oge, %32, %33 : vector<4x64xf32>
    %cst_17 = arith.constant 0.00999999977 : f32
    %35 = vector.broadcast %cst_17 : f32 to vector<4x64xf32>
    %36 = arith.mulf %35, %32 : vector<4x64xf32>
    %37 = arith.select %34, %32, %36 : vector<4x64xi1>, vector<4x64xf32>
    %38 = arith.truncf %37 : vector<4x64xf32> to vector<4x64xbf16>
    %c0_18 = arith.constant 0 : index
    %c0_19 = arith.constant 0 : index
    %c0_20 = arith.constant 0 : index
    %39 = vector.load %arg5[%c0_18, %c0_19, %c0_20] : memref<3x8x4xbf16, #tpu.memory_space<vmem>>, vector<3x8x4xbf16>
    %c0_21 = arith.constant 0 : index
    %c0_22 = arith.constant 0 : index
    %c0_23 = arith.constant 0 : index
    %40 = vector.load %arg6[%c0_21, %c0_22, %c0_23] : memref<3x64x64xbf16, #tpu.memory_space<vmem>>, vector<3x64x64xbf16>
    %c0_24 = arith.constant 0 : index
    %c0_25 = arith.constant 0 : index
    %41 = vector.load %arg7[%c0_24, %c0_25] : memref<1x64xf32, #tpu.memory_space<vmem>>, vector<1x64xf32>
    %cst_26 = arith.constant 0.000000e+00 : f32
    %42 = vector.broadcast %cst_26 : f32 to vector<8x64xf32>
    %43 = vector.extract_strided_slice %39 {offsets = [0, 0, 0], sizes = [1, 8, 4], strides = [1, 1, 1]} : vector<3x8x4xbf16> to vector<1x8x4xbf16>
    %44 = vector.shape_cast %43 : vector<1x8x4xbf16> to vector<8x4xbf16>
    %cst_27 = arith.constant dense<0.000000e+00> : vector<8x64xf32>
    %45 = tpu.matmul %44, %38, %cst_27 {dimension_numbers = #tpu.dot_dimension_numbers<[1], [0], [0], [1], [0, 0, 1, 1], [], []>} : vector<8x4xbf16>, vector<4x64xbf16>, vector<8x64xf32> -> vector<8x64xf32>
    %46 = arith.truncf %45 : vector<8x64xf32> to vector<8x64xbf16>
    %47 = vector.extract_strided_slice %40 {offsets = [0, 0, 0], sizes = [1, 64, 64], strides = [1, 1, 1]} : vector<3x64x64xbf16> to vector<1x64x64xbf16>
    %48 = vector.shape_cast %47 : vector<1x64x64xbf16> to vector<64x64xbf16>
    %cst_28 = arith.constant dense<0.000000e+00> : vector<8x64xf32>
    %49 = tpu.matmul %46, %48, %cst_28 {dimension_numbers = #tpu.dot_dimension_numbers<[1], [0], [0], [1], [0, 0, 1, 1], [], []>} : vector<8x64xbf16>, vector<64x64xbf16>, vector<8x64xf32> -> vector<8x64xf32>
    %50 = arith.addf %42, %49 : vector<8x64xf32>
    %51 = vector.extract_strided_slice %39 {offsets = [1, 0, 0], sizes = [1, 8, 4], strides = [1, 1, 1]} : vector<3x8x4xbf16> to vector<1x8x4xbf16>
    %52 = vector.shape_cast %51 : vector<1x8x4xbf16> to vector<8x4xbf16>
    %cst_29 = arith.constant dense<0.000000e+00> : vector<8x64xf32>
    %53 = tpu.matmul %52, %38, %cst_29 {dimension_numbers = #tpu.dot_dimension_numbers<[1], [0], [0], [1], [0, 0, 1, 1], [], []>} : vector<8x4xbf16>, vector<4x64xbf16>, vector<8x64xf32> -> vector<8x64xf32>
    %54 = arith.truncf %53 : vector<8x64xf32> to vector<8x64xbf16>
    %55 = vector.extract_strided_slice %40 {offsets = [1, 0, 0], sizes = [1, 64, 64], strides = [1, 1, 1]} : vector<3x64x64xbf16> to vector<1x64x64xbf16>
    %56 = vector.shape_cast %55 : vector<1x64x64xbf16> to vector<64x64xbf16>
    %cst_30 = arith.constant dense<0.000000e+00> : vector<8x64xf32>
    %57 = tpu.matmul %54, %56, %cst_30 {dimension_numbers = #tpu.dot_dimension_numbers<[1], [0], [0], [1], [0, 0, 1, 1], [], []>} : vector<8x64xbf16>, vector<64x64xbf16>, vector<8x64xf32> -> vector<8x64xf32>
    %58 = arith.addf %50, %57 : vector<8x64xf32>
    %59 = vector.extract_strided_slice %39 {offsets = [2, 0, 0], sizes = [1, 8, 4], strides = [1, 1, 1]} : vector<3x8x4xbf16> to vector<1x8x4xbf16>
    %60 = vector.shape_cast %59 : vector<1x8x4xbf16> to vector<8x4xbf16>
    %cst_31 = arith.constant dense<0.000000e+00> : vector<8x64xf32>
    %61 = tpu.matmul %60, %38, %cst_31 {dimension_numbers = #tpu.dot_dimension_numbers<[1], [0], [0], [1], [0, 0, 1, 1], [], []>} : vector<8x4xbf16>, vector<4x64xbf16>, vector<8x64xf32> -> vector<8x64xf32>
    %62 = arith.truncf %61 : vector<8x64xf32> to vector<8x64xbf16>
    %63 = vector.extract_strided_slice %40 {offsets = [2, 0, 0], sizes = [1, 64, 64], strides = [1, 1, 1]} : vector<3x64x64xbf16> to vector<1x64x64xbf16>
    %64 = vector.shape_cast %63 : vector<1x64x64xbf16> to vector<64x64xbf16>
    %cst_32 = arith.constant dense<0.000000e+00> : vector<8x64xf32>
    %65 = tpu.matmul %62, %64, %cst_32 {dimension_numbers = #tpu.dot_dimension_numbers<[1], [0], [0], [1], [0, 0, 1, 1], [], []>} : vector<8x64xbf16>, vector<64x64xbf16>, vector<8x64xf32> -> vector<8x64xf32>
    %66 = arith.addf %58, %65 : vector<8x64xf32>
    %67 = vector.broadcast %41 : vector<1x64xf32> to vector<8x64xf32>
    %68 = arith.addf %66, %67 : vector<8x64xf32>
    %cst_33 = arith.constant 0.000000e+00 : f32
    %69 = vector.broadcast %cst_33 : f32 to vector<8x64xf32>
    %70 = arith.cmpf oge, %68, %69 : vector<8x64xf32>
    %cst_34 = arith.constant 0.00999999977 : f32
    %71 = vector.broadcast %cst_34 : f32 to vector<8x64xf32>
    %72 = arith.mulf %71, %68 : vector<8x64xf32>
    %73 = arith.select %70, %68, %72 : vector<8x64xi1>, vector<8x64xf32>
    %74 = arith.truncf %73 : vector<8x64xf32> to vector<8x64xbf16>
    %c0_35 = arith.constant 0 : index
    %c0_36 = arith.constant 0 : index
    %c0_37 = arith.constant 0 : index
    %75 = vector.load %arg8[%c0_35, %c0_36, %c0_37] : memref<3x16x8xbf16, #tpu.memory_space<vmem>>, vector<3x16x8xbf16>
    %c0_38 = arith.constant 0 : index
    %c0_39 = arith.constant 0 : index
    %c0_40 = arith.constant 0 : index
    %76 = vector.load %arg9[%c0_38, %c0_39, %c0_40] : memref<3x64x64xbf16, #tpu.memory_space<vmem>>, vector<3x64x64xbf16>
    %c0_41 = arith.constant 0 : index
    %c0_42 = arith.constant 0 : index
    %77 = vector.load %arg10[%c0_41, %c0_42] : memref<1x64xf32, #tpu.memory_space<vmem>>, vector<1x64xf32>
    %cst_43 = arith.constant 0.000000e+00 : f32
    %78 = vector.broadcast %cst_43 : f32 to vector<16x64xf32>
    %79 = vector.extract_strided_slice %75 {offsets = [0, 0, 0], sizes = [1, 16, 8], strides = [1, 1, 1]} : vector<3x16x8xbf16> to vector<1x16x8xbf16>
    %80 = vector.shape_cast %79 : vector<1x16x8xbf16> to vector<16x8xbf16>
    %cst_44 = arith.constant dense<0.000000e+00> : vector<16x64xf32>
    %81 = tpu.matmul %80, %74, %cst_44 {dimension_numbers = #tpu.dot_dimension_numbers<[1], [0], [0], [1], [0, 0, 1, 1], [], []>} : vector<16x8xbf16>, vector<8x64xbf16>, vector<16x64xf32> -> vector<16x64xf32>
    %82 = arith.truncf %81 : vector<16x64xf32> to vector<16x64xbf16>
    %83 = vector.extract_strided_slice %76 {offsets = [0, 0, 0], sizes = [1, 64, 64], strides = [1, 1, 1]} : vector<3x64x64xbf16> to vector<1x64x64xbf16>
    %84 = vector.shape_cast %83 : vector<1x64x64xbf16> to vector<64x64xbf16>
    %cst_45 = arith.constant dense<0.000000e+00> : vector<16x64xf32>
    %85 = tpu.matmul %82, %84, %cst_45 {dimension_numbers = #tpu.dot_dimension_numbers<[1], [0], [0], [1], [0, 0, 1, 1], [], []>} : vector<16x64xbf16>, vector<64x64xbf16>, vector<16x64xf32> -> vector<16x64xf32>
    %86 = arith.addf %78, %85 : vector<16x64xf32>
    %87 = vector.extract_strided_slice %75 {offsets = [1, 0, 0], sizes = [1, 16, 8], strides = [1, 1, 1]} : vector<3x16x8xbf16> to vector<1x16x8xbf16>
    %88 = vector.shape_cast %87 : vector<1x16x8xbf16> to vector<16x8xbf16>
    %cst_46 = arith.constant dense<0.000000e+00> : vector<16x64xf32>
    %89 = tpu.matmul %88, %74, %cst_46 {dimension_numbers = #tpu.dot_dimension_numbers<[1], [0], [0], [1], [0, 0, 1, 1], [], []>} : vector<16x8xbf16>, vector<8x64xbf16>, vector<16x64xf32> -> vector<16x64xf32>
    %90 = arith.truncf %89 : vector<16x64xf32> to vector<16x64xbf16>
    %91 = vector.extract_strided_slice %76 {offsets = [1, 0, 0], sizes = [1, 64, 64], strides = [1, 1, 1]} : vector<3x64x64xbf16> to vector<1x64x64xbf16>
    %92 = vector.shape_cast %91 : vector<1x64x64xbf16> to vector<64x64xbf16>
    %cst_47 = arith.constant dense<0.000000e+00> : vector<16x64xf32>
    %93 = tpu.matmul %90, %92, %cst_47 {dimension_numbers = #tpu.dot_dimension_numbers<[1], [0], [0], [1], [0, 0, 1, 1], [], []>} : vector<16x64xbf16>, vector<64x64xbf16>, vector<16x64xf32> -> vector<16x64xf32>
    %94 = arith.addf %86, %93 : vector<16x64xf32>
    %95 = vector.extract_strided_slice %75 {offsets = [2, 0, 0], sizes = [1, 16, 8], strides = [1, 1, 1]} : vector<3x16x8xbf16> to vector<1x16x8xbf16>
    %96 = vector.shape_cast %95 : vector<1x16x8xbf16> to vector<16x8xbf16>
    %cst_48 = arith.constant dense<0.000000e+00> : vector<16x64xf32>
    %97 = tpu.matmul %96, %74, %cst_48 {dimension_numbers = #tpu.dot_dimension_numbers<[1], [0], [0], [1], [0, 0, 1, 1], [], []>} : vector<16x8xbf16>, vector<8x64xbf16>, vector<16x64xf32> -> vector<16x64xf32>
    %98 = arith.truncf %97 : vector<16x64xf32> to vector<16x64xbf16>
    %99 = vector.extract_strided_slice %76 {offsets = [2, 0, 0], sizes = [1, 64, 64], strides = [1, 1, 1]} : vector<3x64x64xbf16> to vector<1x64x64xbf16>
    %100 = vector.shape_cast %99 : vector<1x64x64xbf16> to vector<64x64xbf16>
    %cst_49 = arith.constant dense<0.000000e+00> : vector<16x64xf32>
    %101 = tpu.matmul %98, %100, %cst_49 {dimension_numbers = #tpu.dot_dimension_numbers<[1], [0], [0], [1], [0, 0, 1, 1], [], []>} : vector<16x64xbf16>, vector<64x64xbf16>, vector<16x64xf32> -> vector<16x64xf32>
    %102 = arith.addf %94, %101 : vector<16x64xf32>
    %103 = vector.broadcast %77 : vector<1x64xf32> to vector<16x64xf32>
    %104 = arith.addf %102, %103 : vector<16x64xf32>
    %cst_50 = arith.constant 0.000000e+00 : f32
    %105 = vector.broadcast %cst_50 : f32 to vector<16x64xf32>
    %106 = arith.cmpf oge, %104, %105 : vector<16x64xf32>
    %cst_51 = arith.constant 0.00999999977 : f32
    %107 = vector.broadcast %cst_51 : f32 to vector<16x64xf32>
    %108 = arith.mulf %107, %104 : vector<16x64xf32>
    %109 = arith.select %106, %104, %108 : vector<16x64xi1>, vector<16x64xf32>
    %110 = arith.truncf %109 : vector<16x64xf32> to vector<16x64xbf16>
    %c0_52 = arith.constant 0 : index
    %c0_53 = arith.constant 0 : index
    %c0_54 = arith.constant 0 : index
    %111 = vector.load %arg11[%c0_52, %c0_53, %c0_54] : memref<3x16x16xbf16, #tpu.memory_space<vmem>>, vector<3x16x16xbf16>
    %c0_55 = arith.constant 0 : index
    %c0_56 = arith.constant 0 : index
    %c0_57 = arith.constant 0 : index
    %112 = vector.load %arg12[%c0_55, %c0_56, %c0_57] : memref<3x64x64xbf16, #tpu.memory_space<vmem>>, vector<3x64x64xbf16>
    %c0_58 = arith.constant 0 : index
    %c0_59 = arith.constant 0 : index
    %113 = vector.load %arg13[%c0_58, %c0_59] : memref<1x64xf32, #tpu.memory_space<vmem>>, vector<1x64xf32>
    %cst_60 = arith.constant 0.000000e+00 : f32
    %114 = vector.broadcast %cst_60 : f32 to vector<16x64xf32>
    %115 = vector.extract_strided_slice %111 {offsets = [0, 0, 0], sizes = [1, 16, 16], strides = [1, 1, 1]} : vector<3x16x16xbf16> to vector<1x16x16xbf16>
    %116 = vector.shape_cast %115 : vector<1x16x16xbf16> to vector<16x16xbf16>
    %cst_61 = arith.constant dense<0.000000e+00> : vector<16x64xf32>
    %117 = tpu.matmul %116, %110, %cst_61 {dimension_numbers = #tpu.dot_dimension_numbers<[1], [0], [0], [1], [0, 0, 1, 1], [], []>} : vector<16x16xbf16>, vector<16x64xbf16>, vector<16x64xf32> -> vector<16x64xf32>
    %118 = arith.truncf %117 : vector<16x64xf32> to vector<16x64xbf16>
    %119 = vector.extract_strided_slice %112 {offsets = [0, 0, 0], sizes = [1, 64, 64], strides = [1, 1, 1]} : vector<3x64x64xbf16> to vector<1x64x64xbf16>
    %120 = vector.shape_cast %119 : vector<1x64x64xbf16> to vector<64x64xbf16>
    %cst_62 = arith.constant dense<0.000000e+00> : vector<16x64xf32>
    %121 = tpu.matmul %118, %120, %cst_62 {dimension_numbers = #tpu.dot_dimension_numbers<[1], [0], [0], [1], [0, 0, 1, 1], [], []>} : vector<16x64xbf16>, vector<64x64xbf16>, vector<16x64xf32> -> vector<16x64xf32>
    %122 = arith.addf %114, %121 : vector<16x64xf32>
    %123 = vector.extract_strided_slice %111 {offsets = [1, 0, 0], sizes = [1, 16, 16], strides = [1, 1, 1]} : vector<3x16x16xbf16> to vector<1x16x16xbf16>
    %124 = vector.shape_cast %123 : vector<1x16x16xbf16> to vector<16x16xbf16>
    %cst_63 = arith.constant dense<0.000000e+00> : vector<16x64xf32>
    %125 = tpu.matmul %124, %110, %cst_63 {dimension_numbers = #tpu.dot_dimension_numbers<[1], [0], [0], [1], [0, 0, 1, 1], [], []>} : vector<16x16xbf16>, vector<16x64xbf16>, vector<16x64xf32> -> vector<16x64xf32>
    %126 = arith.truncf %125 : vector<16x64xf32> to vector<16x64xbf16>
    %127 = vector.extract_strided_slice %112 {offsets = [1, 0, 0], sizes = [1, 64, 64], strides = [1, 1, 1]} : vector<3x64x64xbf16> to vector<1x64x64xbf16>
    %128 = vector.shape_cast %127 : vector<1x64x64xbf16> to vector<64x64xbf16>
    %cst_64 = arith.constant dense<0.000000e+00> : vector<16x64xf32>
    %129 = tpu.matmul %126, %128, %cst_64 {dimension_numbers = #tpu.dot_dimension_numbers<[1], [0], [0], [1], [0, 0, 1, 1], [], []>} : vector<16x64xbf16>, vector<64x64xbf16>, vector<16x64xf32> -> vector<16x64xf32>
    %130 = arith.addf %122, %129 : vector<16x64xf32>
    %131 = vector.extract_strided_slice %111 {offsets = [2, 0, 0], sizes = [1, 16, 16], strides = [1, 1, 1]} : vector<3x16x16xbf16> to vector<1x16x16xbf16>
    %132 = vector.shape_cast %131 : vector<1x16x16xbf16> to vector<16x16xbf16>
    %cst_65 = arith.constant dense<0.000000e+00> : vector<16x64xf32>
    %133 = tpu.matmul %132, %110, %cst_65 {dimension_numbers = #tpu.dot_dimension_numbers<[1], [0], [0], [1], [0, 0, 1, 1], [], []>} : vector<16x16xbf16>, vector<16x64xbf16>, vector<16x64xf32> -> vector<16x64xf32>
    %134 = arith.truncf %133 : vector<16x64xf32> to vector<16x64xbf16>
    %135 = vector.extract_strided_slice %112 {offsets = [2, 0, 0], sizes = [1, 64, 64], strides = [1, 1, 1]} : vector<3x64x64xbf16> to vector<1x64x64xbf16>
    %136 = vector.shape_cast %135 : vector<1x64x64xbf16> to vector<64x64xbf16>
    %cst_66 = arith.constant dense<0.000000e+00> : vector<16x64xf32>
    %137 = tpu.matmul %134, %136, %cst_66 {dimension_numbers = #tpu.dot_dimension_numbers<[1], [0], [0], [1], [0, 0, 1, 1], [], []>} : vector<16x64xbf16>, vector<64x64xbf16>, vector<16x64xf32> -> vector<16x64xf32>
    %138 = arith.addf %130, %137 : vector<16x64xf32>
    %139 = vector.broadcast %113 : vector<1x64xf32> to vector<16x64xf32>
    %140 = arith.addf %138, %139 : vector<16x64xf32>
    %c0_67 = arith.constant 0 : index
    %c0_68 = arith.constant 0 : index
    %c0_69 = arith.constant 0 : index
    %141 = vector.load %arg14[%c0_67, %c0_68, %c0_69] : memref<1x16x64xf32, #tpu.memory_space<vmem>>, vector<1x16x64xf32>
    %142 = vector.shape_cast %141 : vector<1x16x64xf32> to vector<16x64xf32>
    %143 = vector.shape_cast %140 : vector<16x64xf32> to vector<1x16x64xf32>
    tpu.vector_store %arg14[%c0_67, %c0_68, %c0_69], %143 {strides = array<i32>} : memref<1x16x64xf32, #tpu.memory_space<vmem>>, vector<1x16x64xf32>,
    return
  }
  func.func @transform_0(%arg0: i32) -> (i32, i32, i32) {
    %c0_i32 = arith.constant 0 : i32
    %c0_i32_0 = arith.constant 0 : i32
    %c0_i32_1 = arith.constant 0 : i32
    return %arg0, %c0_i32, %c0_i32_0 : i32, i32, i32
  }
  func.func @transform_1(%arg0: i32) -> (i32, i32, i32) {
    %c0_i32 = arith.constant 0 : i32
    %c0_i32_0 = arith.constant 0 : i32
    %c0_i32_1 = arith.constant 0 : i32
    %c0_i32_2 = arith.constant 0 : i32
    return %c0_i32, %c0_i32_0, %c0_i32_1 : i32, i32, i32
  }
  func.func @transform_2(%arg0: i32) -> (i32, i32, i32) {
    %c0_i32 = arith.constant 0 : i32
    %c0_i32_0 = arith.constant 0 : i32
    %c0_i32_1 = arith.constant 0 : i32
    %c0_i32_2 = arith.constant 0 : i32
    return %c0_i32, %c0_i32_0, %c0_i32_1 : i32, i32, i32
  }
  func.func @transform_3(%arg0: i32) -> (i32, i32) {
    %c0_i32 = arith.constant 0 : i32
    %c0_i32_0 = arith.constant 0 : i32
    %c0_i32_1 = arith.constant 0 : i32
    return %c0_i32, %c0_i32_0 : i32, i32
  }
  func.func @transform_4(%arg0: i32) -> (i32, i32, i32) {
    %c0_i32 = arith.constant 0 : i32
    %c0_i32_0 = arith.constant 0 : i32
    %c0_i32_1 = arith.constant 0 : i32
    %c0_i32_2 = arith.constant 0 : i32
    return %c0_i32, %c0_i32_0, %c0_i32_1 : i32, i32, i32
  }
  func.func @transform_5(%arg0: i32) -> (i32, i32, i32) {
    %c0_i32 = arith.constant 0 : i32
    %c0_i32_0 = arith.constant 0 : i32
    %c0_i32_1 = arith.constant 0 : i32
    %c0_i32_2 = arith.constant 0 : i32
    return %c0_i32, %c0_i32_0, %c0_i32_1 : i32, i32, i32
  }
  func.func @transform_6(%arg0: i32) -> (i32, i32) {
    %c0_i32 = arith.constant 0 : i32
    %c0_i32_0 = arith.constant 0 : i32
    %c0_i32_1 = arith.constant 0 : i32
    return %c0_i32, %c0_i32_0 : i32, i32
  }
  func.func @transform_7(%arg0: i32) -> (i32, i32, i32) {
    %c0_i32 = arith.constant 0 : i32
    %c0_i32_0 = arith.constant 0 : i32
    %c0_i32_1 = arith.constant 0 : i32
    %c0_i32_2 = arith.constant 0 : i32
    return %c0_i32, %c0_i32_0, %c0_i32_1 : i32, i32, i32
  }
  func.func @transform_8(%arg0: i32) -> (i32, i32, i32) {
    %c0_i32 = arith.constant 0 : i32
    %c0_i32_0 = arith.constant 0 : i32
    %c0_i32_1 = arith.constant 0 : i32
    %c0_i32_2 = arith.constant 0 : i32
    return %c0_i32, %c0_i32_0, %c0_i32_1 : i32, i32, i32
  }
  func.func @transform_9(%arg0: i32) -> (i32, i32) {
    %c0_i32 = arith.constant 0 : i32
    %c0_i32_0 = arith.constant 0 : i32
    %c0_i32_1 = arith.constant 0 : i32
    return %c0_i32, %c0_i32_0 : i32, i32
  }
  func.func @transform_10(%arg0: i32) -> (i32, i32, i32) {
    %c0_i32 = arith.constant 0 : i32
    %c0_i32_0 = arith.constant 0 : i32
    %c0_i32_1 = arith.constant 0 : i32
    %c0_i32_2 = arith.constant 0 : i32
    return %c0_i32, %c0_i32_0, %c0_i32_1 : i32, i32, i32
  }
  func.func @transform_11(%arg0: i32) -> (i32, i32, i32) {
    %c0_i32 = arith.constant 0 : i32
    %c0_i32_0 = arith.constant 0 : i32
    %c0_i32_1 = arith.constant 0 : i32
    %c0_i32_2 = arith.constant 0 : i32
    return %c0_i32, %c0_i32_0, %c0_i32_1 : i32, i32, i32
  }
  func.func @transform_12(%arg0: i32) -> (i32, i32) {
    %c0_i32 = arith.constant 0 : i32
    %c0_i32_0 = arith.constant 0 : i32
    %c0_i32_1 = arith.constant 0 : i32
    return %c0_i32, %c0_i32_0 : i32, i32
  }
  func.func @transform_13(%arg0: i32) -> (i32, i32, i32) {
    %c0_i32 = arith.constant 0 : i32
    %c0_i32_0 = arith.constant 0 : i32
    %c0_i32_1 = arith.constant 0 : i32
    return %arg0, %c0_i32, %c0_i32_0 : i32, i32, i32
  }
}

</mosaic_0001>

<bundles_post_ra>
// kernel: _lambda_.4
= control target key start
LH: loop header
LB: loop body
LE: loop exit
PB: predicated region body
PF: predicated region fallthrough
CT: control target
= control target key end

     0   :  { %s959_s24 = smov 0   ;;  %s1082_s0 = inlined_call_operand.vmem [shape: f32[8,16,64], index: 0, kind: input, shape index: {}]   ;;  %s1083_s1 = inlined_call_operand.vmem [shape: bf16[3,8,16], index: 1, kind: input, shape index: {}]   ;;  %s1084_s2 = inlined_call_operand.vmem [shape: bf16[3,64,64], index: 2, kind: input, shape index: {}]   ;;  %s1085_s3 = inlined_call_operand.vmem [shape: f32[1,64], index: 3, kind: input, shape index: {}]   ;;  %s1086_s4 = inlined_call_operand.vmem [shape: bf16[3,4,8], index: 4, kind: input, shape index: {}]   ;;  %s1087_s5 = inlined_call_operand.vmem [shape: bf16[3,64,64], index: 5, kind: input, shape index: {}]   ;;  %s1088_s6 = inlined_call_operand.vmem [shape: f32[1,64], index: 6, kind: input, shape index: {}]   ;;  %s1089_s7 = inlined_call_operand.vmem [shape: f32[8,4,64], index: 7, kind: output, shape index: {}]  }
   0x1 LB: > { %s758_s25 = sadd.s32 4294967295, %s917_s24   ;;  %p762_p0 = scmp.ge.s32.totalorder %s917_s24, 1  ;;  %s917_s24 = sphi %s959_s24, %s17_s24  }
   0x2   : > { %p237_p1 = scmp.lt.s32.totalorder %s917_s24, 9 }
   0x4   : > { %p238_p2 = pnand %p762_p0, %p237_p1 }
   0x5   : > { %p268_p3 = scmp.lt.s32.totalorder (!%p238_p2), %s758_s25, 7 }
   0x6   : > { %241 = sbr.rel (%p238_p2) target bundleno = 593 (0x251), region = 48 }
   0xb   : > { %v884_v0 = vld [vmem:[%s1084_s2 + $0x38] sm:$0xff]  ;;  %s1091_s25 = smov (!%p268_p3, %s758_s25), 7  ;;  %v883_v2 = vld [vmem:[%s1084_s2 + $0x30] sm:$0xff]  ;;  %v882_v7 = vld [vmem:[%s1084_s2 + $0x28] sm:$0xff]  ;;  %vm309_vm0 = vcmask 130048   ;;  %vm368_vm1 = vcmask 523264  }
   0xc   : > { %v880_v1 = vld [vmem:[%s1084_s2 + $0x18] sm:$0xff]  ;;  %376 = vmatpush.bf16.msra.mxu2 %v884_v0  ;;  %v879_v3 = vld [vmem:[%s1084_s2 + $0x10] sm:$0xff]  ;;  %s876_s11 = sshll.u32 %s1091_s25, 4  ;;  %v878_v8 = vld [vmem:[%s1084_s2 + $0x8] sm:$0xff]  ;;  %vm523_vm3 = vcmask 1043456   ;;  %vm519_vm4 = vcmask 64512  }
   0xd   : > { %416 = vmatpush.bf16.msra.mxu3 %v880_v1  ;;  %s272_s14 = scalar_lea.vmem %s1082_s0, %s876_s11  ;;  %v281_v9 = vld [vmem:[%s1083_s1] sm:$0xf]  ;;  %v282_v10 = vld [vmem:[%s1083_s1 + $0x4] sm:$0xf]  ;;  %v283_v11 = vld [vmem:[%s1083_s1 + $0x8] sm:$0xf] }
   0xe   : > { %v278_v4 = vld [vmem:[%s272_s14] sm:$0xff]  ;;  %v279_v5 = vld [vmem:[%s272_s14 + $0x8] sm:$0xff]  ;;  %v888_v14 = vld [vmem:[%s1084_s2 + $0x58] sm:$0xff]  ;;  %s765_s8 = sshll.u32 %s1091_s25, 2  ;;  %vm703_vm6 = vcmask 519168  }
   0xf   : > { %v280_v6 = vpack.c.bf16 %v279_v5, %v278_v4  ;;  %v881_v12 = vld [vmem:[%s1084_s2 + $0x20] sm:$0xff]  ;;  %v887_v15 = vld [vmem:[%s1084_s2 + $0x50] sm:$0xff]  ;;  %v886_v16 = vld [vmem:[%s1084_s2 + $0x48] sm:$0xff]  ;;  %s276_s11 = scalar_lea.vmem %s1089_s7, %s765_s8 }
  0x10   : > { %377 = vmatpush.bf16.msra.mxu2 %v883_v2  ;;  %v877_v13 = vld [vmem:[%s1084_s2] sm:$0xff]  ;;  %v892_v31 = vld [vmem:[%s1087_s5 + $0x18] sm:$0xff]  ;;  %v891_v35 = vld [vmem:[%s1087_s5 + $0x10] sm:$0xff] }
  0x11   : > { %417 = vmatpush.bf16.msra.mxu3 %v879_v3  ;;  %320 = vmatpush.bf16.msra.mxu0 %v280_v6  ;;  %v885_v17 = vld [vmem:[%s1084_s2 + $0x40] sm:$0xff]  ;;  %v896_v46 = vld [vmem:[%s1087_s5 + $0x38] sm:$0xff]  ;;  %v895_v47 = vld [vmem:[%s1087_s5 + $0x30] sm:$0xff] }
  0x12   : > { %337 = vmatpush.bf16.msra.mxu1 %v280_v6  ;;  %v909_v33 = vld [vmem:[%s1085_s3] ss:$0 sm:$0xff]  ;;  %v492_v44 = vld [vmem:[%s1086_s4 + $0x2] sm:$0x3]  ;;  %v493_v45 = vld [vmem:[%s1086_s4 + $0x4] sm:$0x3] }
  0x13   : > { %v491_v43 = vld [vmem:[%s1086_s4] sm:$0x3]  ;;  %v890_v48 = vld [vmem:[%s1087_s5 + $0x8] sm:$0xff]  ;;  %v900_v52 = vld [vmem:[%s1087_s5 + $0x58] sm:$0xff] }
  0x14   : > { %378 = vmatpush.bf16.msra.mxu2 %v882_v7  ;;  %766 = vmatmul.msk.bf16.vlgmr.msra.gmra.mxu0 %vm309_vm0, %v281_v9  ;;  %v894_v49 = vld [vmem:[%s1087_s5 + $0x28] sm:$0xff]  ;;  %v889_v50 = vld [vmem:[%s1087_s5] sm:$0xff]  ;;  %v899_v53 = vld [vmem:[%s1087_s5 + $0x50] sm:$0xff] }
  0x15   : > { %435 = vmatpush.bf16.msrb.mxu0 %v280_v6  ;;  %418 = vmatpush.bf16.msra.mxu3 %v878_v8  ;;  %v893_v51 = vld [vmem:[%s1087_s5 + $0x20] sm:$0xff]  ;;  %v898_v54 = vld [vmem:[%s1087_s5 + $0x48] sm:$0xff] }
  0x16   : > { %767 = vmatmul.msk.bf16.vlgmr.msra.gmra.mxu1 %vm309_vm0, %v282_v10  ;;  %v897_v55 = vld [vmem:[%s1087_s5 + $0x40] sm:$0xff] }
  0x17   : > { %473 = vmatpush.bf16.msrb.mxu1 %v888_v14  ;;  %v910_v6 = vld [vmem:[%s1088_s6] ss:$0 sm:$0xff] }
  0x18   : > { %379 = vmatpush.bf16.msra.mxu2 %v881_v12 }
  0x19   : > { %419 = vmatpush.bf16.msra.mxu3 %v877_v13  ;;  %589 = vmatpush.bf16.msra.mxu0 %v896_v46 }
  0x1b   : > { %474 = vmatpush.bf16.msrb.mxu1 %v887_v15 }
  0x1d   : > { %590 = vmatpush.bf16.msra.mxu0 %v895_v47 }
  0x1f   : > { %475 = vmatpush.bf16.msrb.mxu1 %v886_v16 }
  0x21   : > { %591 = vmatpush.bf16.msra.mxu0 %v894_v49 }
  0x23   : > { %476 = vmatpush.bf16.msrb.mxu1 %v885_v17 }
  0x24   : > { %802 = vmatmul.msk.bf16.vlgmr.msrb.gmra.mxu0 %vm309_vm0, %v283_v11 }
  0x25   : > { %592 = vmatpush.bf16.msra.mxu0 %v893_v51 }
  0x27   : > { %629 = vmatpush.bf16.msra.mxu1 %v892_v31 }
  0x2b   : > { %630 = vmatpush.bf16.msra.mxu1 %v891_v35 }
  0x2f   : > { %631 = vmatpush.bf16.msra.mxu1 %v890_v48 }
  0x33   : > { %632 = vmatpush.bf16.msra.mxu1 %v889_v50 }
  0x91   : > { %v322_v18 = vpop.f32.mrf.mxu0 }
  0x92   : > { %v326_v20 = vpack.c.bf16 %v322_v18, %v322_v18 }
  0x93   : > { %v339_v19 = vpop.f32.mrf.mxu1 }
  0x94   : > { %v343_v21 = vpack.c.bf16 %v339_v19, %v339_v19  ;;  %801 = vmatmul.msk.bf16.vlgmr.msra.gmra.mxu3 %vm368_vm1, %v326_v20 }
  0x96   : > { %784 = vmatmul.msk.bf16.vlgmr.msra.gmra.mxu2 %vm368_vm1, %v343_v21 }
  0x99   : > { %v324_v22 = vpop.f32.mrf.mxu0 }
  0x9b   : > { %v341_v23 = vpop.f32.mrf.mxu1 }
  0xa1   : > { %v437_v24 = vpop.f32.mrf.mxu0 }
  0xa2   : > { %v441_v25 = vpack.c.bf16 %v437_v24, %v437_v24 }
  0xa4   : > { %819 = vmatmul.msk.bf16.vlgmr.msrb.gmra.mxu1 %vm368_vm1, %v441_v25 }
  0xa9   : > { %v439_v26 = vpop.f32.mrf.mxu0 }
 0x117   : > { %v421_v28 = vpop.f32.mrf.mxu3 }
 0x119   : > { %v381_v27 = vpop.f32.mrf.mxu2 }
 0x11a   : > { %v422_v32 = vadd.f32 %v421_v28, %v381_v27 }
 0x11f   : > { %v423_v30 = vpop.f32.mrf.mxu3 }
 0x121   : > { %v383_v29 = vpop.f32.mrf.mxu2  ;;  %v478_v34 = vpop.f32.mrf.mxu1 }
 0x122   : > { %v482_v36 = vadd.f32 %v478_v34, %v422_v32 }
 0x124   : > { %v486_v37 = vadd.f32 %v909_v33, %v482_v36 }
 0x126   : > { %v488_v38 = vmul.f32 0.01, %v486_v37  ;;  %vm487_vm2 = vcmp.ge.f32.partialorder %v486_v37, 0.0 }
 0x128   : > { %v489_v39 = vsel %vm487_vm2, %v486_v37, %v488_v38 }
 0x129   : > { %v480_v40 = vpop.f32.mrf.mxu1  ;;  %v490_v41 = vpack.c.bf16 %v489_v39, %v489_v39 }
 0x12b   : > { %v525_v42 = vsel %vm523_vm3, %v490_v41, 0 }
 0x12c   : > { %534 = vmatpush.bf16.msrb.mxu2 %v525_v42  ;;  %551 = vmatpush.bf16.msrb.mxu3 %v525_v42 }
 0x12f   : > { %820 = vmatmul.msk.bf16.vlgmr.msrb.gmra.mxu2 %vm519_vm4, %v491_v43  ;;  %821 = vmatmul.msk.bf16.vlgmr.msrb.gmra.mxu3 %vm519_vm4, %v492_v44 }
 0x130   : > { %648 = vmatpush.bf16.msra.mxu2 %v525_v42  ;;  %686 = vmatpush.bf16.msra.mxu3 %v900_v52 }
 0x134   : > { %687 = vmatpush.bf16.msra.mxu3 %v899_v53 }
 0x138   : > { %688 = vmatpush.bf16.msra.mxu3 %v898_v54 }
 0x13c   : > { %689 = vmatpush.bf16.msra.mxu3 %v897_v55 }
 0x13f   : > { %856 = vmatmul.msk.bf16.vlgmr.msra.gmra.mxu2 %vm519_vm4, %v493_v45 }
 0x1b2   : > { %v536_v56 = vpop.f32.mrf.mxu2  ;;  %v553_v57 = vpop.f32.mrf.mxu3 }
 0x1b3   : > { %v540_v58 = vpack.c.bf16 %v536_v56, %v536_v56  ;;  %v557_v59 = vpack.c.bf16 %v553_v57, %v553_v57 }
 0x1b5   : > { %855 = vmatmul.msk.bf16.vlgmr.msra.gmra.mxu1 %vm368_vm1, %v540_v58  ;;  %838 = vmatmul.msk.bf16.vlgmr.msra.gmra.mxu0 %vm368_vm1, %v557_v59 }
 0x1ba   : > { %v538_v60 = vpop.f32.mrf.mxu2  ;;  %v555_v61 = vpop.f32.mrf.mxu3 }
 0x1c2   : > { %v650_v62 = vpop.f32.mrf.mxu2 }
 0x1c3   : > { %v654_v63 = vpack.c.bf16 %v650_v62, %v650_v62 }
 0x1c5   : > { %873 = vmatmul.msk.bf16.vlgmr.msra.gmra.mxu3 %vm368_vm1, %v654_v63 }
 0x1ca   : > { %v652_v0 = vpop.f32.mrf.mxu2 }
 0x232   : > { %v634_v1 = vpop.f32.mrf.mxu1  ;;  %v594_v2 = vpop.f32.mrf.mxu0 }
 0x233   : > { %v635_v5 = vadd.f32 %v634_v1, %v594_v2 }
 0x23a   : > { %v636_v3 = vpop.f32.mrf.mxu1  ;;  %v596_v4 = vpop.f32.mrf.mxu0 }
 0x248   : > { %v691_v7 = vpop.f32.mrf.mxu3 }
 0x249   : > { %v695_v8 = vadd.f32 %v691_v7, %v635_v5 }
 0x24b   : > { %v699_v9 = vadd.f32 %v910_v6, %v695_v8 }
 0x24d   : > { %vm700_vm5 = vcmp.ge.f32.partialorder %v699_v9, 0.0  ;;  %v701_v10 = vmul.f32 0.01, %v699_v9 }
 0x24f   : > { %v702_v11 = vsel %vm700_vm5, %v699_v9, %v701_v10 }
 0x250   : > { %704 = vst.msk [vmem:[%s276_s11] sm:$0xf] %vm703_vm6, %v702_v11  ;;  %v693_v12 = vpop.f32.mrf.mxu3 }
 0x251 PF: > { %s17_s24 = sadd.s32 1, %s917_s24  }
 0x252   : > { %p14_p4 = scmp.ge.s32.totalorder %s17_s24, 10  }
 0x254   :  { %16 = sbr.rel (!%p14_p4) target bundleno = 1 (0x1), region = 78 }

// kernel: _lambda_.6
= control target key start
LH: loop header
LB: loop body
LE: loop exit
PB: predicated region body
PF: predicated region fallthrough
CT: control target
= control target key end

     0   :  { %s2009_s27 = smov 0   ;;  %s2011_s28 = smov 0   ;;  %s2271_s0 = inlined_call_operand.vmem [shape: f32[2,4,32], index: 0, kind: input, shape index: {}]   ;;  %s2272_s1 = inlined_call_operand.vmem [shape: f32[2,4,32], index: 1, kind: input, shape index: {}]   ;;  %s2273_s2 = inlined_call_operand.vmem [shape: f32[2,4,32], index: 2, kind: input, shape index: {}]   ;;  %s2274_s3 = inlined_call_operand.vmem [shape: f32[2,4,32], index: 3, kind: input, shape index: {}]   ;;  %s2275_s4 = inlined_call_operand.vmem [shape: f32[2,4,32], index: 4, kind: input, shape index: {}]   ;;  %s2276_s5 = inlined_call_operand.vmem [shape: bf16[3,4,4], index: 5, kind: input, shape index: {}]   ;;  %s2277_s6 = inlined_call_operand.vmem [shape: bf16[3,32,128], index: 6, kind: input, shape index: {}]   ;;  %s2278_s7 = inlined_call_operand.vmem [shape: bf16[3,32,128], index: 7, kind: input, shape index: {}]   ;;  %s2279_s8 = inlined_call_operand.vmem [shape: f32[1,128], index: 8, kind: input, shape index: {}]   ;;  %s2280_s9 = inlined_call_operand.vmem [shape: f32[4,32], index: 9, kind: input, shape index: {}]   ;;  %s2281_s10 = inlined_call_operand.vmem [shape: f32[4,32], index: 10, kind: input, shape index: {}]   ;;  %s2282_s11 = inlined_call_operand.vmem [shape: f32[4,32], index: 11, kind: input, shape index: {}]   ;;  %s2283_s12 = inlined_call_operand.vmem [shape: bf16[3,32,128], index: 12, kind: input, shape index: {}]   ;;  %s2284_s13 = inlined_call_operand.vmem [shape: bf16[3,32,128], index: 13, kind: input, shape index: {}]   ;;  %s2285_s14 = inlined_call_operand.vmem [shape: f32[1,128], index: 14, kind: input, shape index: {}]   ;;  %s2286_s15 = inlined_call_operand.vmem [shape: f32[4,32], index: 15, kind: input, shape index: {}]   ;;  %s2287_s16 = inlined_call_operand.vmem [shape: f32[4,32], index: 16, kind: input, shape index: {}]   ;;  %s2288_s17 = inlined_call_operand.vmem [shape: f32[4,32], index: 17, kind: input, shape index: {}]   ;;  %s2289_s18 = inlined_call_operand.vmem [shape: f32[2,3,4,32], index: 18, kind: output, shape index: {}]  }
   0x1   :  { %2295 = sst [smem:[#allocation12_spill]] %s2271_s0  ;;  %s2013_s29 = smov 0  }
   0x2   :  { %2296 = sst [smem:[#allocation13_spill]] %s2272_s1  ;;  %s2015_s30 = smov 0  }
   0x3   :  { %2297 = sst [smem:[#allocation14_spill]] %s2273_s2  ;;  %s2017_s0 = smov 0  }
   0x4   :  { %2298 = sst [smem:[#allocation15_spill]] %s2280_s9 }
   0x5   :  { %2299 = sst [smem:[#allocation16_spill]] %s2281_s10 }
   0x6   :  { %2300 = sst [smem:[#allocation17_spill]] %s2282_s11 }
   0x7   :  { %2301 = sst [smem:[#allocation18_spill]] %s2283_s12 }
   0x8   :  { %2302 = sst [smem:[#allocation19_spill]] %s2284_s13 }
   0x9   :  { %2303 = sst [smem:[#allocation20_spill]] %s2285_s14 }
   0xa   :  { %2304 = sst [smem:[#allocation21_spill]] %s2286_s15 }
   0xb   :  { %2305 = sst [smem:[#allocation22_spill]] %s2287_s16 }
   0xc   :  { %2306 = sst [smem:[#allocation23_spill]] %s2288_s17 }
   0xd LB: > { %2307 = sst [smem:[#allocation7_spill]] %s1901_s29  ;;  %s37_s19 = sadd.s32 1, %s1901_s29  ;;  %s1909_s0 = sphi %s2017_s0, %s28_s0   ;;  %s1905_s30 = sphi %s2015_s30, %s2328_s30   ;;  %s1901_s29 = sphi %s2013_s29, %s2327_s29   ;;  %s1897_s28 = sphi %s2011_s28, %s2326_s28   ;;  %s1893_s27 = sphi %s2009_s27, %s2325_s27  }
   0xe   : > { %2308 = sst [smem:[#allocation8_spill]] %s1905_s30  ;;  %s40_s1 = sadd.s32 1, %s1905_s30 }
   0xf   : > { %2309 = sst [smem:[#allocation9_spill]] %s1909_s0  ;;  %p38_p0 = scmp.ge.s32.totalorder %s37_s19, 3 }
  0x10   : > { %p1633_p1 = scmp.ge.s32.totalorder %s1909_s0, 1  ;;  %p561_p2 = scmp.lt.s32.totalorder %s1909_s0, 7 }
  0x11   : > { %s2330_s19 = smov (%p38_p0, %s37_s19), 0  ;;  %s2332_s1 = smov (!%p38_p0, %s40_s1), %s1905_s30 }
  0x12   : > { %2310 = sst [smem:[#allocation10_spill]] %s2330_s19  ;;  %p562_p3 = pnand %p1633_p1, %p561_p2 }
  0x13   : > { %p42_p4 = scmp.ge.s32.totalorder %s2332_s1, 2  ;;  %p633_p5 = scmp.lt.s32.totalorder (!%p562_p3), %s1897_s28, 1 }
  0x14   : > { %565 = sbr.rel (%p562_p3) target bundleno = 1801 (0x709), region = 92  ;;  %p655_p6 = scmp.lt.s32.totalorder (!%p562_p3), %s1893_s27, 2 }
  0x15   : > { %s2334_s1 = smov (%p42_p4, %s2332_s1), 0  ;;  %s2312_s24 = sld [smem:[#allocation12_spill]] (!%p562_p3) }
  0x16   : > { %2311 = sst [smem:[#allocation11_spill]] %s2334_s1  ;;  %p1640_p7 = scmp.ne.s32.totalorder (!%p562_p3), %s1893_s27, 0 }
  0x17   : > { %s2313_s30 = sld [smem:[#allocation13_spill]] (!%p562_p3) }
  0x18   : > { %s2314_s1 = sld [smem:[#allocation14_spill]] (!%p562_p3) }
  0x19   : > { %s2336_s28 = smov (!%p633_p5, %s1897_s28), 1 }
  0x1a   : > { %s656_s20 = scalar_select %p655_p6, %s1893_s27, 2 }
  0x1b   : > { %s1634_s21 = sshll.u32 %s2336_s28, 2  ;;  %s1793_s22 = smul.u32 3, %s2336_s28 }
  0x1c   : > { %s636_s25 = scalar_lea.vmem %s2312_s24, %s1634_s21  ;;  %s648_s12 = scalar_lea.vmem %s2274_s3, %s1634_s21 }
  0x1d   : > { %s640_s29 = scalar_lea.vmem %s2313_s30, %s1634_s21  ;;  %s652_s28 = scalar_lea.vmem %s2275_s4, %s1634_s21 }
  0x1e   : > { %s644_s15 = scalar_lea.vmem %s2314_s1, %s1634_s21  ;;  %s658_s9 = sadd.s32 %s1793_s22, %s656_s20 }
  0x1f   : > { %s1639_s10 = sshll.u32 %s658_s9, 2  ;;  %665 = sbr.rel (%p1640_p7) target bundleno = 42 (0x2a), region = 96 }
  0x20   : > { %s2061_s24 = scalar_lea.vmem %s2289_s18, %s1639_s10 }
  0x24   : > { %v666_v0 = vld [vmem:[%s636_s25] sm:$0xf]  ;;  %vm667_vm0 = vcmask 257024  }
  0x25   : > { %v669_v1 = vld [vmem:[%s640_s29] sm:$0xf]  ;;  %668 = vst.msk [vmem:[#allocation2] sm:$0xf] %vm667_vm0, %v666_v0 }
  0x26   : > { %v671_v2 = vld [vmem:[%s644_s15] sm:$0xf]  ;;  %670 = vst.msk [vmem:[#allocation3] sm:$0xf] %vm667_vm0, %v669_v1 }
  0x27   : > { %v673_v3 = vld [vmem:[%s648_s12] sm:$0xf]  ;;  %672 = vst.msk [vmem:[#allocation4] sm:$0xf] %vm667_vm0, %v671_v2 }
  0x28   : > { %v675_v4 = vld [vmem:[%s652_s28] sm:$0xf]  ;;  %674 = vst.msk [vmem:[#allocation5] sm:$0xf] %vm667_vm0, %v673_v3 }
  0x29   : > { %676 = vst.msk [vmem:[#allocation6] sm:$0xf] %vm667_vm0, %v675_v4 }
  0x2a PF: > { %vm717_vm1 = vcmask 1041408   ;;  %v2069_v11 = vld [vmem:[%s2276_s5] sm:$0x3]  ;;  %vm713_vm2 = vcmask 31744   ;;  %v1776_v12 = vld [vmem:[%s2278_s7 + $0x8] sm:$0xff]  ;;  %v1772_v18 = vld [vmem:[%s2277_s6 + $0x18] sm:$0xff] }
  0x2b   : > { %v1770_v13 = vld [vmem:[%s2277_s6 + $0x8] sm:$0xff]  ;;  %774 = vmatpush.bf16.msra.mxu2 %v1776_v12  ;;  %v2084_v14 = vld [vmem:[%s2276_s5 + $0x2] sm:$0x3]  ;;  %v2093_v15 = vld [vmem:[%s2276_s5 + $0x4] sm:$0x3]  ;;  %vm764_vm3 = vcmask 261120  }
  0x2c   : > { %v680_v5 = vld [vmem:[#allocation2] sm:$0xf]  ;;  %802 = vmatpush.bf16.msra.mxu3 %v1770_v13  ;;  %v1778_v19 = vld [vmem:[%s2278_s7 + $0x18] sm:$0xff]  ;;  %v1771_v20 = vld [vmem:[%s2277_s6 + $0x10] sm:$0xff]  ;;  %s1911_s16 = smov 32   ;;  %s1912_s29 = smov 64  }
  0x2d   : > { %v681_v6 = vld [vmem:[#allocation3] sm:$0xf]  ;;  %v711_v7 = vpack.c.bf16 %v680_v5, %v680_v5  ;;  %v1777_v21 = vld [vmem:[%s2278_s7 + $0x10] sm:$0xff]  ;;  %v1774_v24 = vld [vmem:[%s2277_s6 + $0x28] sm:$0xff]  ;;  %s2315_s19 = sld [smem:[#allocation16_spill]]  ;;  %s1913_s22 = smov 96  }
  0x2e   : > { %v712_v8 = vpack.c.bf16 %v681_v6, %v681_v6  ;;  %v1775_v16 = vld [vmem:[%s2278_s7] sm:$0xff]  ;;  %v1780_v25 = vld [vmem:[%s2278_s7 + $0x28] sm:$0xff]  ;;  %s2316_s21 = sld [smem:[#allocation15_spill]]  ;;  %vm1490_vm12 = vcmask 257024  }
  0x2f   : > { %v719_v9 = vsel %vm717_vm1, %v711_v7, 0  ;;  %v1769_v17 = vld [vmem:[%s2277_s6] sm:$0xff]  ;;  %775 = vmatpush.bf16.msra.mxu2 %v1775_v16  ;;  %v682_v46 = vld [vmem:[#allocation4] sm:$0xf]  ;;  %s2317_s28 = sld [smem:[#allocation17_spill]] }
  0x30   : > { %v736_v10 = vsel %vm717_vm1, %v712_v8, 0  ;;  %728 = vmatpush.bf16.msra.mxu0 %v719_v9  ;;  %803 = vmatpush.bf16.msra.mxu3 %v1769_v17  ;;  %v1773_v28 = vld [vmem:[%s2277_s6 + $0x20] sm:$0xff]  ;;  %s2318_s9 = sld [smem:[#allocation19_spill]] }
  0x31   : > { %745 = vmatpush.bf16.msra.mxu1 %v736_v10  ;;  %v1779_v29 = vld [vmem:[%s2278_s7 + $0x20] sm:$0xff]  ;;  %1038 = vrot.lane.b32.xlu1 %v682_v46, %s1911_s16  ;;  %s2319_s12 = sld [smem:[#allocation18_spill]] }
  0x32   : > { %v1837_v59 = vld [vmem:[%s2279_s8] ss:$0 sm:$0xff]  ;;  %s2320_s27 = sld [smem:[#allocation22_spill]] }
  0x33   : > { %1641 = vmatmul.msk.bf16.vlgmr.msra.gmra.mxu0 %vm713_vm2, %v2069_v11  ;;  %861 = vmatpush.bf16.msrb.mxu2 %v1772_v18  ;;  %v709_v1 = vld [vmem:[%s2315_s19] sm:$0xf]  ;;  %s2321_s19 = sld [smem:[#allocation20_spill]] }
  0x34   : > { %819 = vmatpush.bf16.msrb.mxu0 %v719_v9  ;;  %1642 = vmatmul.msk.bf16.vlgmr.msra.gmra.mxu1 %vm713_vm2, %v2069_v11  ;;  %v1012_v2 = vmul.f32 %v709_v1, %v682_v46  ;;  %v708_v3 = vld [vmem:[%s2316_s21] sm:$0xf]  ;;  %v1088_v1 = vld [vmem:[#allocation5] sm:$0xf]  ;;  %s2322_s21 = sld [smem:[#allocation21_spill]] }
  0x35   : > { %833 = vmatpush.bf16.msrb.mxu1 %v736_v10  ;;  %890 = vmatpush.bf16.msrb.mxu3 %v1778_v19  ;;  %v991_v4 = vmul.f32 %v708_v3, %v682_v46 }
  0x37   : > { %862 = vmatpush.bf16.msrb.mxu2 %v1771_v20 }
  0x38   : > { %908 = vmatpush.bf16.msra.mxu0 %v719_v9 }
  0x39   : > { %922 = vmatpush.bf16.msra.mxu1 %v736_v10  ;;  %891 = vmatpush.bf16.msrb.mxu3 %v1777_v21 }
  0x43   : > { %1661 = vmatmul.msk.bf16.vlgmr.msrb.gmra.mxu0 %vm713_vm2, %v2084_v14 }
  0x44   : > { %1662 = vmatmul.msk.bf16.vlgmr.msrb.gmra.mxu1 %vm713_vm2, %v2084_v14 }
  0x53   : > { %1681 = vmatmul.msk.bf16.vlgmr.msra.gmra.mxu0 %vm713_vm2, %v2093_v15 }
  0x54   : > { %1682 = vmatmul.msk.bf16.vlgmr.msra.gmra.mxu1 %vm713_vm2, %v2093_v15 }
  0xb0   : > { %v730_v22 = vpop.f32.mrf.mxu0 }
  0xb1   : > { %v747_v23 = vpop.f32.mrf.mxu1  ;;  %v734_v26 = vpack.c.bf16 %v730_v22, %v730_v22 }
  0xb2   : > { %v751_v27 = vpack.c.bf16 %v747_v23, %v747_v23 }
  0xb3   : > { %1660 = vmatmul.msk.bf16.vlgmr.msra.gmra.mxu3 %vm764_vm3, %v734_v26 }
  0xb4   : > { %1651 = vmatmul.msk.bf16.vlgmr.msra.gmra.mxu2 %vm764_vm3, %v751_v27  ;;  %979 = vmatpush.bf16.msra.mxu3 %v1780_v25 }
  0xb5   : > { %950 = vmatpush.bf16.msra.mxu2 %v1774_v24 }
  0xb8   : > { %v732_v30 = vpop.f32.mrf.mxu0  ;;  %980 = vmatpush.bf16.msra.mxu3 %v1779_v29 }
  0xb9   : > { %v749_v31 = vpop.f32.mrf.mxu1  ;;  %951 = vmatpush.bf16.msra.mxu2 %v1773_v28 }
  0xc0   : > { %v821_v32 = vpop.f32.mrf.mxu0 }
  0xc1   : > { %v835_v33 = vpop.f32.mrf.mxu1  ;;  %v825_v34 = vpack.c.bf16 %v821_v32, %v821_v32 }
  0xc2   : > { %v839_v35 = vpack.c.bf16 %v835_v33, %v835_v33 }
  0xc4   : > { %1671 = vmatmul.msk.bf16.vlgmr.msrb.gmra.mxu2 %vm764_vm3, %v825_v34  ;;  %1680 = vmatmul.msk.bf16.vlgmr.msrb.gmra.mxu3 %vm764_vm3, %v839_v35 }
  0xc8   : > { %v823_v36 = vpop.f32.mrf.mxu0 }
  0xc9   : > { %v837_v37 = vpop.f32.mrf.mxu1  ;;  %v1039_v36 = vpop.permute.xlu1 %1038 }
  0xd0   : > { %v910_v38 = vpop.f32.mrf.mxu0 }
  0xd1   : > { %v924_v39 = vpop.f32.mrf.mxu1  ;;  %v914_v40 = vpack.c.bf16 %v910_v38, %v910_v38 }
  0xd2   : > { %v928_v41 = vpack.c.bf16 %v924_v39, %v924_v39 }
  0xd4   : > { %1691 = vmatmul.msk.bf16.vlgmr.msra.gmra.mxu2 %vm764_vm3, %v914_v40  ;;  %1700 = vmatmul.msk.bf16.vlgmr.msra.gmra.mxu3 %vm764_vm3, %v928_v41 }
  0xd8   : > { %v912_v42 = vpop.f32.mrf.mxu0 }
  0xd9   : > { %v926_v43 = vpop.f32.mrf.mxu1 }
 0x136   : > { %v805_v45 = vpop.f32.mrf.mxu3 }
 0x137   : > { %v777_v44 = vpop.f32.mrf.mxu2 }
 0x138   : > { %v806_v53 = vadd.f32 %v805_v45, %v777_v44  ;;  %v710_v44 = vld [vmem:[%s2317_s28] sm:$0xf]  ;;  %s2323_s28 = sld [smem:[#allocation23_spill]] }
 0x13e   : > { %v807_v48 = vpop.f32.mrf.mxu3 }
 0x13f   : > { %v779_v47 = vpop.f32.mrf.mxu2 }
 0x147   : > { %v864_v49 = vpop.f32.mrf.mxu2  ;;  %v893_v50 = vpop.f32.mrf.mxu3 }
 0x148   : > { %v868_v54 = vadd.f32 %v864_v49, %v806_v53 }
 0x14a   : > { %v897_v55 = vadd.f32 %v893_v50, %v868_v54 }
 0x14f   : > { %v866_v51 = vpop.f32.mrf.mxu2  ;;  %v895_v52 = vpop.f32.mrf.mxu3 }
 0x157   : > { %v953_v56 = vpop.f32.mrf.mxu2  ;;  %v982_v57 = vpop.f32.mrf.mxu3 }
 0x158   : > { %v957_v58 = vadd.f32 %v953_v56, %v897_v55 }
 0x15a   : > { %v986_v60 = vadd.f32 %v982_v57, %v957_v58 }
 0x15c   : > { %v2139_v61 = vadd.f32 %v1837_v59, %v986_v60 }
 0x15e   : > { %1839 = vtanh.f32 %v2139_v61  ;;  %v992_v5 = vadd.f32 %v991_v4, %v2139_v61 }
 0x15f   : > { %v955_v62 = vpop.f32.mrf.mxu2  ;;  %v984_v63 = vpop.f32.mrf.mxu3 }
 0x160   : > { %v1701_v6 = vmul.f32 -1.442695, %v992_v5 }
 0x162   : > { %1841 = vpow2.f32 %v1701_v6  ;;  %v1788_v6 = vld [vmem:[%s2318_s9 + $0x8] sm:$0xff] }
 0x163   : > { %1178 = vmatpush.bf16.msrb.mxu2 %v1788_v6 }
 0x164   : > { %v1840_v0 = vpop.eup %1839 }
 0x165   : > { %1044 = vrot.lane.b32.xlu0 %v1840_v0, %s1912_s29 }
 0x168   : > { %v1842_v7 = vpop.eup %1841 }
 0x169   : > { %v996_v8 = vadd.f32 1.0, %v1842_v7  ;;  %v1782_v7 = vld [vmem:[%s2319_s12 + $0x8] sm:$0xff] }
 0x16a   : > { %1206 = vmatpush.bf16.msrb.mxu3 %v1782_v7 }
 0x16b   : > { %1843 = vrcp.f32 %v996_v8  ;;  %v1008_v17 = vand.u32 2147483648, %v996_v8  ;;  %vm1002_vm5 = vweird.f32 %v996_v8  ;;  %v1006_v18 = vand.u32 2147483647, %v996_v8 }
 0x16d   : > { %1014 = vrot.lane.b32.xlu0 %v1012_v2, %s1911_s16  ;;  %v1009_v20 = vor.u32 1.1754944e-38, %v1008_v17  ;;  %vm1007_vm7 = vcmp.eq.f32.partialorder %v1006_v18, 8.507059e+37  ;;  %v1119_v2 = vpack.c.bf16 %v1088_v1, %v1088_v1  ;;  %v1789_v17 = vld [vmem:[%s2318_s9 + $0x10] sm:$0xff] }
 0x16f   : > { %v1141_v3 = vsel %vm717_vm1, %v1119_v2, 0 }
 0x170   : > { %1150 = vmatpush.bf16.msrb.mxu1 %v1141_v3 }
 0x171   : > { %v1844_v9 = vpop.eup %1843 }
 0x172   : > { %v998_v10 = vmul.f32 %v1844_v9, %v996_v8  ;;  %vm1003_vm4 = vweird.f32 %v1844_v9 }
 0x173   : > { %vm1004_vm6 = vmor %vm1002_vm5, %vm1003_vm4  ;;  %1705 = vmatmul.msk.bf16.vlgmr.msrb.gmra.mxu1 %vm713_vm2, %v2069_v11 }
 0x174   : > { %v999_v12 = vsub.f32 1.0, %v998_v10  ;;  %1234 = vmatpush.bf16.msra.mxu1 %v1141_v3  ;;  %v1781_v10 = vld [vmem:[%s2319_s12] sm:$0xff] }
 0x175   : > { %1207 = vmatpush.bf16.msrb.mxu3 %v1781_v10 }
 0x176   : > { %v1000_v13 = vmul.f32 %v1844_v9, %v999_v12 }
 0x178   : > { %v1001_v16 = vadd.f32 %v1844_v9, %v1000_v13  ;;  %1320 = vmatpush.bf16.msrb.mxu1 %v1141_v3 }
 0x17a   : > { %v1005_v19 = vsel %vm1004_vm6, %v1844_v9, %v1001_v16  ;;  %v1783_v16 = vld [vmem:[%s2319_s12 + $0x10] sm:$0xff] }
 0x17b   : > { %v1010_v22 = vsel %vm1007_vm7, %v1009_v20, %v1005_v19  ;;  %v1786_v19 = vld [vmem:[%s2319_s12 + $0x28] sm:$0xff] }
 0x183   : > { %1725 = vmatmul.msk.bf16.vlgmr.msra.gmra.mxu1 %vm713_vm2, %v2084_v14 }
 0x193   : > { %1745 = vmatmul.msk.bf16.vlgmr.msrb.gmra.mxu1 %vm713_vm2, %v2093_v15 }
 0x1d7   : > { %v1045_v21 = vpop.permute.xlu0 %1044 }
 0x1d8   : > { %v1047_v23 = vmul.f32 %v1045_v21, %v1010_v22  ;;  %v1785_v21 = vld [vmem:[%s2319_s12 + $0x20] sm:$0xff] }
 0x1da   : > { %1049 = vrot.lane.b32.xlu1 %v1047_v23, %s1911_s16  ;;  %v1792_v23 = vld [vmem:[%s2318_s9 + $0x28] sm:$0xff] }
 0x1df   : > { %v1015_v24 = vpop.permute.xlu0 %1014 }
 0x1e0   : > { %v1017_v25 = vadd.f32 %v1015_v24, %v2139_v61 }
 0x1e2   : > { %v1702_v26 = vmul.f32 -1.442695, %v1017_v25 }
 0x1e4   : > { %1845 = vpow2.f32 %v1702_v26  ;;  %v1791_v26 = vld [vmem:[%s2318_s9 + $0x20] sm:$0xff] }
 0x1ea   : > { %v1846_v27 = vpop.eup %1845 }
 0x1eb   : > { %v1021_v28 = vadd.f32 1.0, %v1846_v27 }
 0x1ed   : > { %1847 = vrcp.f32 %v1021_v28  ;;  %v1033_v34 = vand.u32 2147483648, %v1021_v28  ;;  %vm1027_vm9 = vweird.f32 %v1021_v28  ;;  %v1031_v35 = vand.u32 2147483647, %v1021_v28 }
 0x1ef   : > { %v1034_v38 = vor.u32 1.1754944e-38, %v1033_v34  ;;  %vm1032_vm11 = vcmp.eq.f32.partialorder %v1031_v35, 8.507059e+37 }
 0x1f0   : > { %v1152_v8 = vpop.f32.mrf.mxu1 }
 0x1f1   : > { %v1156_v9 = vpack.c.bf16 %v1152_v8, %v1152_v8 }
 0x1f3   : > { %v1848_v29 = vpop.eup %1847 }
 0x1f4   : > { %v1023_v30 = vmul.f32 %v1848_v29, %v1021_v28  ;;  %vm1028_vm8 = vweird.f32 %v1848_v29  ;;  %v1089_v28 = vld [vmem:[#allocation6] sm:$0xf] }
 0x1f5   : > { %vm1029_vm10 = vmor %vm1027_vm9, %vm1028_vm8 }
 0x1f6   : > { %v1024_v31 = vsub.f32 1.0, %v1023_v30 }
 0x1f8   : > { %v1025_v32 = vmul.f32 %v1848_v29, %v1024_v31  ;;  %v1154_v12 = vpop.f32.mrf.mxu1 }
 0x1fa   : > { %v1026_v33 = vadd.f32 %v1848_v29, %v1025_v32 }
 0x1fc   : > { %v1030_v37 = vsel %vm1029_vm10, %v1848_v29, %v1026_v33  ;;  %v1116_v29 = vld [vmem:[%s2320_s27] sm:$0xf] }
 0x1fd   : > { %v1035_v39 = vsel %vm1032_vm11, %v1034_v38, %v1030_v37  ;;  %v1410_v30 = vmul.f32 %v1116_v29, %v1089_v28 }
 0x1fe   : > { %v1041_v40 = vmul.f32 %v1039_v36, %v1035_v39 }
 0x200   : > { %v1236_v13 = vpop.f32.mrf.mxu1 }
 0x201   : > { %v1240_v31 = vpack.c.bf16 %v1236_v13, %v1236_v13 }
 0x208   : > { %v1238_v18 = vpop.f32.mrf.mxu1 }
 0x210   : > { %v1322_v20 = vpop.f32.mrf.mxu1 }
 0x211   : > { %v1326_v35 = vpack.c.bf16 %v1322_v20, %v1322_v20 }
 0x218   : > { %v1324_v25 = vpop.f32.mrf.mxu1 }
 0x24c   : > { %v1050_v41 = vpop.permute.xlu1 %1049 }
 0x24d   : > { %v1052_v42 = vadd.f32 %v1050_v41, %v1041_v40 }
 0x24f   : > { %1849 = vtanh.f32 %v1052_v42  ;;  %1054 = vrot.lane.b32.xlu2 %v1052_v42, %s1913_s22 }
 0x255   : > { %v1850_v43 = vpop.eup %1849 }
 0x256   : > { %1084 = vrot.lane.b32.xlu0 %v1850_v43, %s1912_s29 }
 0x25e   : > { %1412 = vrot.lane.b32.xlu0 %v1410_v30, %s1911_s16 }
 0x2a9   : > { %v1055_v45 = vpop.permute.xlu2 %1054 }
 0x2aa   : > { %v1057_v46 = vmul.f32 %v1055_v45, %v710_v44  ;;  %1492 = vst.msk [vmem:[#allocation4] sm:$0xf] %vm1490_vm12, %v1055_v45 }
 0x2ac   : > { %1059 = vrot.lane.b32.xlu2 %v1057_v46, %s1913_s22 }
 0x2c8   : > { %v1085_v62 = vpop.permute.xlu0 %1084 }
 0x306   : > { %v1060_v47 = vpop.permute.xlu2 %1059 }
 0x307   : > { %v1062_v48 = vadd.f32 %v1060_v47, %v2139_v61 }
 0x309   : > { %v1703_v49 = vmul.f32 -1.442695, %v1062_v48 }
 0x30b   : > { %1851 = vpow2.f32 %v1703_v49 }
 0x311   : > { %v1852_v50 = vpop.eup %1851 }
 0x312   : > { %v1066_v51 = vadd.f32 1.0, %v1852_v50 }
 0x314   : > { %1853 = vrcp.f32 %v1066_v51  ;;  %v1078_v55 = vand.u32 2147483648, %v1066_v51  ;;  %v1076_v57 = vand.u32 2147483647, %v1066_v51  ;;  %vm1072_vm14 = vweird.f32 %v1066_v51 }
 0x316   : > { %v1079_v59 = vor.u32 1.1754944e-38, %v1078_v55  ;;  %vm1077_vm0 = vcmp.eq.f32.partialorder %v1076_v57, 8.507059e+37 }
 0x31a   : > { %v1854_v52 = vpop.eup %1853 }
 0x31b   : > { %v1068_v53 = vmul.f32 %v1854_v52, %v1066_v51  ;;  %vm1073_vm13 = vweird.f32 %v1854_v52 }
 0x31c   : > { %vm1074_vm15 = vmor %vm1072_vm14, %vm1073_vm13 }
 0x31d   : > { %v1069_v54 = vsub.f32 1.0, %v1068_v53  ;;  %v1838_v53 = vld [vmem:[%s2321_s19] ss:$0 sm:$0xff] }
 0x31f   : > { %v1070_v56 = vmul.f32 %v1854_v52, %v1069_v54 }
 0x321   : > { %v1071_v58 = vadd.f32 %v1854_v52, %v1070_v56 }
 0x323   : > { %v1075_v60 = vsel %vm1074_vm15, %v1854_v52, %v1071_v58 }
 0x324   : > { %v1080_v61 = vsel %vm1077_vm0, %v1079_v59, %v1075_v60  ;;  %v1115_v59 = vld [vmem:[%s2322_s21] sm:$0xf] }
 0x325   : > { %v2161_v63 = vmul.f32 %v1085_v62, %v1080_v61  ;;  %v1389_v60 = vmul.f32 %v1115_v59, %v1089_v28 }
 0x327   : > { %v1118_v0 = vpack.c.bf16 %v2161_v63, %v2161_v63 }
 0x329   : > { %1121 = vrot.lane.b32.xlu1 %v1118_v0, %s1911_s16 }
 0x331   : > { %1436 = vrot.lane.b32.xlu1 %v1089_v28, %s1911_s16 }
 0x39b   : > { %v1122_v4 = vpop.permute.xlu1 %1121 }
 0x39c   : > { %v1124_v5 = vsel %vm717_vm1, %v1122_v4, 0 }
 0x39d   : > { %1133 = vmatpush.bf16.msrb.mxu0 %v1124_v5 }
 0x3a0   : > { %1704 = vmatmul.msk.bf16.vlgmr.msrb.gmra.mxu0 %vm713_vm2, %v2069_v11  ;;  %v1787_v11 = vld [vmem:[%s2318_s9] sm:$0xff] }
 0x3a1   : > { %1220 = vmatpush.bf16.msra.mxu0 %v1124_v5  ;;  %1179 = vmatpush.bf16.msrb.mxu2 %v1787_v11 }
 0x3a3   : > { %v1437_v28 = vpop.permute.xlu1 %1436 }
 0x3a4   : > { %1714 = vmatmul.msk.bf16.vlgmr.msrb.gmra.mxu2 %vm764_vm3, %v1156_v9 }
 0x3a5   : > { %1306 = vmatpush.bf16.msrb.mxu0 %v1124_v5 }
 0x3b0   : > { %1724 = vmatmul.msk.bf16.vlgmr.msra.gmra.mxu0 %vm713_vm2, %v2084_v14  ;;  %v1784_v14 = vld [vmem:[%s2319_s12 + $0x18] sm:$0xff] }
 0x3b1   : > { %1262 = vmatpush.bf16.msra.mxu2 %v1784_v14 }
 0x3b5   : > { %1263 = vmatpush.bf16.msra.mxu2 %v1783_v16 }
 0x3b9   : > { %1348 = vmatpush.bf16.msrb.mxu2 %v1786_v19 }
 0x3bd   : > { %1349 = vmatpush.bf16.msrb.mxu2 %v1785_v21 }
 0x3c0   : > { %1744 = vmatmul.msk.bf16.vlgmr.msrb.gmra.mxu0 %vm713_vm2, %v2093_v15  ;;  %v1790_v15 = vld [vmem:[%s2318_s9 + $0x18] sm:$0xff] }
 0x3c1   : > { %1291 = vmatpush.bf16.msra.mxu3 %v1790_v15  ;;  %v1413_v15 = vpop.permute.xlu0 %1412 }
 0x3c5   : > { %1292 = vmatpush.bf16.msra.mxu3 %v1789_v17 }
 0x41d   : > { %v1135_v22 = vpop.f32.mrf.mxu0 }
 0x41e   : > { %v1139_v24 = vpack.c.bf16 %v1135_v22, %v1135_v22 }
 0x420   : > { %1723 = vmatmul.msk.bf16.vlgmr.msrb.gmra.mxu3 %vm764_vm3, %v1139_v24 }
 0x421   : > { %1377 = vmatpush.bf16.msrb.mxu3 %v1792_v23 }
 0x425   : > { %v1137_v27 = vpop.f32.mrf.mxu0  ;;  %1378 = vmatpush.bf16.msrb.mxu3 %v1791_v26 }
 0x427   : > { %v1181_v39 = vpop.f32.mrf.mxu2 }
 0x42d   : > { %v1222_v32 = vpop.f32.mrf.mxu0 }
 0x42e   : > { %v1226_v33 = vpack.c.bf16 %v1222_v32, %v1222_v32 }
 0x42f   : > { %v1183_v40 = vpop.f32.mrf.mxu2 }
 0x430   : > { %1734 = vmatmul.msk.bf16.vlgmr.msra.gmra.mxu2 %vm764_vm3, %v1226_v33  ;;  %1743 = vmatmul.msk.bf16.vlgmr.msra.gmra.mxu3 %vm764_vm3, %v1240_v31 }
 0x435   : > { %v1224_v34 = vpop.f32.mrf.mxu0 }
 0x436   : > { %v1117_v34 = vld [vmem:[%s2323_s28] sm:$0xf] }
 0x43d   : > { %v1308_v36 = vpop.f32.mrf.mxu0 }
 0x43e   : > { %v1312_v37 = vpack.c.bf16 %v1308_v36, %v1308_v36 }
 0x440   : > { %1754 = vmatmul.msk.bf16.vlgmr.msrb.gmra.mxu2 %vm764_vm3, %v1312_v37  ;;  %1763 = vmatmul.msk.bf16.vlgmr.msrb.gmra.mxu3 %vm764_vm3, %v1326_v35 }
 0x445   : > { %v1310_v38 = vpop.f32.mrf.mxu0 }
 0x4a3   : > { %v1209_v41 = vpop.f32.mrf.mxu3 }
 0x4a4   : > { %v1210_v47 = vadd.f32 %v1209_v41, %v1181_v39 }
 0x4ab   : > { %v1211_v42 = vpop.f32.mrf.mxu3 }
 0x4b3   : > { %v1265_v43 = vpop.f32.mrf.mxu2  ;;  %v1294_v44 = vpop.f32.mrf.mxu3 }
 0x4b4   : > { %v1269_v48 = vadd.f32 %v1265_v43, %v1210_v47 }
 0x4b6   : > { %v1298_v49 = vadd.f32 %v1294_v44, %v1269_v48 }
 0x4bb   : > { %v1267_v45 = vpop.f32.mrf.mxu2  ;;  %v1296_v46 = vpop.f32.mrf.mxu3 }
 0x4c3   : > { %v1351_v50 = vpop.f32.mrf.mxu2  ;;  %v1380_v51 = vpop.f32.mrf.mxu3 }
 0x4c4   : > { %v1355_v52 = vadd.f32 %v1351_v50, %v1298_v49 }
 0x4c6   : > { %v1384_v54 = vadd.f32 %v1380_v51, %v1355_v52 }
 0x4c8   : > { %v2230_v55 = vadd.f32 %v1838_v53, %v1384_v54 }
 0x4ca   : > { %1855 = vtanh.f32 %v2230_v55  ;;  %v1390_v62 = vadd.f32 %v1389_v60, %v2230_v55  ;;  %v1415_v13 = vadd.f32 %v1413_v15, %v2230_v55 }
 0x4cb   : > { %v1353_v56 = vpop.f32.mrf.mxu2  ;;  %v1382_v57 = vpop.f32.mrf.mxu3 }
 0x4cc   : > { %v1764_v61 = vmul.f32 -1.442695, %v1390_v62  ;;  %v1765_v16 = vmul.f32 -1.442695, %v1415_v13 }
 0x4ce   : > { %1857 = vpow2.f32 %v1764_v61 }
 0x4d0   : > { %v1856_v58 = vpop.eup %1855 }
 0x4d1   : > { %1442 = vrot.lane.b32.xlu2 %v1856_v58, %s1912_s29 }
 0x4d4   : > { %v1858_v0 = vpop.eup %1857 }
 0x4d5   : > { %v1394_v1 = vadd.f32 1.0, %v1858_v0 }
 0x4d7   : > { %1859 = vrcp.f32 %v1394_v1  ;;  %v1406_v7 = vand.u32 2147483648, %v1394_v1  ;;  %vm1400_vm2 = vweird.f32 %v1394_v1  ;;  %v1404_v11 = vand.u32 2147483647, %v1394_v1 }
 0x4d8   : > { %1861 = vpow2.f32 %v1765_v16 }
 0x4d9   : > { %v1407_v9 = vor.u32 1.1754944e-38, %v1406_v7  ;;  %vm1405_vm4 = vcmp.eq.f32.partialorder %v1404_v11, 8.507059e+37 }
 0x4dd   : > { %v1860_v2 = vpop.eup %1859 }
 0x4de   : > { %v1396_v3 = vmul.f32 %v1860_v2, %v1394_v1  ;;  %vm1401_vm1 = vweird.f32 %v1860_v2  ;;  %v1862_v17 = vpop.eup %1861 }
 0x4df   : > { %vm1402_vm3 = vmor %vm1400_vm2, %vm1401_vm1  ;;  %v1419_v18 = vadd.f32 1.0, %v1862_v17 }
 0x4e0   : > { %v1397_v4 = vsub.f32 1.0, %v1396_v3 }
 0x4e1   : > { %1863 = vrcp.f32 %v1419_v18  ;;  %v1431_v24 = vand.u32 2147483648, %v1419_v18  ;;  %vm1425_vm6 = vweird.f32 %v1419_v18  ;;  %v1429_v25 = vand.u32 2147483647, %v1419_v18 }
 0x4e2   : > { %v1398_v5 = vmul.f32 %v1860_v2, %v1397_v4 }
 0x4e3   : > { %v1432_v27 = vor.u32 1.1754944e-38, %v1431_v24  ;;  %vm1430_vm8 = vcmp.eq.f32.partialorder %v1429_v25, 8.507059e+37 }
 0x4e4   : > { %v1399_v6 = vadd.f32 %v1860_v2, %v1398_v5 }
 0x4e6   : > { %v1403_v8 = vsel %vm1402_vm3, %v1860_v2, %v1399_v6 }
 0x4e7   : > { %v1408_v12 = vsel %vm1405_vm4, %v1407_v9, %v1403_v8  ;;  %v1864_v19 = vpop.eup %1863 }
 0x4e8   : > { %v1421_v20 = vmul.f32 %v1864_v19, %v1419_v18  ;;  %vm1426_vm5 = vweird.f32 %v1864_v19 }
 0x4e9   : > { %vm1427_vm7 = vmor %vm1425_vm6, %vm1426_vm5 }
 0x4ea   : > { %v1422_v21 = vsub.f32 1.0, %v1421_v20 }
 0x4ec   : > { %v1423_v22 = vmul.f32 %v1864_v19, %v1422_v21 }
 0x4ee   : > { %v1424_v23 = vadd.f32 %v1864_v19, %v1423_v22 }
 0x4f0   : > { %v1428_v26 = vsel %vm1427_vm7, %v1864_v19, %v1424_v23 }
 0x4f1   : > { %v1433_v29 = vsel %vm1430_vm8, %v1432_v27, %v1428_v26 }
 0x4f2   : > { %v1439_v30 = vmul.f32 %v1437_v28, %v1433_v29 }
 0x52b   : > { %v1443_v10 = vpop.permute.xlu2 %1442 }
 0x52c   : > { %v1445_v14 = vmul.f32 %v1443_v10, %v1408_v12 }
 0x52e   : > { %1447 = vrot.lane.b32.xlu2 %v1445_v14, %s1911_s16 }
 0x588   : > { %v1448_v31 = vpop.permute.xlu2 %1447 }
 0x589   : > { %v1450_v32 = vadd.f32 %v1448_v31, %v1439_v30 }
 0x58b   : > { %1865 = vtanh.f32 %v1450_v32  ;;  %1452 = vrot.lane.b32.xlu0 %v1450_v32, %s1913_s22 }
 0x591   : > { %v1866_v33 = vpop.eup %1865 }
 0x592   : > { %1482 = vrot.lane.b32.xlu2 %v1866_v33, %s1912_s29 }
 0x593   : > { %1487 = vrot.lane.b32.xlu0 %v2161_v63, %s1911_s16 }
 0x5ec   : > { %v1483_v51 = vpop.permute.xlu2 %1482 }
 0x5fd   : > { %v1453_v35 = vpop.permute.xlu0 %1452 }
 0x5fe   : > { %v1455_v36 = vmul.f32 %v1453_v35, %v1117_v34  ;;  %1498 = vst.msk [vmem:[#allocation6] sm:$0xf] %vm1490_vm12, %v1453_v35 }
 0x600   : > { %1457 = vrot.lane.b32.xlu1 %v1455_v36, %s1913_s22 }
 0x605   : > { %v1488_v37 = vpop.permute.xlu0 %1487 }
 0x606   : > { %1491 = vst.msk [vmem:[#allocation3] sm:$0xf] %vm1490_vm12, %v1488_v37 }
 0x672   : > { %v1458_v38 = vpop.permute.xlu1 %1457 }
 0x673   : > { %v1460_v39 = vadd.f32 %v1458_v38, %v2230_v55 }
 0x675   : > { %v1766_v40 = vmul.f32 -1.442695, %v1460_v39 }
 0x677   : > { %1867 = vpow2.f32 %v1766_v40 }
 0x67d   : > { %v1868_v41 = vpop.eup %1867 }
 0x67e   : > { %v1464_v63 = vadd.f32 1.0, %v1868_v41 }
 0x680   : > { %1869 = vrcp.f32 %v1464_v63  ;;  %v1476_v45 = vand.u32 2147483648, %v1464_v63  ;;  %v1474_v47 = vand.u32 2147483647, %v1464_v63  ;;  %vm1470_vm10 = vweird.f32 %v1464_v63 }
 0x682   : > { %v1477_v49 = vor.u32 1.1754944e-38, %v1476_v45  ;;  %vm1475_vm13 = vcmp.eq.f32.partialorder %v1474_v47, 8.507059e+37 }
 0x686   : > { %v1870_v42 = vpop.eup %1869 }
 0x687   : > { %v1466_v43 = vmul.f32 %v1870_v42, %v1464_v63  ;;  %vm1471_vm9 = vweird.f32 %v1870_v42 }
 0x688   : > { %vm1472_vm11 = vmor %vm1470_vm10, %vm1471_vm9 }
 0x689   : > { %v1467_v44 = vsub.f32 1.0, %v1466_v43 }
 0x68b   : > { %v1468_v46 = vmul.f32 %v1870_v42, %v1467_v44 }
 0x68d   : > { %v1469_v48 = vadd.f32 %v1870_v42, %v1468_v46 }
 0x68f   : > { %v1473_v50 = vsel %vm1472_vm11, %v1870_v42, %v1469_v48 }
 0x690   : > { %v1478_v52 = vsel %vm1475_vm13, %v1477_v49, %v1473_v50 }
 0x691   : > { %v1485_v53 = vmul.f32 %v1483_v51, %v1478_v52 }
 0x693   : > { %1494 = vrot.lane.b32.xlu1 %v1485_v53, %s1911_s16 }
 0x705   : > { %v1495_v54 = vpop.permute.xlu1 %1494 }
 0x706   : > { %1497 = vst.msk [vmem:[#allocation5] sm:$0xf] %vm1490_vm12, %v1495_v54 }
 0x707   : > { %1499 = vst.msk [vmem:[#allocation2] sm:$0xf] %vm1490_vm12, %v1495_v54 }
 0x708   : > { %1500 = vst.msk [vmem:[%s2061_s24] sm:$0xf] %vm1490_vm12, %v1495_v54 }
 0x709 PF: > { %s2324_s29 = sld [smem:[#allocation9_spill]] }
 0x70a   : > { %s2325_s27 = sld [smem:[#allocation7_spill]] }
 0x70b   : > { %s2326_s28 = sld [smem:[#allocation8_spill]] }
 0x70c   : > { %s2328_s30 = sld [smem:[#allocation11_spill]] }
 0x70f   : > { %s28_s0 = sadd.s32 1, %s2324_s29   ;;  %s2327_s29 = sld [smem:[#allocation10_spill]] }
 0x710   : > { %p25_p8 = scmp.ge.s32.totalorder %s28_s0, 8  }
 0x712   :  { %27 = sbr.rel (!%p25_p8) target bundleno = 13 (0xd), region = 138 }

// kernel: _lambda_.5
= control target key start
LH: loop header
LB: loop body
LE: loop exit
PB: predicated region body
PF: predicated region fallthrough
CT: control target
= control target key end

     0   :  { %s2060_s24 = smov 0   ;;  %s2062_s25 = smov 0   ;;  %s2369_s0 = inlined_call_operand.vmem [shape: f32[2,4,4,64], index: 0, kind: input, shape index: {}]   ;;  %s2370_s1 = inlined_call_operand.vmem [shape: bf16[3,4,4], index: 1, kind: input, shape index: {}]   ;;  %s2371_s2 = inlined_call_operand.vmem [shape: bf16[3,64,128], index: 2, kind: input, shape index: {}]   ;;  %s2372_s3 = inlined_call_operand.vmem [shape: bf16[3,32,128], index: 3, kind: input, shape index: {}]   ;;  %s2373_s4 = inlined_call_operand.vmem [shape: f32[1,128], index: 4, kind: input, shape index: {}]   ;;  %s2374_s5 = inlined_call_operand.vmem [shape: f32[4,32], index: 5, kind: input, shape index: {}]   ;;  %s2375_s6 = inlined_call_operand.vmem [shape: f32[4,32], index: 6, kind: input, shape index: {}]   ;;  %s2376_s7 = inlined_call_operand.vmem [shape: f32[4,32], index: 7, kind: input, shape index: {}]   ;;  %s2377_s8 = inlined_call_operand.vmem [shape: bf16[3,32,128], index: 8, kind: input, shape index: {}]   ;;  %s2378_s9 = inlined_call_operand.vmem [shape: bf16[3,32,128], index: 9, kind: input, shape index: {}]   ;;  %s2379_s10 = inlined_call_operand.vmem [shape: f32[1,128], index: 10, kind: input, shape index: {}]   ;;  %s2380_s11 = inlined_call_operand.vmem [shape: f32[4,32], index: 11, kind: input, shape index: {}]   ;;  %s2381_s12 = inlined_call_operand.vmem [shape: f32[4,32], index: 12, kind: input, shape index: {}]   ;;  %s2382_s13 = inlined_call_operand.vmem [shape: f32[4,32], index: 13, kind: input, shape index: {}]   ;;  %s2383_s14 = inlined_call_operand.vmem [shape: f32[2,4,32], index: 14, kind: output, shape index: {0}]   ;;  %s2384_s15 = inlined_call_operand.vmem [shape: f32[2,4,32], index: 15, kind: output, shape index: {1}]   ;;  %s2385_s16 = inlined_call_operand.vmem [shape: f32[2,4,32], index: 16, kind: output, shape index: {2}]   ;;  %s2386_s17 = inlined_call_operand.vmem [shape: f32[2,4,32], index: 17, kind: output, shape index: {3}]  }
   0x1   :  { %2392 = sst [smem:[#allocation11_spill]] %s2369_s0  ;;  %s2064_s26 = smov 0  }
   0x2   :  { %2393 = sst [smem:[#allocation12_spill]] %s2370_s1  ;;  %s2066_s27 = smov 0  }
   0x3   :  { %2394 = sst [smem:[#allocation13_spill]] %s2377_s8  ;;  %s2068_s28 = smov 0  }
   0x4   :  { %2395 = sst [smem:[#allocation14_spill]] %s2379_s10 }
   0x5   :  { %2396 = sst [smem:[#allocation15_spill]] %s2380_s11 }
   0x6   :  { %2397 = sst [smem:[#allocation16_spill]] %s2381_s12 }
   0x7   :  { %2398 = sst [smem:[#allocation17_spill]] %s2382_s13 }
   0x8 LB: > { %2399 = sst [smem:[#allocation6_spill]] %s1956_s26  ;;  %s37_s29 = sadd.s32 1, %s1956_s26  ;;  %s1964_s28 = sphi %s2068_s28, %s28_s28   ;;  %s1960_s27 = sphi %s2066_s27, %s2415_s27   ;;  %s1956_s26 = sphi %s2064_s26, %s2414_s26   ;;  %s1952_s25 = sphi %s2062_s25, %s2413_s25   ;;  %s1948_s24 = sphi %s2060_s24, %s2412_s24  }
   0x9   : > { %2400 = sst [smem:[#allocation7_spill]] %s1960_s27  ;;  %s40_s0 = sadd.s32 1, %s1960_s27 }
   0xa   : > { %2401 = sst [smem:[#allocation8_spill]] %s1964_s28  ;;  %p38_p0 = scmp.ge.s32.totalorder %s37_s29, 4 }
   0xb   : > { %p1657_p1 = scmp.ge.s32.totalorder %s1964_s28, 1  ;;  %p511_p2 = scmp.lt.s32.totalorder %s1964_s28, 9 }
   0xc   : > { %s2417_s29 = smov (%p38_p0, %s37_s29), 0  ;;  %s2419_s0 = smov (!%p38_p0, %s40_s0), %s1960_s27 }
   0xd   : > { %2402 = sst [smem:[#allocation9_spill]] %s2417_s29  ;;  %p512_p3 = pnand %p1657_p1, %p511_p2 }
   0xe   : > { %p42_p4 = scmp.ge.s32.totalorder %s2419_s0, 2  ;;  %p577_p5 = scmp.lt.s32.totalorder (!%p512_p3), %s1952_s25, 1 }
   0xf   : > { %515 = sbr.rel (%p512_p3) target bundleno = 1793 (0x701), region = 76  ;;  %p579_p6 = scmp.lt.s32.totalorder (!%p512_p3), %s1948_s24, 3 }
  0x10   : > { %s2421_s0 = smov (%p42_p4, %s2419_s0), 0  ;;  %s2404_s28 = sld [smem:[#allocation11_spill]] (!%p512_p3) }
  0x11   : > { %2403 = sst [smem:[#allocation10_spill]] %s2421_s0  ;;  %p1664_p7 = scmp.ne.s32.totalorder (!%p512_p3), %s1948_s24, 0 }
  0x14   : > { %s2423_s25 = smov (!%p577_p5, %s1952_s25), 1 }
  0x15   : > { %s580_s30 = scalar_select %p579_p6, %s1948_s24, 3 }
  0x16   : > { %s2094_s18 = sshll.u32 %s2423_s25, 2  ;;  %605 = sbr.rel (%p1664_p7) target bundleno = 32 (0x20), region = 80 }
  0x17   : > { %s582_s19 = sadd.s32 %s2094_s18, %s580_s30  ;;  %s588_s21 = scalar_lea.vmem %s2383_s14, %s2094_s18 }
  0x18   : > { %s1659_s22 = sshll.u32 %s582_s19, 2  ;;  %s592_s29 = scalar_lea.vmem %s2384_s15, %s2094_s18 }
  0x19   : > { %s584_s25 = scalar_lea.vmem %s2404_s28, %s1659_s22  ;;  %s596_s10 = scalar_lea.vmem %s2385_s16, %s2094_s18 }
  0x1a   : > { %s600_s30 = scalar_lea.vmem %s2386_s17, %s2094_s18 }
  0x1b   : > { %vm606_vm0 = vcmask 257024   ;;  %v1966_v0 = vmov 0.0  }
  0x1c   : > { %607 = vst.msk [vmem:[#allocation2] sm:$0xf] %vm606_vm0, %v1966_v0 }
  0x1d   : > { %608 = vst.msk [vmem:[#allocation3] sm:$0xf] %vm606_vm0, %v1966_v0 }
  0x1e   : > { %609 = vst.msk [vmem:[#allocation4] sm:$0xf] %vm606_vm0, %v1966_v0 }
  0x1f   : > { %610 = vst.msk [vmem:[#allocation5] sm:$0xf] %vm606_vm0, %v1966_v0 }
  0x20 PF: > { %v614_v1 = vld [vmem:[%s584_s25] sm:$0xf]  ;;  %vm663_vm1 = vcmask 1041408   ;;  %s2405_s12 = sld [smem:[#allocation12_spill]]  ;;  %vm659_vm2 = vcmask 31744   ;;  %v1821_v8 = vld [vmem:[%s2371_s2 + $0x18] sm:$0xff] }
  0x21   : > { %v657_v3 = vpack.c.bf16 %v614_v1, %v614_v1  ;;  %v1831_v9 = vld [vmem:[%s2372_s3 + $0x8] sm:$0xff]  ;;  %759 = vmatpush.bf16.msra.mxu3 %v1821_v8  ;;  %v1820_v10 = vld [vmem:[%s2371_s2 + $0x10] sm:$0xff]  ;;  %v1830_v14 = vld [vmem:[%s2372_s3] sm:$0xff]  ;;  %vm710_vm3 = vcmask 261120   ;;  %vm751_vm4 = vcmask 523264   ;;  %s1967_s26 = smov 32  }
  0x22   : > { %720 = vmatpush.bf16.msra.mxu2 %v1831_v9  ;;  %v1819_v11 = vld [vmem:[%s2371_s2 + $0x8] sm:$0xff]  ;;  %v1818_v15 = vld [vmem:[%s2371_s2] sm:$0xff]  ;;  %v1825_v16 = vld [vmem:[%s2371_s2 + $0x38] sm:$0xff]  ;;  %s1968_s0 = smov 64   ;;  %s1969_s23 = smov 96   ;;  %vm1473_vm13 = vcmask 257024  }
  0x23   : > { %v615_v2 = vld [vmem:[#allocation2] sm:$0xf]  ;;  %v665_v5 = vsel %vm663_vm1, %v657_v3, 0  ;;  %v1824_v17 = vld [vmem:[%s2371_s2 + $0x30] sm:$0xff]  ;;  %v1823_v18 = vld [vmem:[%s2371_s2 + $0x28] sm:$0xff]  ;;  %s2406_s19 = sld [smem:[#allocation13_spill]] }
  0x24   : > { %v658_v4 = vpack.c.bf16 %v615_v2, %v615_v2  ;;  %674 = vmatpush.bf16.msra.mxu0 %v665_v5  ;;  %v1833_v19 = vld [vmem:[%s2372_s3 + $0x18] sm:$0xff]  ;;  %v1822_v20 = vld [vmem:[%s2371_s2 + $0x20] sm:$0xff]  ;;  %v1832_v21 = vld [vmem:[%s2372_s3 + $0x10] sm:$0xff]  ;;  %s2407_s8 = sld [smem:[#allocation16_spill]]  ;;  %p1815_p8 = scmp.ne.s32.totalorder %s1948_s24, 3 }
  0x25   : > { %760 = vmatpush.bf16.msra.mxu3 %v1820_v10  ;;  %v1829_v24 = vld [vmem:[%s2371_s2 + $0x58] sm:$0xff]  ;;  %v1835_v25 = vld [vmem:[%s2372_s3 + $0x28] sm:$0xff]  ;;  %v1828_v28 = vld [vmem:[%s2371_s2 + $0x50] sm:$0xff]  ;;  %s2408_s27 = sld [smem:[#allocation14_spill]] }
  0x26   : > { %v682_v6 = vsel %vm663_vm1, %v658_v4, 0  ;;  %v2122_v7 = vld [vmem:[%s2405_s12] sm:$0x3]  ;;  %v2143_v12 = vld [vmem:[%s2405_s12 + $0x2] sm:$0x3]  ;;  %721 = vmatpush.bf16.msra.mxu2 %v1830_v14  ;;  %v1827_v32 = vld [vmem:[%s2371_s2 + $0x48] sm:$0xff] }
  0x27   : > { %691 = vmatpush.bf16.msra.mxu1 %v682_v6  ;;  %1665 = vmatmul.msk.bf16.vlgmr.msra.gmra.mxu0 %vm659_vm2, %v2122_v7  ;;  %v2152_v13 = vld [vmem:[%s2405_s12 + $0x4] sm:$0x3]  ;;  %v1892_v61 = vld [vmem:[%s2373_s4] ss:$0 sm:$0xff]  ;;  %s2409_s20 = sld [smem:[#allocation15_spill]] }
  0x28   : > { %778 = vmatpush.bf16.msrb.mxu0 %v665_v5  ;;  %v1834_v29 = vld [vmem:[%s2372_s3 + $0x20] sm:$0xff] }
  0x29   : > { %761 = vmatpush.bf16.msra.mxu3 %v1819_v11  ;;  %v1826_v33 = vld [vmem:[%s2371_s2 + $0x40] sm:$0xff] }
  0x2a   : > { %1666 = vmatmul.msk.bf16.vlgmr.msra.gmra.mxu1 %vm659_vm2, %v2122_v7  ;;  %830 = vmatpush.bf16.msrb.mxu2 %v1825_v16  ;;  %v616_v48 = vld [vmem:[#allocation3] sm:$0xf]  ;;  %v655_v3 = vld [vmem:[%s2375_s6] sm:$0xf] }
  0x2b   : > { %792 = vmatpush.bf16.msrb.mxu1 %v682_v6  ;;  %1021 = vrot.lane.b32.xlu1 %v616_v48, %s1967_s26  ;;  %v995_v4 = vmul.f32 %v655_v3, %v616_v48  ;;  %v1071_v3 = vld [vmem:[#allocation4] sm:$0xf] }
  0x2c   : > { %879 = vmatpush.bf16.msra.mxu0 %v665_v5  ;;  %v654_v5 = vld [vmem:[%s2374_s5] sm:$0xf] }
  0x2d   : > { %762 = vmatpush.bf16.msra.mxu3 %v1818_v15 }
  0x2e   : > { %831 = vmatpush.bf16.msrb.mxu2 %v1824_v17 }
  0x2f   : > { %893 = vmatpush.bf16.msra.mxu1 %v682_v6  ;;  %v974_v6 = vmul.f32 %v654_v5, %v616_v48 }
  0x31   : > { %861 = vmatpush.bf16.msrb.mxu3 %v1833_v19 }
  0x32   : > { %832 = vmatpush.bf16.msrb.mxu2 %v1823_v18 }
  0x35   : > { %862 = vmatpush.bf16.msrb.mxu3 %v1832_v21 }
  0x36   : > { %833 = vmatpush.bf16.msrb.mxu2 %v1822_v20 }
  0x37   : > { %1693 = vmatmul.msk.bf16.vlgmr.msrb.gmra.mxu0 %vm659_vm2, %v2143_v12 }
  0x3a   : > { %1694 = vmatmul.msk.bf16.vlgmr.msrb.gmra.mxu1 %vm659_vm2, %v2143_v12 }
  0x47   : > { %1721 = vmatmul.msk.bf16.vlgmr.msra.gmra.mxu0 %vm659_vm2, %v2152_v13 }
  0x4a   : > { %1722 = vmatmul.msk.bf16.vlgmr.msra.gmra.mxu1 %vm659_vm2, %v2152_v13 }
  0xa4   : > { %v676_v22 = vpop.f32.mrf.mxu0 }
  0xa5   : > { %v680_v26 = vpack.c.bf16 %v676_v22, %v676_v22 }
  0xa7   : > { %v693_v23 = vpop.f32.mrf.mxu1  ;;  %1692 = vmatmul.msk.bf16.vlgmr.msra.gmra.mxu3 %vm751_vm4, %v680_v26 }
  0xa8   : > { %v697_v27 = vpack.c.bf16 %v693_v23, %v693_v23  ;;  %962 = vmatpush.bf16.msra.mxu3 %v1835_v25 }
  0xaa   : > { %1675 = vmatmul.msk.bf16.vlgmr.msra.gmra.mxu2 %vm710_vm3, %v697_v27 }
  0xab   : > { %931 = vmatpush.bf16.msra.mxu2 %v1829_v24 }
  0xac   : > { %v678_v30 = vpop.f32.mrf.mxu0  ;;  %963 = vmatpush.bf16.msra.mxu3 %v1834_v29 }
  0xaf   : > { %v695_v31 = vpop.f32.mrf.mxu1  ;;  %932 = vmatpush.bf16.msra.mxu2 %v1828_v28 }
  0xb3   : > { %933 = vmatpush.bf16.msra.mxu2 %v1827_v32 }
  0xb4   : > { %v780_v34 = vpop.f32.mrf.mxu0 }
  0xb5   : > { %v784_v36 = vpack.c.bf16 %v780_v34, %v780_v34 }
  0xb7   : > { %v794_v35 = vpop.f32.mrf.mxu1  ;;  %934 = vmatpush.bf16.msra.mxu2 %v1826_v33 }
  0xb8   : > { %v798_v37 = vpack.c.bf16 %v794_v35, %v794_v35 }
  0xba   : > { %1711 = vmatmul.msk.bf16.vlgmr.msrb.gmra.mxu2 %vm751_vm4, %v784_v36  ;;  %1720 = vmatmul.msk.bf16.vlgmr.msrb.gmra.mxu3 %vm710_vm3, %v798_v37 }
  0xbc   : > { %v782_v38 = vpop.f32.mrf.mxu0 }
  0xbd   : > { %v1022_v38 = vpop.permute.xlu1 %1021 }
  0xbf   : > { %v796_v39 = vpop.f32.mrf.mxu1 }
  0xc4   : > { %v881_v40 = vpop.f32.mrf.mxu0 }
  0xc5   : > { %v885_v42 = vpack.c.bf16 %v881_v40, %v881_v40 }
  0xc7   : > { %v895_v41 = vpop.f32.mrf.mxu1 }
  0xc8   : > { %v899_v43 = vpack.c.bf16 %v895_v41, %v895_v41 }
  0xca   : > { %1739 = vmatmul.msk.bf16.vlgmr.msra.gmra.mxu2 %vm751_vm4, %v885_v42  ;;  %1748 = vmatmul.msk.bf16.vlgmr.msra.gmra.mxu3 %vm710_vm3, %v899_v43 }
  0xcc   : > { %v883_v44 = vpop.f32.mrf.mxu0 }
  0xcf   : > { %v897_v45 = vpop.f32.mrf.mxu1 }
 0x12a   : > { %v764_v47 = vpop.f32.mrf.mxu3 }
 0x12d   : > { %v723_v46 = vpop.f32.mrf.mxu2 }
 0x12e   : > { %v765_v55 = vadd.f32 %v764_v47, %v723_v46  ;;  %v656_v46 = vld [vmem:[%s2376_s7] sm:$0xf] }
 0x132   : > { %v766_v50 = vpop.f32.mrf.mxu3 }
 0x135   : > { %v725_v49 = vpop.f32.mrf.mxu2 }
 0x13d   : > { %v835_v51 = vpop.f32.mrf.mxu2  ;;  %v864_v52 = vpop.f32.mrf.mxu3 }
 0x13e   : > { %v839_v56 = vadd.f32 %v835_v51, %v765_v55 }
 0x140   : > { %v868_v57 = vadd.f32 %v864_v52, %v839_v56 }
 0x145   : > { %v837_v53 = vpop.f32.mrf.mxu2  ;;  %v866_v54 = vpop.f32.mrf.mxu3 }
 0x14d   : > { %v936_v58 = vpop.f32.mrf.mxu2  ;;  %v965_v59 = vpop.f32.mrf.mxu3 }
 0x14e   : > { %v940_v60 = vadd.f32 %v936_v58, %v868_v57 }
 0x150   : > { %v969_v62 = vadd.f32 %v965_v59, %v940_v60 }
 0x152   : > { %v2210_v63 = vadd.f32 %v1892_v61, %v969_v62 }
 0x154   : > { %1894 = vtanh.f32 %v2210_v63  ;;  %v975_v8 = vadd.f32 %v974_v6, %v2210_v63 }
 0x155   : > { %v938_v0 = vpop.f32.mrf.mxu2  ;;  %v967_v1 = vpop.f32.mrf.mxu3 }
 0x156   : > { %v1749_v9 = vmul.f32 -1.442695, %v975_v8 }
 0x158   : > { %1896 = vpow2.f32 %v1749_v9  ;;  %v1843_v9 = vld [vmem:[%s2378_s9 + $0x8] sm:$0xff] }
 0x159   : > { %1161 = vmatpush.bf16.msrb.mxu2 %v1843_v9 }
 0x15a   : > { %v1895_v2 = vpop.eup %1894 }
 0x15b   : > { %1027 = vrot.lane.b32.xlu0 %v1895_v2, %s1968_s0 }
 0x15e   : > { %v1897_v10 = vpop.eup %1896 }
 0x15f   : > { %v979_v11 = vadd.f32 1.0, %v1897_v10  ;;  %v1837_v10 = vld [vmem:[%s2406_s19 + $0x8] sm:$0xff] }
 0x160   : > { %1189 = vmatpush.bf16.msrb.mxu3 %v1837_v10 }
 0x161   : > { %1898 = vrcp.f32 %v979_v11  ;;  %v991_v19 = vand.u32 2147483648, %v979_v11  ;;  %vm985_vm6 = vweird.f32 %v979_v11  ;;  %v989_v20 = vand.u32 2147483647, %v979_v11 }
 0x163   : > { %997 = vrot.lane.b32.xlu0 %v995_v4, %s1967_s26  ;;  %v992_v22 = vor.u32 1.1754944e-38, %v991_v19  ;;  %vm990_vm8 = vcmp.eq.f32.partialorder %v989_v20, 8.507059e+37  ;;  %v1102_v4 = vpack.c.bf16 %v1071_v3, %v1071_v3  ;;  %v1844_v19 = vld [vmem:[%s2378_s9 + $0x10] sm:$0xff] }
 0x165   : > { %v1124_v5 = vsel %vm663_vm1, %v1102_v4, 0 }
 0x166   : > { %1133 = vmatpush.bf16.msrb.mxu1 %v1124_v5 }
 0x167   : > { %v1899_v14 = vpop.eup %1898 }
 0x168   : > { %v981_v15 = vmul.f32 %v1899_v14, %v979_v11  ;;  %vm986_vm5 = vweird.f32 %v1899_v14 }
 0x169   : > { %vm987_vm7 = vmor %vm985_vm6, %vm986_vm5  ;;  %1753 = vmatmul.msk.bf16.vlgmr.msrb.gmra.mxu1 %vm659_vm2, %v2122_v7 }
 0x16a   : > { %v982_v16 = vsub.f32 1.0, %v981_v15  ;;  %1217 = vmatpush.bf16.msra.mxu1 %v1124_v5  ;;  %v1836_v15 = vld [vmem:[%s2406_s19] sm:$0xff] }
 0x16b   : > { %1190 = vmatpush.bf16.msrb.mxu3 %v1836_v15 }
 0x16c   : > { %v983_v17 = vmul.f32 %v1899_v14, %v982_v16 }
 0x16e   : > { %v984_v18 = vadd.f32 %v1899_v14, %v983_v17  ;;  %1303 = vmatpush.bf16.msrb.mxu1 %v1124_v5 }
 0x170   : > { %v988_v21 = vsel %vm987_vm7, %v1899_v14, %v984_v18  ;;  %v1838_v18 = vld [vmem:[%s2406_s19 + $0x10] sm:$0xff] }
 0x171   : > { %v993_v24 = vsel %vm990_vm8, %v992_v22, %v988_v21  ;;  %v1841_v21 = vld [vmem:[%s2406_s19 + $0x28] sm:$0xff] }
 0x179   : > { %1773 = vmatmul.msk.bf16.vlgmr.msra.gmra.mxu1 %vm659_vm2, %v2143_v12 }
 0x189   : > { %1793 = vmatmul.msk.bf16.vlgmr.msrb.gmra.mxu1 %vm659_vm2, %v2152_v13 }
 0x1cd   : > { %v1028_v23 = vpop.permute.xlu0 %1027 }
 0x1ce   : > { %v1030_v25 = vmul.f32 %v1028_v23, %v993_v24  ;;  %v1840_v23 = vld [vmem:[%s2406_s19 + $0x20] sm:$0xff] }
 0x1d0   : > { %1032 = vrot.lane.b32.xlu1 %v1030_v25, %s1967_s26  ;;  %v1847_v25 = vld [vmem:[%s2378_s9 + $0x28] sm:$0xff] }
 0x1d5   : > { %v998_v26 = vpop.permute.xlu0 %997 }
 0x1d6   : > { %v1000_v27 = vadd.f32 %v998_v26, %v2210_v63 }
 0x1d8   : > { %v1750_v28 = vmul.f32 -1.442695, %v1000_v27 }
 0x1da   : > { %1900 = vpow2.f32 %v1750_v28  ;;  %v1846_v28 = vld [vmem:[%s2378_s9 + $0x20] sm:$0xff] }
 0x1e0   : > { %v1901_v29 = vpop.eup %1900 }
 0x1e1   : > { %v1004_v30 = vadd.f32 1.0, %v1901_v29 }
 0x1e3   : > { %1902 = vrcp.f32 %v1004_v30  ;;  %v1016_v36 = vand.u32 2147483648, %v1004_v30  ;;  %vm1010_vm10 = vweird.f32 %v1004_v30  ;;  %v1014_v37 = vand.u32 2147483647, %v1004_v30 }
 0x1e5   : > { %v1017_v40 = vor.u32 1.1754944e-38, %v1016_v36  ;;  %vm1015_vm12 = vcmp.eq.f32.partialorder %v1014_v37, 8.507059e+37 }
 0x1e6   : > { %v1135_v11 = vpop.f32.mrf.mxu1 }
 0x1e7   : > { %v1139_v14 = vpack.c.bf16 %v1135_v11, %v1135_v11 }
 0x1e9   : > { %v1903_v31 = vpop.eup %1902 }
 0x1ea   : > { %v1006_v32 = vmul.f32 %v1903_v31, %v1004_v30  ;;  %vm1011_vm9 = vweird.f32 %v1903_v31  ;;  %v1072_v30 = vld [vmem:[#allocation5] sm:$0xf] }
 0x1eb   : > { %vm1012_vm11 = vmor %vm1010_vm10, %vm1011_vm9 }
 0x1ec   : > { %v1007_v33 = vsub.f32 1.0, %v1006_v32 }
 0x1ee   : > { %v1008_v34 = vmul.f32 %v1903_v31, %v1007_v33  ;;  %v1137_v16 = vpop.f32.mrf.mxu1 }
 0x1f0   : > { %v1009_v35 = vadd.f32 %v1903_v31, %v1008_v34 }
 0x1f2   : > { %v1013_v39 = vsel %vm1012_vm11, %v1903_v31, %v1009_v35  ;;  %v1099_v31 = vld [vmem:[%s2407_s8] sm:$0xf]  ;;  %s2410_s8 = sld [smem:[#allocation17_spill]] }
 0x1f3   : > { %v1018_v41 = vsel %vm1015_vm12, %v1017_v40, %v1013_v39  ;;  %v1393_v32 = vmul.f32 %v1099_v31, %v1072_v30 }
 0x1f4   : > { %v1024_v42 = vmul.f32 %v1022_v38, %v1018_v41 }
 0x1f6   : > { %v1219_v17 = vpop.f32.mrf.mxu1 }
 0x1f7   : > { %v1223_v33 = vpack.c.bf16 %v1219_v17, %v1219_v17 }
 0x1fe   : > { %v1221_v20 = vpop.f32.mrf.mxu1 }
 0x206   : > { %v1305_v22 = vpop.f32.mrf.mxu1 }
 0x207   : > { %v1309_v37 = vpack.c.bf16 %v1305_v22, %v1305_v22 }
 0x20e   : > { %v1307_v27 = vpop.f32.mrf.mxu1 }
 0x242   : > { %v1033_v43 = vpop.permute.xlu1 %1032 }
 0x243   : > { %v1035_v44 = vadd.f32 %v1033_v43, %v1024_v42 }
 0x245   : > { %1904 = vtanh.f32 %v1035_v44  ;;  %1037 = vrot.lane.b32.xlu2 %v1035_v44, %s1969_s23 }
 0x24b   : > { %v1905_v45 = vpop.eup %1904 }
 0x24c   : > { %1067 = vrot.lane.b32.xlu0 %v1905_v45, %s1968_s0 }
 0x254   : > { %1395 = vrot.lane.b32.xlu0 %v1393_v32, %s1967_s26 }
 0x29f   : > { %v2229_v47 = vpop.permute.xlu2 %1037 }
 0x2a0   : > { %v1040_v48 = vmul.f32 %v2229_v47, %v656_v46  ;;  %1475 = vst.msk [vmem:[#allocation3] sm:$0xf] %vm1473_vm13, %v2229_v47 }
 0x2a2   : > { %1042 = vrot.lane.b32.xlu2 %v1040_v48, %s1969_s23 }
 0x2be   : > { %v1068_v0 = vpop.permute.xlu0 %1067 }
 0x2c6   : > { %v1396_v17 = vpop.permute.xlu0 %1395 }
 0x2fc   : > { %v1043_v49 = vpop.permute.xlu2 %1042 }
 0x2fd   : > { %v1045_v50 = vadd.f32 %v1043_v49, %v2210_v63 }
 0x2ff   : > { %v1751_v51 = vmul.f32 -1.442695, %v1045_v50 }
 0x301   : > { %1906 = vpow2.f32 %v1751_v51 }
 0x307   : > { %v1907_v52 = vpop.eup %1906 }
 0x308   : > { %v1049_v53 = vadd.f32 1.0, %v1907_v52 }
 0x30a   : > { %1908 = vrcp.f32 %v1049_v53  ;;  %v1061_v57 = vand.u32 2147483648, %v1049_v53  ;;  %v1059_v59 = vand.u32 2147483647, %v1049_v53  ;;  %vm1055_vm15 = vweird.f32 %v1049_v53 }
 0x30c   : > { %v1062_v61 = vor.u32 1.1754944e-38, %v1061_v57  ;;  %vm1060_vm4 = vcmp.eq.f32.partialorder %v1059_v59, 8.507059e+37 }
 0x310   : > { %v1909_v54 = vpop.eup %1908 }
 0x311   : > { %v1051_v55 = vmul.f32 %v1909_v54, %v1049_v53  ;;  %vm1056_vm14 = vweird.f32 %v1909_v54 }
 0x312   : > { %vm1057_vm0 = vmor %vm1055_vm15, %vm1056_vm14 }
 0x313   : > { %v1052_v56 = vsub.f32 1.0, %v1051_v55 }
 0x315   : > { %v1053_v58 = vmul.f32 %v1909_v54, %v1052_v56  ;;  %v1893_v56 = vld [vmem:[%s2408_s27] ss:$0 sm:$0xff] }
 0x317   : > { %v1054_v60 = vadd.f32 %v1909_v54, %v1053_v58 }
 0x319   : > { %v1058_v62 = vsel %vm1057_vm0, %v1909_v54, %v1054_v60 }
 0x31a   : > { %v1063_v63 = vsel %vm1060_vm4, %v1062_v61, %v1058_v62  ;;  %v1098_v62 = vld [vmem:[%s2409_s20] sm:$0xf] }
 0x31b   : > { %v2236_v1 = vmul.f32 %v1068_v0, %v1063_v63  ;;  %v1372_v0 = vmul.f32 %v1098_v62, %v1072_v30 }
 0x31d   : > { %v1101_v2 = vpack.c.bf16 %v2236_v1, %v2236_v1 }
 0x31f   : > { %1104 = vrot.lane.b32.xlu1 %v1101_v2, %s1967_s26 }
 0x327   : > { %1419 = vrot.lane.b32.xlu1 %v1072_v30, %s1967_s26 }
 0x391   : > { %v1105_v6 = vpop.permute.xlu1 %1104 }
 0x392   : > { %v1107_v8 = vsel %vm663_vm1, %v1105_v6, 0 }
 0x393   : > { %1116 = vmatpush.bf16.msrb.mxu0 %v1107_v8 }
 0x396   : > { %1752 = vmatmul.msk.bf16.vlgmr.msrb.gmra.mxu0 %vm659_vm2, %v2122_v7  ;;  %v1842_v7 = vld [vmem:[%s2378_s9] sm:$0xff] }
 0x397   : > { %1203 = vmatpush.bf16.msra.mxu0 %v1107_v8  ;;  %1162 = vmatpush.bf16.msrb.mxu2 %v1842_v7 }
 0x399   : > { %v1420_v31 = vpop.permute.xlu1 %1419 }
 0x39a   : > { %1762 = vmatmul.msk.bf16.vlgmr.msrb.gmra.mxu2 %vm710_vm3, %v1139_v14 }
 0x39b   : > { %1289 = vmatpush.bf16.msrb.mxu0 %v1107_v8 }
 0x3a6   : > { %1772 = vmatmul.msk.bf16.vlgmr.msra.gmra.mxu0 %vm659_vm2, %v2143_v12  ;;  %v1839_v12 = vld [vmem:[%s2406_s19 + $0x18] sm:$0xff] }
 0x3a7   : > { %1245 = vmatpush.bf16.msra.mxu2 %v1839_v12 }
 0x3ab   : > { %1246 = vmatpush.bf16.msra.mxu2 %v1838_v18 }
 0x3af   : > { %1331 = vmatpush.bf16.msrb.mxu2 %v1841_v21 }
 0x3b3   : > { %1332 = vmatpush.bf16.msrb.mxu2 %v1840_v23 }
 0x3b6   : > { %1792 = vmatmul.msk.bf16.vlgmr.msrb.gmra.mxu0 %vm659_vm2, %v2152_v13  ;;  %v1845_v13 = vld [vmem:[%s2378_s9 + $0x18] sm:$0xff] }
 0x3b7   : > { %1274 = vmatpush.bf16.msra.mxu3 %v1845_v13 }
 0x3bb   : > { %1275 = vmatpush.bf16.msra.mxu3 %v1844_v19 }
 0x413   : > { %v1118_v24 = vpop.f32.mrf.mxu0 }
 0x414   : > { %v1122_v26 = vpack.c.bf16 %v1118_v24, %v1118_v24 }
 0x416   : > { %1771 = vmatmul.msk.bf16.vlgmr.msrb.gmra.mxu3 %vm710_vm3, %v1122_v26 }
 0x417   : > { %1360 = vmatpush.bf16.msrb.mxu3 %v1847_v25 }
 0x41b   : > { %v1120_v29 = vpop.f32.mrf.mxu0  ;;  %1361 = vmatpush.bf16.msrb.mxu3 %v1846_v28 }
 0x41d   : > { %v1164_v41 = vpop.f32.mrf.mxu2 }
 0x423   : > { %v1205_v34 = vpop.f32.mrf.mxu0 }
 0x424   : > { %v1209_v35 = vpack.c.bf16 %v1205_v34, %v1205_v34 }
 0x425   : > { %v1166_v42 = vpop.f32.mrf.mxu2 }
 0x426   : > { %1782 = vmatmul.msk.bf16.vlgmr.msra.gmra.mxu2 %vm710_vm3, %v1209_v35  ;;  %1791 = vmatmul.msk.bf16.vlgmr.msra.gmra.mxu3 %vm710_vm3, %v1223_v33 }
 0x42b   : > { %v1207_v36 = vpop.f32.mrf.mxu0 }
 0x433   : > { %v1291_v38 = vpop.f32.mrf.mxu0 }
 0x434   : > { %v1295_v39 = vpack.c.bf16 %v1291_v38, %v1291_v38 }
 0x436   : > { %1802 = vmatmul.msk.bf16.vlgmr.msrb.gmra.mxu2 %vm710_vm3, %v1295_v39  ;;  %1811 = vmatmul.msk.bf16.vlgmr.msrb.gmra.mxu3 %vm710_vm3, %v1309_v37  ;;  %v1100_v37 = vld [vmem:[%s2410_s8] sm:$0xf] }
 0x43b   : > { %v1293_v40 = vpop.f32.mrf.mxu0 }
 0x499   : > { %v1192_v43 = vpop.f32.mrf.mxu3 }
 0x49a   : > { %v1193_v50 = vadd.f32 %v1192_v43, %v1164_v41 }
 0x4a1   : > { %v1194_v44 = vpop.f32.mrf.mxu3 }
 0x4a9   : > { %v1248_v45 = vpop.f32.mrf.mxu2  ;;  %v1277_v46 = vpop.f32.mrf.mxu3 }
 0x4aa   : > { %v1252_v51 = vadd.f32 %v1248_v45, %v1193_v50 }
 0x4ac   : > { %v1281_v52 = vadd.f32 %v1277_v46, %v1252_v51 }
 0x4b1   : > { %v1250_v48 = vpop.f32.mrf.mxu2  ;;  %v1279_v49 = vpop.f32.mrf.mxu3 }
 0x4b9   : > { %v1334_v53 = vpop.f32.mrf.mxu2  ;;  %v1363_v54 = vpop.f32.mrf.mxu3 }
 0x4ba   : > { %v1338_v55 = vadd.f32 %v1334_v53, %v1281_v52 }
 0x4bc   : > { %v1367_v57 = vadd.f32 %v1363_v54, %v1338_v55 }
 0x4be   : > { %v2305_v58 = vadd.f32 %v1893_v56, %v1367_v57 }
 0x4c0   : > { %1910 = vtanh.f32 %v2305_v58  ;;  %v1373_v63 = vadd.f32 %v1372_v0, %v2305_v58  ;;  %v1398_v18 = vadd.f32 %v1396_v17, %v2305_v58 }
 0x4c1   : > { %v1336_v59 = vpop.f32.mrf.mxu2  ;;  %v1365_v60 = vpop.f32.mrf.mxu3 }
 0x4c2   : > { %v1812_v2 = vmul.f32 -1.442695, %v1373_v63  ;;  %v1813_v19 = vmul.f32 -1.442695, %v1398_v18 }
 0x4c4   : > { %1912 = vpow2.f32 %v1812_v2 }
 0x4c6   : > { %v1911_v61 = vpop.eup %1910 }
 0x4c7   : > { %1425 = vrot.lane.b32.xlu2 %v1911_v61, %s1968_s0 }
 0x4ca   : > { %v1913_v3 = vpop.eup %1912 }
 0x4cb   : > { %v1377_v4 = vadd.f32 1.0, %v1913_v3 }
 0x4cd   : > { %1914 = vrcp.f32 %v1377_v4  ;;  %v1389_v7 = vand.u32 2147483648, %v1377_v4  ;;  %vm1383_vm2 = vweird.f32 %v1377_v4  ;;  %v1387_v11 = vand.u32 2147483647, %v1377_v4 }
 0x4ce   : > { %1916 = vpow2.f32 %v1813_v19 }
 0x4cf   : > { %v1390_v15 = vor.u32 1.1754944e-38, %v1389_v7  ;;  %vm1388_vm5 = vcmp.eq.f32.partialorder %v1387_v11, 8.507059e+37 }
 0x4d3   : > { %v1915_v5 = vpop.eup %1914 }
 0x4d4   : > { %v1379_v6 = vmul.f32 %v1915_v5, %v1377_v4  ;;  %vm1384_vm1 = vweird.f32 %v1915_v5  ;;  %v1917_v20 = vpop.eup %1916 }
 0x4d5   : > { %vm1385_vm3 = vmor %vm1383_vm2, %vm1384_vm1  ;;  %v1402_v21 = vadd.f32 1.0, %v1917_v20 }
 0x4d6   : > { %v1380_v8 = vsub.f32 1.0, %v1379_v6 }
 0x4d7   : > { %1918 = vrcp.f32 %v1402_v21  ;;  %v1414_v27 = vand.u32 2147483648, %v1402_v21  ;;  %vm1408_vm7 = vweird.f32 %v1402_v21  ;;  %v1412_v28 = vand.u32 2147483647, %v1402_v21 }
 0x4d8   : > { %v1381_v9 = vmul.f32 %v1915_v5, %v1380_v8 }
 0x4d9   : > { %v1415_v30 = vor.u32 1.1754944e-38, %v1414_v27  ;;  %vm1413_vm9 = vcmp.eq.f32.partialorder %v1412_v28, 8.507059e+37 }
 0x4da   : > { %v1382_v10 = vadd.f32 %v1915_v5, %v1381_v9 }
 0x4dc   : > { %v1386_v14 = vsel %vm1385_vm3, %v1915_v5, %v1382_v10 }
 0x4dd   : > { %v1391_v12 = vsel %vm1388_vm5, %v1390_v15, %v1386_v14  ;;  %v1919_v22 = vpop.eup %1918 }
 0x4de   : > { %v1404_v23 = vmul.f32 %v1919_v22, %v1402_v21  ;;  %vm1409_vm6 = vweird.f32 %v1919_v22 }
 0x4df   : > { %vm1410_vm8 = vmor %vm1408_vm7, %vm1409_vm6 }
 0x4e0   : > { %v1405_v24 = vsub.f32 1.0, %v1404_v23 }
 0x4e2   : > { %v1406_v25 = vmul.f32 %v1919_v22, %v1405_v24 }
 0x4e4   : > { %v1407_v26 = vadd.f32 %v1919_v22, %v1406_v25 }
 0x4e6   : > { %v1411_v29 = vsel %vm1410_vm8, %v1919_v22, %v1407_v26 }
 0x4e7   : > { %v1416_v32 = vsel %vm1413_vm9, %v1415_v30, %v1411_v29 }
 0x4e8   : > { %v1422_v33 = vmul.f32 %v1420_v31, %v1416_v32 }
 0x521   : > { %v1426_v16 = vpop.permute.xlu2 %1425 }
 0x522   : > { %v1428_v13 = vmul.f32 %v1426_v16, %v1391_v12 }
 0x524   : > { %1430 = vrot.lane.b32.xlu2 %v1428_v13, %s1967_s26 }
 0x57e   : > { %v1431_v34 = vpop.permute.xlu2 %1430 }
 0x57f   : > { %v1433_v35 = vadd.f32 %v1431_v34, %v1422_v33 }
 0x581   : > { %1920 = vtanh.f32 %v1433_v35  ;;  %1435 = vrot.lane.b32.xlu0 %v1433_v35, %s1969_s23 }
 0x587   : > { %v1921_v36 = vpop.eup %1920 }
 0x588   : > { %1465 = vrot.lane.b32.xlu2 %v1921_v36, %s1968_s0 }
 0x589   : > { %1470 = vrot.lane.b32.xlu0 %v2236_v1, %s1967_s26 }
 0x5e2   : > { %v1466_v55 = vpop.permute.xlu2 %1465 }
 0x5f3   : > { %v1436_v38 = vpop.permute.xlu0 %1435 }
 0x5f4   : > { %v1438_v39 = vmul.f32 %v1436_v38, %v1100_v37  ;;  %1481 = vst.msk [vmem:[#allocation5] sm:$0xf] %vm1473_vm13, %v1436_v38 }
 0x5f6   : > { %1440 = vrot.lane.b32.xlu1 %v1438_v39, %s1969_s23 }
 0x5fb   : > { %v1471_v40 = vpop.permute.xlu0 %1470 }
 0x5fc   : > { %1474 = vst.msk [vmem:[#allocation2] sm:$0xf] %vm1473_vm13, %v1471_v40 }
 0x668   : > { %v1441_v41 = vpop.permute.xlu1 %1440 }
 0x669   : > { %v1443_v42 = vadd.f32 %v1441_v41, %v2305_v58 }
 0x66b   : > { %v1814_v43 = vmul.f32 -1.442695, %v1443_v42 }
 0x66d   : > { %1922 = vpow2.f32 %v1814_v43 }
 0x673   : > { %v1923_v44 = vpop.eup %1922 }
 0x674   : > { %v1447_v1 = vadd.f32 1.0, %v1923_v44 }
 0x676   : > { %1924 = vrcp.f32 %v1447_v1  ;;  %v1459_v49 = vand.u32 2147483648, %v1447_v1  ;;  %v1457_v51 = vand.u32 2147483647, %v1447_v1  ;;  %vm1453_vm11 = vweird.f32 %v1447_v1 }
 0x678   : > { %v1460_v53 = vor.u32 1.1754944e-38, %v1459_v49  ;;  %vm1458_vm14 = vcmp.eq.f32.partialorder %v1457_v51, 8.507059e+37 }
 0x67c   : > { %v1925_v45 = vpop.eup %1924 }
 0x67d   : > { %v1449_v46 = vmul.f32 %v1925_v45, %v1447_v1  ;;  %vm1454_vm10 = vweird.f32 %v1925_v45 }
 0x67e   : > { %vm1455_vm12 = vmor %vm1453_vm11, %vm1454_vm10 }
 0x67f   : > { %v1450_v48 = vsub.f32 1.0, %v1449_v46 }
 0x681   : > { %v1451_v50 = vmul.f32 %v1925_v45, %v1450_v48 }
 0x683   : > { %v1452_v52 = vadd.f32 %v1925_v45, %v1451_v50 }
 0x685   : > { %v1456_v54 = vsel %vm1455_vm12, %v1925_v45, %v1452_v52 }
 0x686   : > { %v1461_v56 = vsel %vm1458_vm14, %v1460_v53, %v1456_v54 }
 0x687   : > { %v1468_v57 = vmul.f32 %v1466_v55, %v1461_v56 }
 0x689   : > { %1477 = vrot.lane.b32.xlu1 %v1468_v57, %s1967_s26 }
 0x6f8   : > { %1485 = sbr.rel (%p1815_p8) target bundleno = 1793 (0x701), region = 84 }
 0x6fb   : > { %v1478_v58 = vpop.permute.xlu1 %1477 }
 0x6fc   : > { %1480 = vst.msk [vmem:[#allocation4] sm:$0xf] %vm1473_vm13, %v1478_v58 }
 0x6fd   : > { %1486 = vst.msk [vmem:[%s588_s21] sm:$0xf] %vm1473_vm13, %v1471_v40 }
 0x6fe   : > { %1487 = vst.msk [vmem:[%s592_s29] sm:$0xf] %vm1473_vm13, %v2229_v47 }
 0x6ff   : > { %1488 = vst.msk [vmem:[%s596_s10] sm:$0xf] %vm1473_vm13, %v1478_v58 }
 0x700   : > { %1489 = vst.msk [vmem:[%s600_s30] sm:$0xf] %vm1473_vm13, %v1436_v38 }
 0x701 PF: > { %s2411_s21 = sld [smem:[#allocation8_spill]] }
 0x702   : > { %s2412_s24 = sld [smem:[#allocation6_spill]] }
 0x703   : > { %s2413_s25 = sld [smem:[#allocation7_spill]] }
 0x704   : > { %s2414_s26 = sld [smem:[#allocation9_spill]] }
 0x705   : > { %s2415_s27 = sld [smem:[#allocation10_spill]] }
 0x707   : > { %s28_s28 = sadd.s32 1, %s2411_s21  }
 0x708   : > { %p25_p9 = scmp.ge.s32.totalorder %s28_s28, 10  }
 0x70a   :  { %27 = sbr.rel (!%p25_p9) target bundleno = 8 (0x8), region = 150 }

// kernel: _lambda_.7
= control target key start
LH: loop header
LB: loop body
LE: loop exit
PB: predicated region body
PF: predicated region fallthrough
CT: control target
= control target key end

     0   :  { %s1714_s25 = smov 0   ;;  %s1928_s0 = inlined_call_operand.vmem [shape: f32[6,4,32], index: 0, kind: input, shape index: {}]   ;;  %s1929_s1 = inlined_call_operand.vmem [shape: bf16[3,4,4], index: 1, kind: input, shape index: {}]   ;;  %s1930_s2 = inlined_call_operand.vmem [shape: bf16[3,32,64], index: 2, kind: input, shape index: {}]   ;;  %s1931_s3 = inlined_call_operand.vmem [shape: f32[1,64], index: 3, kind: input, shape index: {}]   ;;  %s1932_s4 = inlined_call_operand.vmem [shape: bf16[3,8,4], index: 4, kind: input, shape index: {}]   ;;  %s1933_s5 = inlined_call_operand.vmem [shape: bf16[3,64,64], index: 5, kind: input, shape index: {}]   ;;  %s1934_s6 = inlined_call_operand.vmem [shape: f32[1,64], index: 6, kind: input, shape index: {}]   ;;  %s1935_s7 = inlined_call_operand.vmem [shape: bf16[3,16,8], index: 7, kind: input, shape index: {}]   ;;  %s1936_s8 = inlined_call_operand.vmem [shape: bf16[3,64,64], index: 8, kind: input, shape index: {}]   ;;  %s1937_s9 = inlined_call_operand.vmem [shape: f32[1,64], index: 9, kind: input, shape index: {}]   ;;  %s1938_s10 = inlined_call_operand.vmem [shape: bf16[3,16,16], index: 10, kind: input, shape index: {}]   ;;  %s1939_s11 = inlined_call_operand.vmem [shape: bf16[3,64,64], index: 11, kind: input, shape index: {}]   ;;  %s1940_s12 = inlined_call_operand.vmem [shape: f32[1,64], index: 12, kind: input, shape index: {}]   ;;  %s1941_s13 = inlined_call_operand.vmem [shape: f32[6,16,64], index: 13, kind: output, shape index: {}]  }
   0x1 LB: > { %s1349_s26 = sadd.s32 4294967295, %s1642_s25   ;;  %p1353_p0 = scmp.ge.s32.totalorder %s1642_s25, 1  ;;  %s1642_s25 = sphi %s1714_s25, %s23_s25  }
   0x2   : > { %p386_p1 = scmp.lt.s32.totalorder %s1642_s25, 7 }
   0x4   : > { %p387_p2 = pnand %p1353_p0, %p386_p1 }
   0x5   : > { %p429_p3 = scmp.lt.s32.totalorder (!%p387_p2), %s1349_s26, 5 }
   0x6   : > { %390 = sbr.rel (%p387_p2) target bundleno = 1200 (0x4b0), region = 72 }
   0xb   : > { %v1579_v0 = vld [vmem:[%s1930_s2 + $0x18] sm:$0xff]  ;;  %v1577_v1 = vld [vmem:[%s1930_s2 + $0x8] sm:$0xff]  ;;  %s1943_s26 = smov (!%p429_p3, %s1349_s26), 5  ;;  %vm461_vm0 = vcmask 1041408   ;;  %v441_v5 = vld [vmem:[%s1929_s1] sm:$0x3] }
   0xc   : > { %518 = vmatpush.bf16.msra.mxu2 %v1579_v0  ;;  %546 = vmatpush.bf16.msra.mxu3 %v1577_v1  ;;  %s1354_s14 = sshll.u32 %s1943_s26, 2  ;;  %vm457_vm1 = vcmask 31744   ;;  %v442_v6 = vld [vmem:[%s1929_s1 + $0x2] sm:$0x3]  ;;  %v443_v7 = vld [vmem:[%s1929_s1 + $0x4] sm:$0x3] }
   0xd   : > { %s432_s17 = scalar_lea.vmem %s1928_s0, %s1354_s14  ;;  %v1578_v8 = vld [vmem:[%s1930_s2 + $0x10] sm:$0xff]  ;;  %v1576_v9 = vld [vmem:[%s1930_s2] sm:$0xff]  ;;  %v1581_v10 = vld [vmem:[%s1930_s2 + $0x28] sm:$0xff]  ;;  %vm508_vm2 = vcmask 261120   ;;  %vm696_vm4 = vcmask 523264   ;;  %vm859_vm6 = vcmask 1043456  }
   0xe   : > { %v439_v2 = vld [vmem:[%s432_s17] sm:$0xf]  ;;  %v1589_v25 = vld [vmem:[%s1933_s5 + $0x38] sm:$0xff]  ;;  %v1588_v30 = vld [vmem:[%s1933_s5 + $0x30] sm:$0xff]  ;;  %vm855_vm7 = vcmask 64512   ;;  %vm1097_vm10 = vcmask 130048  }
   0xf   : > { %v440_v3 = vpack.c.bf16 %v439_v2, %v439_v2  ;;  %v1580_v11 = vld [vmem:[%s1930_s2 + $0x20] sm:$0xff]  ;;  %v1585_v26 = vld [vmem:[%s1933_s5 + $0x18] sm:$0xff]  ;;  %v1584_v31 = vld [vmem:[%s1933_s5 + $0x10] sm:$0xff]  ;;  %s1575_s23 = sshll.u32 %s1943_s26, 4 }
  0x10   : > { %519 = vmatpush.bf16.msra.mxu2 %v1578_v8  ;;  %547 = vmatpush.bf16.msra.mxu3 %v1576_v9  ;;  %v1632_v28 = vld [vmem:[%s1931_s3] ss:$0 sm:$0xff]  ;;  %v1587_v34 = vld [vmem:[%s1933_s5 + $0x28] sm:$0xff]  ;;  %v608_v42 = vld [vmem:[%s1932_s4 + $0x4] sm:$0xf]  ;;  %s437_s30 = scalar_lea.vmem %s1941_s13, %s1575_s23 }
  0x11   : > { %v463_v4 = vsel %vm461_vm0, %v440_v3, 0  ;;  %v1583_v35 = vld [vmem:[%s1933_s5 + $0x8] sm:$0xff]  ;;  %v607_v41 = vld [vmem:[%s1932_s4] sm:$0xf]  ;;  %v1593_v46 = vld [vmem:[%s1933_s5 + $0x58] sm:$0xff] }
  0x12   : > { %472 = vmatpush.bf16.msra.mxu0 %v463_v4  ;;  %489 = vmatpush.bf16.msra.mxu1 %v463_v4  ;;  %v609_v43 = vld [vmem:[%s1932_s4 + $0x8] sm:$0xf]  ;;  %v1586_v44 = vld [vmem:[%s1933_s5 + $0x20] sm:$0xff]  ;;  %v1592_v47 = vld [vmem:[%s1933_s5 + $0x50] sm:$0xff] }
  0x13   : > { %v1582_v45 = vld [vmem:[%s1933_s5] sm:$0xff]  ;;  %v1591_v48 = vld [vmem:[%s1933_s5 + $0x48] sm:$0xff]  ;;  %v1604_v63 = vld [vmem:[%s1936_s8 + $0x38] sm:$0xff] }
  0x14   : > { %v1590_v49 = vld [vmem:[%s1933_s5 + $0x40] sm:$0xff]  ;;  %v1600_v0 = vld [vmem:[%s1936_s8 + $0x18] sm:$0xff] }
  0x15   : > { %1357 = vmatmul.msk.bf16.vlgmr.msra.gmra.mxu0 %vm457_vm1, %v441_v5  ;;  %1358 = vmatmul.msk.bf16.vlgmr.msra.gmra.mxu1 %vm457_vm1, %v442_v6  ;;  %v1633_v2 = vld [vmem:[%s1934_s6] ss:$0 sm:$0xff] }
  0x16   : > { %563 = vmatpush.bf16.msrb.mxu0 %v463_v4  ;;  %591 = vmatpush.bf16.msrb.mxu1 %v1581_v10 }
  0x1a   : > { %592 = vmatpush.bf16.msrb.mxu1 %v1580_v11  ;;  %704 = vmatpush.bf16.msra.mxu0 %v1589_v25  ;;  %v1594_v11 = vld [vmem:[%s1935_s7] sm:$0xff] }
  0x1e   : > { %744 = vmatpush.bf16.msra.mxu1 %v1585_v26  ;;  %705 = vmatpush.bf16.msra.mxu0 %v1588_v30 }
  0x22   : > { %745 = vmatpush.bf16.msra.mxu1 %v1584_v31  ;;  %706 = vmatpush.bf16.msra.mxu0 %v1587_v34 }
  0x25   : > { %1377 = vmatmul.msk.bf16.vlgmr.msrb.gmra.mxu0 %vm457_vm1, %v443_v7 }
  0x26   : > { %746 = vmatpush.bf16.msra.mxu1 %v1583_v35  ;;  %707 = vmatpush.bf16.msra.mxu0 %v1586_v44 }
  0x2a   : > { %747 = vmatpush.bf16.msra.mxu1 %v1582_v45 }
  0x92   : > { %v474_v12 = vpop.f32.mrf.mxu0  ;;  %v491_v13 = vpop.f32.mrf.mxu1 }
  0x93   : > { %v478_v14 = vpack.c.bf16 %v474_v12, %v474_v12  ;;  %v495_v15 = vpack.c.bf16 %v491_v13, %v491_v13  ;;  %v1595_v12 = vld [vmem:[%s1935_s7 + $0x8] sm:$0xff]  ;;  %v1596_v13 = vld [vmem:[%s1935_s7 + $0x10] sm:$0xff] }
  0x95   : > { %1367 = vmatmul.msk.bf16.vlgmr.msra.gmra.mxu2 %vm508_vm2, %v495_v15  ;;  %1376 = vmatmul.msk.bf16.vlgmr.msra.gmra.mxu3 %vm508_vm2, %v478_v14  ;;  %v1603_v14 = vld [vmem:[%s1936_s8 + $0x30] sm:$0xff] }
  0x96   : > { %v1599_v15 = vld [vmem:[%s1936_s8 + $0x10] sm:$0xff] }
  0x9a   : > { %v476_v16 = vpop.f32.mrf.mxu0  ;;  %v493_v17 = vpop.f32.mrf.mxu1 }
  0x9b   : > { %v1602_v16 = vld [vmem:[%s1936_s8 + $0x28] sm:$0xff] }
  0x9c   : > { %v1598_v17 = vld [vmem:[%s1936_s8 + $0x8] sm:$0xff] }
  0xa2   : > { %v565_v18 = vpop.f32.mrf.mxu0 }
  0xa3   : > { %v569_v19 = vpack.c.bf16 %v565_v18, %v565_v18  ;;  %v1601_v18 = vld [vmem:[%s1936_s8 + $0x20] sm:$0xff] }
  0xa5   : > { %1386 = vmatmul.msk.bf16.vlgmr.msrb.gmra.mxu1 %vm508_vm2, %v569_v19  ;;  %v1597_v19 = vld [vmem:[%s1936_s8] sm:$0xff] }
  0xaa   : > { %v567_v20 = vpop.f32.mrf.mxu0 }
  0xab   : > { %v1608_v20 = vld [vmem:[%s1936_s8 + $0x58] sm:$0xff] }
 0x118   : > { %v521_v21 = vpop.f32.mrf.mxu2  ;;  %v549_v22 = vpop.f32.mrf.mxu3 }
 0x119   : > { %v550_v27 = vadd.f32 %v549_v22, %v521_v21  ;;  %v1607_v21 = vld [vmem:[%s1936_s8 + $0x50] sm:$0xff]  ;;  %v1606_v22 = vld [vmem:[%s1936_s8 + $0x48] sm:$0xff] }
 0x120   : > { %v523_v23 = vpop.f32.mrf.mxu2  ;;  %v551_v24 = vpop.f32.mrf.mxu3 }
 0x121   : > { %v1605_v23 = vld [vmem:[%s1936_s8 + $0x40] sm:$0xff] }
 0x122   : > { %v594_v29 = vpop.f32.mrf.mxu1 }
 0x123   : > { %v598_v32 = vadd.f32 %v594_v29, %v550_v27 }
 0x125   : > { %v602_v33 = vadd.f32 %v1632_v28, %v598_v32 }
 0x127   : > { %v604_v36 = vmul.f32 0.01, %v602_v33  ;;  %vm603_vm3 = vcmp.ge.f32.partialorder %v602_v33, 0.0 }
 0x129   : > { %v605_v37 = vsel %vm603_vm3, %v602_v33, %v604_v36 }
 0x12a   : > { %v596_v38 = vpop.f32.mrf.mxu1  ;;  %v606_v39 = vpack.c.bf16 %v605_v37, %v605_v37 }
 0x12b   : > { %v1634_v38 = vld [vmem:[%s1937_s9] ss:$0 sm:$0xff] }
 0x12c   : > { %v639_v40 = vsel %vm461_vm0, %v606_v39, 0 }
 0x12d   : > { %648 = vmatpush.bf16.msrb.mxu2 %v639_v40  ;;  %665 = vmatpush.bf16.msrb.mxu3 %v639_v40 }
 0x130   : > { %1387 = vmatmul.msk.bf16.vlgmr.msrb.gmra.mxu2 %vm457_vm1, %v607_v41  ;;  %1388 = vmatmul.msk.bf16.vlgmr.msrb.gmra.mxu3 %vm457_vm1, %v608_v42  ;;  %v1619_v41 = vld [vmem:[%s1939_s11 + $0x38] sm:$0xff] }
 0x131   : > { %763 = vmatpush.bf16.msra.mxu2 %v639_v40  ;;  %801 = vmatpush.bf16.msra.mxu3 %v1593_v46  ;;  %v1615_v42 = vld [vmem:[%s1939_s11 + $0x18] sm:$0xff] }
 0x135   : > { %802 = vmatpush.bf16.msra.mxu3 %v1592_v47  ;;  %932 = vmatpush.bf16.msrb.mxu2 %v1604_v63  ;;  %v1622_v63 = vld [vmem:[%s1939_s11 + $0x50] sm:$0xff] }
 0x139   : > { %803 = vmatpush.bf16.msra.mxu3 %v1591_v48  ;;  %933 = vmatpush.bf16.msrb.mxu2 %v1603_v14  ;;  %v1635_v14 = vld [vmem:[%s1940_s12] ss:$0 sm:$0xff] }
 0x13d   : > { %804 = vmatpush.bf16.msra.mxu3 %v1590_v49  ;;  %934 = vmatpush.bf16.msrb.mxu2 %v1602_v16 }
 0x140   : > { %1423 = vmatmul.msk.bf16.vlgmr.msra.gmra.mxu2 %vm457_vm1, %v609_v43 }
 0x141   : > { %973 = vmatpush.bf16.msrb.mxu3 %v1600_v0  ;;  %935 = vmatpush.bf16.msrb.mxu2 %v1601_v18  ;;  %v1621_v0 = vld [vmem:[%s1939_s11 + $0x48] sm:$0xff] }
 0x145   : > { %974 = vmatpush.bf16.msrb.mxu3 %v1599_v15 }
 0x149   : > { %975 = vmatpush.bf16.msrb.mxu3 %v1598_v17 }
 0x14d   : > { %976 = vmatpush.bf16.msrb.mxu3 %v1597_v19 }
 0x1b3   : > { %v650_v50 = vpop.f32.mrf.mxu2  ;;  %v667_v51 = vpop.f32.mrf.mxu3 }
 0x1b4   : > { %v654_v52 = vpack.c.bf16 %v650_v50, %v650_v50  ;;  %v671_v53 = vpack.c.bf16 %v667_v51, %v667_v51 }
 0x1b6   : > { %1405 = vmatmul.msk.bf16.vlgmr.msra.gmra.mxu0 %vm696_vm4, %v671_v53  ;;  %1422 = vmatmul.msk.bf16.vlgmr.msra.gmra.mxu1 %vm696_vm4, %v654_v52  ;;  %v1609_v53 = vld [vmem:[%s1938_s10] sm:$0xff] }
 0x1bb   : > { %v652_v54 = vpop.f32.mrf.mxu2  ;;  %v669_v55 = vpop.f32.mrf.mxu3 }
 0x1bc   : > { %v1610_v54 = vld [vmem:[%s1938_s10 + $0x8] sm:$0xff]  ;;  %v1611_v55 = vld [vmem:[%s1938_s10 + $0x10] sm:$0xff] }
 0x1c3   : > { %v765_v56 = vpop.f32.mrf.mxu2 }
 0x1c4   : > { %v769_v57 = vpack.c.bf16 %v765_v56, %v765_v56  ;;  %v1618_v56 = vld [vmem:[%s1939_s11 + $0x30] sm:$0xff] }
 0x1c6   : > { %1440 = vmatmul.msk.bf16.vlgmr.msra.gmra.mxu3 %vm696_vm4, %v769_v57  ;;  %v1614_v57 = vld [vmem:[%s1939_s11 + $0x10] sm:$0xff] }
 0x1cb   : > { %v767_v58 = vpop.f32.mrf.mxu2 }
 0x1cc   : > { %v1617_v58 = vld [vmem:[%s1939_s11 + $0x28] sm:$0xff] }
 0x233   : > { %v709_v59 = vpop.f32.mrf.mxu0  ;;  %v749_v60 = vpop.f32.mrf.mxu1 }
 0x234   : > { %v750_v1 = vadd.f32 %v749_v60, %v709_v59  ;;  %v1613_v59 = vld [vmem:[%s1939_s11 + $0x8] sm:$0xff]  ;;  %v1616_v60 = vld [vmem:[%s1939_s11 + $0x20] sm:$0xff] }
 0x23b   : > { %v751_v61 = vpop.f32.mrf.mxu1  ;;  %v711_v62 = vpop.f32.mrf.mxu0 }
 0x23c   : > { %v1612_v61 = vld [vmem:[%s1939_s11] sm:$0xff]  ;;  %v1623_v62 = vld [vmem:[%s1939_s11 + $0x58] sm:$0xff] }
 0x249   : > { %v806_v3 = vpop.f32.mrf.mxu3 }
 0x24a   : > { %v810_v4 = vadd.f32 %v806_v3, %v750_v1  ;;  %v1620_v1 = vld [vmem:[%s1939_s11 + $0x40] sm:$0xff] }
 0x24c   : > { %v814_v5 = vadd.f32 %v1633_v2, %v810_v4 }
 0x24e   : > { %vm815_vm5 = vcmp.ge.f32.partialorder %v814_v5, 0.0  ;;  %v816_v6 = vmul.f32 0.01, %v814_v5 }
 0x250   : > { %v817_v7 = vsel %vm815_vm5, %v814_v5, %v816_v6 }
 0x251   : > { %v808_v8 = vpop.f32.mrf.mxu3  ;;  %v818_v9 = vpack.c.bf16 %v817_v7, %v817_v7 }
 0x253   : > { %v861_v10 = vsel %vm859_vm6, %v818_v9, 0 }
 0x254   : > { %870 = vmatpush.bf16.msrb.mxu0 %v861_v10  ;;  %893 = vmatpush.bf16.msrb.mxu1 %v861_v10 }
 0x257   : > { %1445 = vmatmul.msk.bf16.vlgmr.msrb.gmra.mxu0 %vm855_vm7, %v1594_v11  ;;  %1450 = vmatmul.msk.bf16.vlgmr.msrb.gmra.mxu1 %vm855_vm7, %v1595_v12 }
 0x258   : > { %998 = vmatpush.bf16.msra.mxu0 %v861_v10  ;;  %1037 = vmatpush.bf16.msra.mxu1 %v1608_v20 }
 0x25c   : > { %1038 = vmatpush.bf16.msra.mxu1 %v1607_v21  ;;  %1170 = vmatpush.bf16.msrb.mxu0 %v1619_v41 }
 0x260   : > { %1039 = vmatpush.bf16.msra.mxu1 %v1606_v22  ;;  %1171 = vmatpush.bf16.msrb.mxu0 %v1618_v56 }
 0x264   : > { %1040 = vmatpush.bf16.msra.mxu1 %v1605_v23  ;;  %1172 = vmatpush.bf16.msrb.mxu0 %v1617_v58 }
 0x267   : > { %1489 = vmatmul.msk.bf16.vlgmr.msra.gmra.mxu0 %vm855_vm7, %v1596_v13 }
 0x268   : > { %1211 = vmatpush.bf16.msrb.mxu1 %v1615_v42  ;;  %1173 = vmatpush.bf16.msrb.mxu0 %v1616_v60 }
 0x26c   : > { %1212 = vmatpush.bf16.msrb.mxu1 %v1614_v57 }
 0x270   : > { %1213 = vmatpush.bf16.msrb.mxu1 %v1613_v59 }
 0x274   : > { %1214 = vmatpush.bf16.msrb.mxu1 %v1612_v61 }
 0x2d4   : > { %v872_v24 = vpop.f32.mrf.mxu0  ;;  %v895_v25 = vpop.f32.mrf.mxu1 }
 0x2dc   : > { %v874_v26 = vpop.f32.mrf.mxu0  ;;  %v897_v27 = vpop.f32.mrf.mxu1 }
 0x2dd   : > { %v877_v28 = vpack.c.bf16 %v874_v26, %v872_v24  ;;  %v900_v29 = vpack.c.bf16 %v897_v27, %v895_v25 }
 0x2df   : > { %1467 = vmatmul.msk.bf16.vlgmr.msrb.gmra.mxu2 %vm696_vm4, %v900_v29  ;;  %1484 = vmatmul.msk.bf16.vlgmr.msrb.gmra.mxu3 %vm696_vm4, %v877_v28 }
 0x2e4   : > { %v1000_v30 = vpop.f32.mrf.mxu0 }
 0x2ec   : > { %v1002_v31 = vpop.f32.mrf.mxu0 }
 0x2ed   : > { %v1005_v32 = vpack.c.bf16 %v1002_v31, %v1000_v30 }
 0x2ef   : > { %1506 = vmatmul.msk.bf16.vlgmr.msra.gmra.mxu1 %vm696_vm4, %v1005_v32 }
 0x362   : > { %v937_v33 = vpop.f32.mrf.mxu2  ;;  %v978_v34 = vpop.f32.mrf.mxu3 }
 0x363   : > { %v979_v36 = vadd.f32 %v978_v34, %v937_v33 }
 0x36a   : > { %v939_v39 = vpop.f32.mrf.mxu2  ;;  %v980_v40 = vpop.f32.mrf.mxu3 }
 0x36b   : > { %v981_v43 = vadd.f32 %v980_v40, %v939_v39 }
 0x36c   : > { %v1042_v35 = vpop.f32.mrf.mxu1 }
 0x36d   : > { %v1047_v37 = vadd.f32 %v1042_v35, %v979_v36 }
 0x36f   : > { %v1052_v44 = vadd.f32 %v1634_v38, %v1047_v37 }
 0x371   : > { %v1056_v47 = vmul.f32 0.01, %v1052_v44  ;;  %vm1054_vm8 = vcmp.ge.f32.partialorder %v1052_v44, 0.0 }
 0x373   : > { %v1058_v50 = vsel %vm1054_vm8, %v1052_v44, %v1056_v47 }
 0x374   : > { %v1044_v45 = vpop.f32.mrf.mxu1 }
 0x375   : > { %v1048_v46 = vadd.f32 %v1044_v45, %v981_v43 }
 0x377   : > { %v1053_v48 = vadd.f32 %v1634_v38, %v1048_v46 }
 0x379   : > { %vm1055_vm9 = vcmp.ge.f32.partialorder %v1053_v48, 0.0  ;;  %v1057_v49 = vmul.f32 0.01, %v1053_v48 }
 0x37b   : > { %v1059_v51 = vsel %vm1055_vm9, %v1053_v48, %v1057_v49 }
 0x37c   : > { %v1060_v52 = vpack.c.bf16 %v1059_v51, %v1058_v50 }
 0x37e   : > { %1108 = vmatpush.bf16.msra.mxu2 %v1060_v52  ;;  %1131 = vmatpush.bf16.msra.mxu3 %v1060_v52 }
 0x381   : > { %1511 = vmatmul.msk.bf16.vlgmr.msra.gmra.mxu2 %vm1097_vm10, %v1609_v53  ;;  %1516 = vmatmul.msk.bf16.vlgmr.msra.gmra.mxu3 %vm1097_vm10, %v1610_v54 }
 0x382   : > { %1236 = vmatpush.bf16.msrb.mxu2 %v1060_v52  ;;  %1275 = vmatpush.bf16.msrb.mxu3 %v1623_v62 }
 0x386   : > { %1276 = vmatpush.bf16.msrb.mxu3 %v1622_v63 }
 0x38a   : > { %1277 = vmatpush.bf16.msrb.mxu3 %v1621_v0 }
 0x38e   : > { %1278 = vmatpush.bf16.msrb.mxu3 %v1620_v1 }
 0x391   : > { %1555 = vmatmul.msk.bf16.vlgmr.msrb.gmra.mxu2 %vm1097_vm10, %v1611_v55 }
 0x404   : > { %v1110_v2 = vpop.f32.mrf.mxu2  ;;  %v1133_v3 = vpop.f32.mrf.mxu3 }
 0x40c   : > { %v1112_v4 = vpop.f32.mrf.mxu2  ;;  %v1135_v5 = vpop.f32.mrf.mxu3 }
 0x40d   : > { %v1115_v6 = vpack.c.bf16 %v1112_v4, %v1110_v2  ;;  %v1138_v7 = vpack.c.bf16 %v1135_v5, %v1133_v3 }
 0x40f   : > { %1533 = vmatmul.msk.bf16.vlgmr.msrb.gmra.mxu0 %vm696_vm4, %v1138_v7  ;;  %1550 = vmatmul.msk.bf16.vlgmr.msrb.gmra.mxu1 %vm696_vm4, %v1115_v6 }
 0x414   : > { %v1238_v8 = vpop.f32.mrf.mxu2 }
 0x41c   : > { %v1240_v9 = vpop.f32.mrf.mxu2 }
 0x41d   : > { %v1243_v10 = vpack.c.bf16 %v1240_v9, %v1238_v8 }
 0x41f   : > { %1572 = vmatmul.msk.bf16.vlgmr.msrb.gmra.mxu3 %vm696_vm4, %v1243_v10 }
 0x48c   : > { %v1175_v11 = vpop.f32.mrf.mxu0  ;;  %v1216_v12 = vpop.f32.mrf.mxu1 }
 0x48d   : > { %v1217_v13 = vadd.f32 %v1216_v12, %v1175_v11 }
 0x494   : > { %v1177_v18 = vpop.f32.mrf.mxu0  ;;  %v1218_v19 = vpop.f32.mrf.mxu1 }
 0x495   : > { %v1219_v20 = vadd.f32 %v1218_v19, %v1177_v18 }
 0x4a2   : > { %v1280_v15 = vpop.f32.mrf.mxu3 }
 0x4a3   : > { %v1285_v16 = vadd.f32 %v1280_v15, %v1217_v13 }
 0x4a5   : > { %v1290_v17 = vadd.f32 %v1635_v14, %v1285_v16 }
 0x4a7   : > { %1292 = vst.msk [vmem:[%s437_s30] sm:$0xff] %vm696_vm4, %v1290_v17 }
 0x4aa   : > { %v1282_v21 = vpop.f32.mrf.mxu3 }
 0x4ab   : > { %v1286_v22 = vadd.f32 %v1282_v21, %v1219_v20 }
 0x4ad   : > { %v1291_v23 = vadd.f32 %v1635_v14, %v1286_v22 }
 0x4af   : > { %1293 = vst.msk [vmem:[%s437_s30 + $0x8] sm:$0xff] %vm696_vm4, %v1291_v23 }
 0x4b0 PF: > { %s23_s25 = sadd.s32 1, %s1642_s25  }
 0x4b1   : > { %p20_p4 = scmp.ge.s32.totalorder %s23_s25, 8  }
 0x4b3   :  { %22 = sbr.rel (!%p20_p4) target bundleno = 1 (0x1), region = 102 }

</bundles_post_ra>
